<compile_context>
chip_gen: v7x
topology: tpu7x:2x2x1
jax: 0.10.0
libtpu: 0.0.40
codegen_flags: <defaults>
</compile_context>

<pallas_src>
import functools
import numpy as np
import jax
import jax.numpy as jnp
from jax import lax
from jax.experimental import pallas as pl
from jax.experimental.pallas import tpu as pltpu

P = 128  # lane width: one 128-lane slab per LSTM gate


def tagger_kernel(char_emb_ref,   # [T_c*N, E_c] f32  time-major flattened char embeddings
                  lengths_ref,    # [N, 1]       i32  per-word char lengths
                  word_emb_ref,   # [N, E_w]     f32
                  cw_ih_ref,      # [E_c, 4P]    f32  char LSTM W_ih^T, gate-padded
                  cw_hh_ref,      # [P, 4P]      f32  char LSTM W_hh^T, gate-padded (rows>=H_c zero)
                  cb_ref,         # [1, 4P]      f32  char LSTM b_ih+b_hh, gate-padded
                  ww_ih_w_ref,    # [E_w, 4P]    f32  word LSTM W_ih^T (word-emb rows), gate-padded
                  ww_ih_c_ref,    # [P, 4P]      f32  word LSTM W_ih^T (char-hidden rows), gate-padded
                  ww_hh_ref,      # [P, 4P]      f32  word LSTM W_hh^T, gate-padded (rows>=H_w zero)
                  wb_ref,         # [1, 4P]      f32  word LSTM b_ih+b_hh, gate-padded
                  lw_ref,         # [P, P]       f32  hidden2tag W^T, zero-padded
                  lb_ref,         # [1, P]       f32  hidden2tag bias, zero-padded
                  out_ref,        # [N, P]       f32  log-softmax scores (lanes >= t_tag garbage)
                  xproj_ref,      # scratch VMEM [T_c*N, 4P]
                  *, t_tag):
    TN, _ = char_emb_ref.shape
    N = lengths_ref.shape[0]
    T_c = TN // N

    # ---- char-LSTM input projection: one batched matmul, bias folded in -----
    xproj_ref[...] = (
        jnp.dot(char_emb_ref[...], cw_ih_ref[...], preferred_element_type=jnp.float32)
        + cb_ref[...])                                     # [T_c*N, 4P]

    # ---- hoisted loop-invariants (off the serial chain) ---------------------
    lengths = lengths_ref[...]                             # [N, 1] i32
    keep = [lengths > t for t in range(T_c)]               # per-step bool masks, hoisted
    cw_hh = cw_hh_ref[...]                                 # [P, 4P] weight load, hoisted

    # TODO(synk): weight-stationary MXU driving (pltpu.matmul_push_rhs /
    # matmul_acc_lhs / matmul_pop) would keep cw_hh / ww_hh resident in the MXU
    # staging registers across the unrolled steps; kept as jnp.dot for
    # portability across v5e/v6e/v7x lowering.

    # ---- char LSTM recurrence (batched over words, masked, fully unrolled) --
    h = jnp.zeros((N, P), jnp.float32)                     # lanes >= H_c stay 0
    c = jnp.zeros((N, P), jnp.float32)
    for t in range(T_c):                                   # static trip count
        x_t = xproj_ref[pl.ds(t * N, N), :]                # static slice [N, 4P]
        gates = jnp.dot(h, cw_hh, preferred_element_type=jnp.float32) + x_t
        i = jax.nn.sigmoid(gates[:, 0 * P:1 * P])          # whole-vreg gate slabs
        f = jax.nn.sigmoid(gates[:, 1 * P:2 * P])
        g = jnp.tanh(gates[:, 2 * P:3 * P])
        o = jax.nn.sigmoid(gates[:, 3 * P:4 * P])
        c_new = f * c + i * g
        h_new = o * jnp.tanh(c_new)
        # freeze state once past this word's char length (pack_padded h_n semantics)
        h = jnp.where(keep[t], h_new, h)
        c = jnp.where(keep[t], c_new, c)
    h_char = h                                             # [N, P], padded lanes are 0

    # ---- word-LSTM input projection (full batch, replaces the concat) -------
    xw = (jnp.dot(word_emb_ref[...], ww_ih_w_ref[...], preferred_element_type=jnp.float32)
          + jnp.dot(h_char, ww_ih_c_ref[...], preferred_element_type=jnp.float32)
          + wb_ref[...])                                   # [N, 4P]

    # ---- word LSTM recurrence (batch = 1, fully unrolled, no scratch) -------
    ww_hh = ww_hh_ref[...]                                 # hoisted weight load
    hw = jnp.zeros((1, P), jnp.float32)
    cw = jnp.zeros((1, P), jnp.float32)
    hs = []
    for t in range(N):                                     # static trip count
        gates = jnp.dot(hw, ww_hh, preferred_element_type=jnp.float32) + xw[t:t + 1, :]
        i = jax.nn.sigmoid(gates[:, 0 * P:1 * P])
        f = jax.nn.sigmoid(gates[:, 1 * P:2 * P])
        g = jnp.tanh(gates[:, 2 * P:3 * P])
        o = jax.nn.sigmoid(gates[:, 3 * P:4 * P])
        cw = f * cw + i * g
        hw = o * jnp.tanh(cw)
        hs.append(hw)                                      # keep rows as values
    lstm_out = jnp.concatenate(hs, axis=0)                 # [N, P], one vreg

    # ---- hidden2tag + masked log_softmax (lane-dense output slab) -----------
    tag_space = jnp.dot(lstm_out, lw_ref[...],
                        preferred_element_type=jnp.float32) + lb_ref[...]   # [N, P]
    lane = lax.broadcasted_iota(jnp.int32, tag_space.shape, 1)
    tag_space = jnp.where(lane < t_tag, tag_space, -1e30)
    mmax = jnp.max(tag_space, axis=1, keepdims=True)
    z = tag_space - mmax
    lse = jnp.log(jnp.sum(jnp.exp(z), axis=1, keepdims=True))
    out_ref[...] = z - lse


# --------------------------- one-time weight prep ----------------------------
def _pad_gate_cols(w, H):
    """[in, 4H] -> [in, 4P]: gate k moved to lanes [k*P, k*P+H), rest zero."""
    parts = []
    for k in range(4):
        g = w[:, k * H:(k + 1) * H]
        parts.append(jnp.pad(g, ((0, 0), (0, P - H))))
    return jnp.concatenate(parts, axis=1)


def _pad_rows(w, rows):
    return jnp.pad(w, ((0, rows - w.shape[0]), (0, 0)))


def prepare_params(params):
    """One-time parameter preprocessing (hoisted out of the per-call path).

    Returns a dict of device arrays already in the gate-slab / padded layouts
    the kernel consumes, so the per-call wrapper emits no pad/transpose ops.
    """
    E_w = params["word_embedding"].shape[1]
    H_c = params["char_lstm_w_hh"].shape[1]
    H_w = params["word_lstm_w_hh"].shape[1]
    T_tag = params["hidden2tag_w"].shape[0]
    ww_ih_T = params["word_lstm_w_ih"].T                                  # [E_w+H_c, 4H_w]

    prepared = {
        "char_embedding": params["char_embedding"].astype(jnp.float32),
        "word_embedding": params["word_embedding"].astype(jnp.float32),
        "cw_ih": _pad_gate_cols(params["char_lstm_w_ih"].T.astype(jnp.float32), H_c),
        "cw_hh": _pad_rows(_pad_gate_cols(params["char_lstm_w_hh"].T.astype(jnp.float32), H_c), P),
        "cb": _pad_gate_cols(
            (params["char_lstm_b_ih"] + params["char_lstm_b_hh"]).reshape(1, -1).astype(jnp.float32), H_c),
        "ww_ih_w": _pad_gate_cols(ww_ih_T[:E_w].astype(jnp.float32), H_w),
        "ww_ih_c": _pad_rows(_pad_gate_cols(ww_ih_T[E_w:].astype(jnp.float32), H_w), P),
        "ww_hh": _pad_rows(_pad_gate_cols(params["word_lstm_w_hh"].T.astype(jnp.float32), H_w), P),
        "wb": _pad_gate_cols(
            (params["word_lstm_b_ih"] + params["word_lstm_b_hh"]).reshape(1, -1).astype(jnp.float32), H_w),
        "lw": jnp.pad(params["hidden2tag_w"].T.astype(jnp.float32),
                      ((0, P - H_w), (0, P - T_tag))),
        "lb": jnp.pad(params["hidden2tag_b"].reshape(1, -1).astype(jnp.float32),
                      ((0, 0), (0, P - T_tag))),
    }
    return jax.tree_util.tree_map(jnp.asarray, prepared), int(T_tag)


# ------------------------------- forward path --------------------------------
def _tagger_apply(prepared, sentence_word, sentence_char, char_seq_lengths, t_tag):
    """Per-call path: embedding gathers + layout glue + one pallas_call."""
    N = sentence_word.shape[0]
    T_c = sentence_char.shape[1]

    char_emb = jnp.take(prepared["char_embedding"], sentence_char, axis=0)   # [N,T_c,E_c]
    word_emb = jnp.take(prepared["word_embedding"], sentence_word, axis=0)   # [N,E_w]
    E_c = char_emb.shape[2]

    # Time-major, flattened so the kernel's per-step read is a static sublane slice.
    char_emb_tm = jnp.transpose(char_emb, (1, 0, 2)).reshape(T_c * N, E_c)
    lengths2d = char_seq_lengths.reshape(N, 1).astype(jnp.int32)

    vmem = pl.BlockSpec(memory_space=pltpu.MemorySpace.VMEM)
    kernel = functools.partial(tagger_kernel, t_tag=t_tag)
    # TODO(synk): for batches of sentences add a leading "parallel" grid axis
    # (with per-sentence BlockSpec slices and a v7x-sized VMEM budget) so v7x's
    # second TensorCore isn't idle; single-sentence forward needs no grid.
    out = pl.pallas_call(
        kernel,
        out_shape=jax.ShapeDtypeStruct((N, P), jnp.float32),
        in_specs=[vmem] * 12,
        out_specs=vmem,
        scratch_shapes=[
            pltpu.VMEM((T_c * N, 4 * P), jnp.float32),   # precomputed char input proj
        ],
    )(char_emb_tm, lengths2d, word_emb,
      prepared["cw_ih"], prepared["cw_hh"], prepared["cb"],
      prepared["ww_ih_w"], prepared["ww_ih_c"], prepared["ww_hh"], prepared["wb"],
      prepared["lw"], prepared["lb"])
    return out[:, :t_tag]


def make_tagger_forward(params):
    """Builds a jitted forward with all weight preprocessing done exactly once."""
    prepared, t_tag = prepare_params(params)

    @jax.jit
    def forward(prepared_, sentence_word, sentence_char, char_seq_lengths):
        return _tagger_apply(prepared_, sentence_word, sentence_char,
                             char_seq_lengths, t_tag)

    return functools.partial(forward, prepared)


# ----------------------- pure-JAX reference (for checking) -------------------
def reference_forward(params, sentence_word, sentence_char, char_seq_lengths):
    char_emb = jnp.take(params["char_embedding"], sentence_char, axis=0)
    word_emb = jnp.take(params["word_embedding"], sentence_word, axis=0)
    N, T_c, _ = char_emb.shape
    H_c = params["char_lstm_w_hh"].shape[1]
    H_w = params["word_lstm_w_hh"].shape[1]

    def lstm_cell(x, h, c, w_ih, w_hh, b_ih, b_hh, H):
        g = x @ w_ih.T + h @ w_hh.T + b_ih + b_hh
        i = jax.nn.sigmoid(g[:, :H]); f = jax.nn.sigmoid(g[:, H:2*H])
        gg = jnp.tanh(g[:, 2*H:3*H]); o = jax.nn.sigmoid(g[:, 3*H:])
        c_new = f * c + i * gg
        return o * jnp.tanh(c_new), c_new

    h = jnp.zeros((N, H_c)); c = jnp.zeros((N, H_c))
    for t in range(T_c):
        h_new, c_new = lstm_cell(char_emb[:, t, :], h, c,
                                 params["char_lstm_w_ih"], params["char_lstm_w_hh"],
                                 params["char_lstm_b_ih"], params["char_lstm_b_hh"], H_c)
        m = (t < char_seq_lengths).reshape(N, 1).astype(jnp.float32)
        h = m * h_new + (1 - m) * h
        c = m * c_new + (1 - m) * c
    concat = jnp.concatenate([word_emb, h], axis=1)
    hw = jnp.zeros((1, H_w)); cw = jnp.zeros((1, H_w))
    outs = []
    for t in range(N):
        hw, cw = lstm_cell(concat[t:t+1], hw, cw,
                           params["word_lstm_w_ih"], params["word_lstm_w_hh"],
                           params["word_lstm_b_ih"], params["word_lstm_b_hh"], H_w)
        outs.append(hw)
    lstm_out = jnp.concatenate(outs, axis=0)
    tag_space = lstm_out @ params["hidden2tag_w"].T + params["hidden2tag_b"]
    return jax.nn.log_softmax(tag_space, axis=1)


if __name__ == "__main__":
    # Small, deterministic configuration.
    char_vocab_size, char_embedding_dim, char_hidden_dim = 20, 8, 16
    vocab_size, word_embedding_dim, word_hidden_dim = 30, 12, 32
    tagset_size = 6
    N_words, T_char = 8, 10

    key = jax.random.PRNGKey(0)
    ks = jax.random.split(key, 16)

    def uni(k, shape, bound):
        return jax.random.uniform(k, shape, jnp.float32, -bound, bound)

    bc = 1.0 / np.sqrt(char_hidden_dim)
    bw = 1.0 / np.sqrt(word_hidden_dim)
    params = {
        "char_embedding": jax.random.normal(ks[0], (char_vocab_size, char_embedding_dim), jnp.float32),
        "word_embedding": jax.random.normal(ks[1], (vocab_size, word_embedding_dim), jnp.float32),
        "char_lstm_w_ih": uni(ks[2], (4 * char_hidden_dim, char_embedding_dim), bc),
        "char_lstm_w_hh": uni(ks[3], (4 * char_hidden_dim, char_hidden_dim), bc),
        "char_lstm_b_ih": uni(ks[4], (4 * char_hidden_dim,), bc),
        "char_lstm_b_hh": uni(ks[5], (4 * char_hidden_dim,), bc),
        "word_lstm_w_ih": uni(ks[6], (4 * word_hidden_dim, word_embedding_dim + char_hidden_dim), bw),
        "word_lstm_w_hh": uni(ks[7], (4 * word_hidden_dim, word_hidden_dim), bw),
        "word_lstm_b_ih": uni(ks[8], (4 * word_hidden_dim,), bw),
        "word_lstm_b_hh": uni(ks[9], (4 * word_hidden_dim,), bw),
        "hidden2tag_w": uni(ks[10], (tagset_size, word_hidden_dim), bw),
        "hidden2tag_b": uni(ks[11], (tagset_size,), bw),
    }

    # Inputs: word indices, padded char indices, descending char lengths
    # (pack_padded_sequence requires sorted lengths in the PyTorch module).
    sentence_word = jax.random.randint(ks[12], (N_words,), 0, vocab_size, jnp.int32)
    sentence_char = jax.random.randint(ks[13], (N_words, T_char), 0, char_vocab_size, jnp.int32)
    char_seq_lengths = jnp.sort(
        jax.random.randint(ks[14], (N_words,), 2, T_char + 1, jnp.int32))[::-1]

    # Weight preprocessing happens exactly once, here.
    tagger_forward = make_tagger_forward(params)

    tag_scores = tagger_forward(sentence_word, sentence_char, char_seq_lengths)
    tag_scores = jax.block_until_ready(tag_scores)

    ref = reference_forward(params, sentence_word, sentence_char, char_seq_lengths)
    assert tag_scores.shape == (N_words, tagset_size)
    assert np.allclose(np.asarray(tag_scores), np.asarray(ref), rtol=1e-4, atol=1e-4), \
        "Pallas kernel does not match JAX reference"
    print("KERNEL_OK")
</pallas_src>

<mosaic_0001>
module attributes {stable_mosaic.version = 11 : i64} {
  func.func @tagger_kernel(%arg0: memref<80x8xf32, #tpu.memory_space<vmem>>, %arg1: memref<8x1xi32, #tpu.memory_space<vmem>>, %arg2: memref<8x12xf32, #tpu.memory_space<vmem>>, %arg3: memref<8x512xf32, #tpu.memory_space<vmem>>, %arg4: memref<128x512xf32, #tpu.memory_space<vmem>>, %arg5: memref<1x512xf32, #tpu.memory_space<vmem>>, %arg6: memref<12x512xf32, #tpu.memory_space<vmem>>, %arg7: memref<128x512xf32, #tpu.memory_space<vmem>>, %arg8: memref<128x512xf32, #tpu.memory_space<vmem>>, %arg9: memref<1x512xf32, #tpu.memory_space<vmem>>, %arg10: memref<128x128xf32, #tpu.memory_space<vmem>>, %arg11: memref<1x128xf32, #tpu.memory_space<vmem>>, %arg12: memref<8x128xf32, #tpu.memory_space<vmem>>, %arg13: memref<80x512xf32, #tpu.memory_space<vmem>>) attributes {dimension_semantics = [], scalar_prefetch = 0 : i64, scratch_operands = 1 : i64, tpu.core_type = #tpu.core_type<tc>} {
    %c0 = arith.constant 0 : index
    %c0_0 = arith.constant 0 : index
    %0 = vector.load %arg0[%c0, %c0_0] : memref<80x8xf32, #tpu.memory_space<vmem>>, vector<80x8xf32>
    %c0_1 = arith.constant 0 : index
    %c0_2 = arith.constant 0 : index
    %1 = vector.load %arg3[%c0_1, %c0_2] : memref<8x512xf32, #tpu.memory_space<vmem>>, vector<8x512xf32>
    %cst = arith.constant dense<0.000000e+00> : vector<80x512xf32>
    %2 = tpu.matmul %0, %1, %cst {dimension_numbers = #tpu.dot_dimension_numbers<[1], [0], [0], [1], [0, 0, 1, 1], [], []>} : vector<80x8xf32>, vector<8x512xf32>, vector<80x512xf32> -> vector<80x512xf32>
    %c0_3 = arith.constant 0 : index
    %c0_4 = arith.constant 0 : index
    %3 = vector.load %arg5[%c0_3, %c0_4] : memref<1x512xf32, #tpu.memory_space<vmem>>, vector<1x512xf32>
    %4 = vector.broadcast %3 : vector<1x512xf32> to vector<80x512xf32>
    %5 = arith.addf %2, %4 : vector<80x512xf32>
    %c0_5 = arith.constant 0 : index
    %c0_6 = arith.constant 0 : index
    %6 = vector.load %arg13[%c0_5, %c0_6] : memref<80x512xf32, #tpu.memory_space<vmem>>, vector<80x512xf32>
    tpu.vector_store %arg13[%c0_5, %c0_6], %5 {strides = array<i32>} : memref<80x512xf32, #tpu.memory_space<vmem>>, vector<80x512xf32>,
    %c0_7 = arith.constant 0 : index
    %c0_8 = arith.constant 0 : index
    %7 = vector.load %arg1[%c0_7, %c0_8] : memref<8x1xi32, #tpu.memory_space<vmem>>, vector<8x1xi32>
    %c0_i32 = arith.constant 0 : i32
    %8 = vector.broadcast %c0_i32 : i32 to vector<8x1xi32>
    %9 = arith.cmpi sgt, %7, %8 : vector<8x1xi32>
    %c1_i32 = arith.constant 1 : i32
    %10 = vector.broadcast %c1_i32 : i32 to vector<8x1xi32>
    %11 = arith.cmpi sgt, %7, %10 : vector<8x1xi32>
    %c2_i32 = arith.constant 2 : i32
    %12 = vector.broadcast %c2_i32 : i32 to vector<8x1xi32>
    %13 = arith.cmpi sgt, %7, %12 : vector<8x1xi32>
    %c3_i32 = arith.constant 3 : i32
    %14 = vector.broadcast %c3_i32 : i32 to vector<8x1xi32>
    %15 = arith.cmpi sgt, %7, %14 : vector<8x1xi32>
    %c4_i32 = arith.constant 4 : i32
    %16 = vector.broadcast %c4_i32 : i32 to vector<8x1xi32>
    %17 = arith.cmpi sgt, %7, %16 : vector<8x1xi32>
    %c5_i32 = arith.constant 5 : i32
    %18 = vector.broadcast %c5_i32 : i32 to vector<8x1xi32>
    %19 = arith.cmpi sgt, %7, %18 : vector<8x1xi32>
    %c6_i32 = arith.constant 6 : i32
    %20 = vector.broadcast %c6_i32 : i32 to vector<8x1xi32>
    %21 = arith.cmpi sgt, %7, %20 : vector<8x1xi32>
    %c7_i32 = arith.constant 7 : i32
    %22 = vector.broadcast %c7_i32 : i32 to vector<8x1xi32>
    %23 = arith.cmpi sgt, %7, %22 : vector<8x1xi32>
    %c8_i32 = arith.constant 8 : i32
    %24 = vector.broadcast %c8_i32 : i32 to vector<8x1xi32>
    %25 = arith.cmpi sgt, %7, %24 : vector<8x1xi32>
    %c9_i32 = arith.constant 9 : i32
    %26 = vector.broadcast %c9_i32 : i32 to vector<8x1xi32>
    %27 = arith.cmpi sgt, %7, %26 : vector<8x1xi32>
    %c0_9 = arith.constant 0 : index
    %c0_10 = arith.constant 0 : index
    %28 = vector.load %arg4[%c0_9, %c0_10] : memref<128x512xf32, #tpu.memory_space<vmem>>, vector<128x512xf32>
    %cst_11 = arith.constant 0.000000e+00 : f32
    %29 = vector.broadcast %cst_11 : f32 to vector<8x128xf32>
    %cst_12 = arith.constant 0.000000e+00 : f32
    %30 = vector.broadcast %cst_12 : f32 to vector<8x128xf32>
    %c0_13 = arith.constant 0 : index
    %c0_14 = arith.constant 0 : index
    %31 = vector.load %arg13[%c0_13, %c0_14] : memref<80x512xf32, #tpu.memory_space<vmem>>, vector<8x512xf32>
    %cst_15 = arith.constant dense<0.000000e+00> : vector<8x512xf32>
    %32 = tpu.matmul %29, %28, %cst_15 {dimension_numbers = #tpu.dot_dimension_numbers<[1], [0], [0], [1], [0, 0, 1, 1], [], []>} : vector<8x128xf32>, vector<128x512xf32>, vector<8x512xf32> -> vector<8x512xf32>
    %33 = arith.addf %32, %31 : vector<8x512xf32>
    %34 = vector.extract_strided_slice %33 {offsets = [0, 0], sizes = [8, 128], strides = [1, 1]} : vector<8x512xf32> to vector<8x128xf32>
    %35 = arith.negf %34 : vector<8x128xf32>
    %36 = math.exp %35 : vector<8x128xf32>
    %cst_16 = arith.constant 1.000000e+00 : f32
    %37 = vector.broadcast %cst_16 : f32 to vector<8x128xf32>
    %38 = arith.addf %37, %36 : vector<8x128xf32>
    %39 = arith.divf %37, %38 : vector<8x128xf32>
    %40 = vector.extract_strided_slice %33 {offsets = [0, 128], sizes = [8, 128], strides = [1, 1]} : vector<8x512xf32> to vector<8x128xf32>
    %41 = arith.negf %40 : vector<8x128xf32>
    %42 = math.exp %41 : vector<8x128xf32>
    %cst_17 = arith.constant 1.000000e+00 : f32
    %43 = vector.broadcast %cst_17 : f32 to vector<8x128xf32>
    %44 = arith.addf %43, %42 : vector<8x128xf32>
    %45 = arith.divf %43, %44 : vector<8x128xf32>
    %46 = vector.extract_strided_slice %33 {offsets = [0, 256], sizes = [8, 128], strides = [1, 1]} : vector<8x512xf32> to vector<8x128xf32>
    %47 = math.tanh %46 : vector<8x128xf32>
    %48 = vector.extract_strided_slice %33 {offsets = [0, 384], sizes = [8, 128], strides = [1, 1]} : vector<8x512xf32> to vector<8x128xf32>
    %49 = arith.negf %48 : vector<8x128xf32>
    %50 = math.exp %49 : vector<8x128xf32>
    %cst_18 = arith.constant 1.000000e+00 : f32
    %51 = vector.broadcast %cst_18 : f32 to vector<8x128xf32>
    %52 = arith.addf %51, %50 : vector<8x128xf32>
    %53 = arith.divf %51, %52 : vector<8x128xf32>
    %54 = arith.mulf %45, %30 : vector<8x128xf32>
    %55 = arith.mulf %39, %47 : vector<8x128xf32>
    %56 = arith.addf %54, %55 : vector<8x128xf32>
    %57 = math.tanh %56 : vector<8x128xf32>
    %58 = arith.mulf %53, %57 : vector<8x128xf32>
    %59 = vector.shape_cast %9 : vector<8x1xi1> to vector<8x1xi1>
    %60 = vector.broadcast %59 : vector<8x1xi1> to vector<8x128xi1>
    %61 = arith.select %60, %58, %29 : vector<8x128xi1>, vector<8x128xf32>
    %62 = vector.shape_cast %9 : vector<8x1xi1> to vector<8x1xi1>
    %63 = vector.broadcast %62 : vector<8x1xi1> to vector<8x128xi1>
    %64 = arith.select %63, %56, %30 : vector<8x128xi1>, vector<8x128xf32>
    %c8 = arith.constant 8 : index
    %c0_19 = arith.constant 0 : index
    %65 = vector.load %arg13[%c8, %c0_19] : memref<80x512xf32, #tpu.memory_space<vmem>>, vector<8x512xf32>
    %cst_20 = arith.constant dense<0.000000e+00> : vector<8x512xf32>
    %66 = tpu.matmul %61, %28, %cst_20 {dimension_numbers = #tpu.dot_dimension_numbers<[1], [0], [0], [1], [0, 0, 1, 1], [], []>} : vector<8x128xf32>, vector<128x512xf32>, vector<8x512xf32> -> vector<8x512xf32>
    %67 = arith.addf %66, %65 : vector<8x512xf32>
    %68 = vector.extract_strided_slice %67 {offsets = [0, 0], sizes = [8, 128], strides = [1, 1]} : vector<8x512xf32> to vector<8x128xf32>
    %69 = arith.negf %68 : vector<8x128xf32>
    %70 = math.exp %69 : vector<8x128xf32>
    %cst_21 = arith.constant 1.000000e+00 : f32
    %71 = vector.broadcast %cst_21 : f32 to vector<8x128xf32>
    %72 = arith.addf %71, %70 : vector<8x128xf32>
    %73 = arith.divf %71, %72 : vector<8x128xf32>
    %74 = vector.extract_strided_slice %67 {offsets = [0, 128], sizes = [8, 128], strides = [1, 1]} : vector<8x512xf32> to vector<8x128xf32>
    %75 = arith.negf %74 : vector<8x128xf32>
    %76 = math.exp %75 : vector<8x128xf32>
    %cst_22 = arith.constant 1.000000e+00 : f32
    %77 = vector.broadcast %cst_22 : f32 to vector<8x128xf32>
    %78 = arith.addf %77, %76 : vector<8x128xf32>
    %79 = arith.divf %77, %78 : vector<8x128xf32>
    %80 = vector.extract_strided_slice %67 {offsets = [0, 256], sizes = [8, 128], strides = [1, 1]} : vector<8x512xf32> to vector<8x128xf32>
    %81 = math.tanh %80 : vector<8x128xf32>
    %82 = vector.extract_strided_slice %67 {offsets = [0, 384], sizes = [8, 128], strides = [1, 1]} : vector<8x512xf32> to vector<8x128xf32>
    %83 = arith.negf %82 : vector<8x128xf32>
    %84 = math.exp %83 : vector<8x128xf32>
    %cst_23 = arith.constant 1.000000e+00 : f32
    %85 = vector.broadcast %cst_23 : f32 to vector<8x128xf32>
    %86 = arith.addf %85, %84 : vector<8x128xf32>
    %87 = arith.divf %85, %86 : vector<8x128xf32>
    %88 = arith.mulf %79, %64 : vector<8x128xf32>
    %89 = arith.mulf %73, %81 : vector<8x128xf32>
    %90 = arith.addf %88, %89 : vector<8x128xf32>
    %91 = math.tanh %90 : vector<8x128xf32>
    %92 = arith.mulf %87, %91 : vector<8x128xf32>
    %93 = vector.shape_cast %11 : vector<8x1xi1> to vector<8x1xi1>
    %94 = vector.broadcast %93 : vector<8x1xi1> to vector<8x128xi1>
    %95 = arith.select %94, %92, %61 : vector<8x128xi1>, vector<8x128xf32>
    %96 = vector.shape_cast %11 : vector<8x1xi1> to vector<8x1xi1>
    %97 = vector.broadcast %96 : vector<8x1xi1> to vector<8x128xi1>
    %98 = arith.select %97, %90, %64 : vector<8x128xi1>, vector<8x128xf32>
    %c16 = arith.constant 16 : index
    %c0_24 = arith.constant 0 : index
    %99 = vector.load %arg13[%c16, %c0_24] : memref<80x512xf32, #tpu.memory_space<vmem>>, vector<8x512xf32>
    %cst_25 = arith.constant dense<0.000000e+00> : vector<8x512xf32>
    %100 = tpu.matmul %95, %28, %cst_25 {dimension_numbers = #tpu.dot_dimension_numbers<[1], [0], [0], [1], [0, 0, 1, 1], [], []>} : vector<8x128xf32>, vector<128x512xf32>, vector<8x512xf32> -> vector<8x512xf32>
    %101 = arith.addf %100, %99 : vector<8x512xf32>
    %102 = vector.extract_strided_slice %101 {offsets = [0, 0], sizes = [8, 128], strides = [1, 1]} : vector<8x512xf32> to vector<8x128xf32>
    %103 = arith.negf %102 : vector<8x128xf32>
    %104 = math.exp %103 : vector<8x128xf32>
    %cst_26 = arith.constant 1.000000e+00 : f32
    %105 = vector.broadcast %cst_26 : f32 to vector<8x128xf32>
    %106 = arith.addf %105, %104 : vector<8x128xf32>
    %107 = arith.divf %105, %106 : vector<8x128xf32>
    %108 = vector.extract_strided_slice %101 {offsets = [0, 128], sizes = [8, 128], strides = [1, 1]} : vector<8x512xf32> to vector<8x128xf32>
    %109 = arith.negf %108 : vector<8x128xf32>
    %110 = math.exp %109 : vector<8x128xf32>
    %cst_27 = arith.constant 1.000000e+00 : f32
    %111 = vector.broadcast %cst_27 : f32 to vector<8x128xf32>
    %112 = arith.addf %111, %110 : vector<8x128xf32>
    %113 = arith.divf %111, %112 : vector<8x128xf32>
    %114 = vector.extract_strided_slice %101 {offsets = [0, 256], sizes = [8, 128], strides = [1, 1]} : vector<8x512xf32> to vector<8x128xf32>
    %115 = math.tanh %114 : vector<8x128xf32>
    %116 = vector.extract_strided_slice %101 {offsets = [0, 384], sizes = [8, 128], strides = [1, 1]} : vector<8x512xf32> to vector<8x128xf32>
    %117 = arith.negf %116 : vector<8x128xf32>
    %118 = math.exp %117 : vector<8x128xf32>
    %cst_28 = arith.constant 1.000000e+00 : f32
    %119 = vector.broadcast %cst_28 : f32 to vector<8x128xf32>
    %120 = arith.addf %119, %118 : vector<8x128xf32>
    %121 = arith.divf %119, %120 : vector<8x128xf32>
    %122 = arith.mulf %113, %98 : vector<8x128xf32>
    %123 = arith.mulf %107, %115 : vector<8x128xf32>
    %124 = arith.addf %122, %123 : vector<8x128xf32>
    %125 = math.tanh %124 : vector<8x128xf32>
    %126 = arith.mulf %121, %125 : vector<8x128xf32>
    %127 = vector.shape_cast %13 : vector<8x1xi1> to vector<8x1xi1>
    %128 = vector.broadcast %127 : vector<8x1xi1> to vector<8x128xi1>
    %129 = arith.select %128, %126, %95 : vector<8x128xi1>, vector<8x128xf32>
    %130 = vector.shape_cast %13 : vector<8x1xi1> to vector<8x1xi1>
    %131 = vector.broadcast %130 : vector<8x1xi1> to vector<8x128xi1>
    %132 = arith.select %131, %124, %98 : vector<8x128xi1>, vector<8x128xf32>
    %c24 = arith.constant 24 : index
    %c0_29 = arith.constant 0 : index
    %133 = vector.load %arg13[%c24, %c0_29] : memref<80x512xf32, #tpu.memory_space<vmem>>, vector<8x512xf32>
    %cst_30 = arith.constant dense<0.000000e+00> : vector<8x512xf32>
    %134 = tpu.matmul %129, %28, %cst_30 {dimension_numbers = #tpu.dot_dimension_numbers<[1], [0], [0], [1], [0, 0, 1, 1], [], []>} : vector<8x128xf32>, vector<128x512xf32>, vector<8x512xf32> -> vector<8x512xf32>
    %135 = arith.addf %134, %133 : vector<8x512xf32>
    %136 = vector.extract_strided_slice %135 {offsets = [0, 0], sizes = [8, 128], strides = [1, 1]} : vector<8x512xf32> to vector<8x128xf32>
    %137 = arith.negf %136 : vector<8x128xf32>
    %138 = math.exp %137 : vector<8x128xf32>
    %cst_31 = arith.constant 1.000000e+00 : f32
    %139 = vector.broadcast %cst_31 : f32 to vector<8x128xf32>
    %140 = arith.addf %139, %138 : vector<8x128xf32>
    %141 = arith.divf %139, %140 : vector<8x128xf32>
    %142 = vector.extract_strided_slice %135 {offsets = [0, 128], sizes = [8, 128], strides = [1, 1]} : vector<8x512xf32> to vector<8x128xf32>
    %143 = arith.negf %142 : vector<8x128xf32>
    %144 = math.exp %143 : vector<8x128xf32>
    %cst_32 = arith.constant 1.000000e+00 : f32
    %145 = vector.broadcast %cst_32 : f32 to vector<8x128xf32>
    %146 = arith.addf %145, %144 : vector<8x128xf32>
    %147 = arith.divf %145, %146 : vector<8x128xf32>
    %148 = vector.extract_strided_slice %135 {offsets = [0, 256], sizes = [8, 128], strides = [1, 1]} : vector<8x512xf32> to vector<8x128xf32>
    %149 = math.tanh %148 : vector<8x128xf32>
    %150 = vector.extract_strided_slice %135 {offsets = [0, 384], sizes = [8, 128], strides = [1, 1]} : vector<8x512xf32> to vector<8x128xf32>
    %151 = arith.negf %150 : vector<8x128xf32>
    %152 = math.exp %151 : vector<8x128xf32>
    %cst_33 = arith.constant 1.000000e+00 : f32
    %153 = vector.broadcast %cst_33 : f32 to vector<8x128xf32>
    %154 = arith.addf %153, %152 : vector<8x128xf32>
    %155 = arith.divf %153, %154 : vector<8x128xf32>
    %156 = arith.mulf %147, %132 : vector<8x128xf32>
    %157 = arith.mulf %141, %149 : vector<8x128xf32>
    %158 = arith.addf %156, %157 : vector<8x128xf32>
    %159 = math.tanh %158 : vector<8x128xf32>
    %160 = arith.mulf %155, %159 : vector<8x128xf32>
    %161 = vector.shape_cast %15 : vector<8x1xi1> to vector<8x1xi1>
    %162 = vector.broadcast %161 : vector<8x1xi1> to vector<8x128xi1>
    %163 = arith.select %162, %160, %129 : vector<8x128xi1>, vector<8x128xf32>
    %164 = vector.shape_cast %15 : vector<8x1xi1> to vector<8x1xi1>
    %165 = vector.broadcast %164 : vector<8x1xi1> to vector<8x128xi1>
    %166 = arith.select %165, %158, %132 : vector<8x128xi1>, vector<8x128xf32>
    %c32 = arith.constant 32 : index
    %c0_34 = arith.constant 0 : index
    %167 = vector.load %arg13[%c32, %c0_34] : memref<80x512xf32, #tpu.memory_space<vmem>>, vector<8x512xf32>
    %cst_35 = arith.constant dense<0.000000e+00> : vector<8x512xf32>
    %168 = tpu.matmul %163, %28, %cst_35 {dimension_numbers = #tpu.dot_dimension_numbers<[1], [0], [0], [1], [0, 0, 1, 1], [], []>} : vector<8x128xf32>, vector<128x512xf32>, vector<8x512xf32> -> vector<8x512xf32>
    %169 = arith.addf %168, %167 : vector<8x512xf32>
    %170 = vector.extract_strided_slice %169 {offsets = [0, 0], sizes = [8, 128], strides = [1, 1]} : vector<8x512xf32> to vector<8x128xf32>
    %171 = arith.negf %170 : vector<8x128xf32>
    %172 = math.exp %171 : vector<8x128xf32>
    %cst_36 = arith.constant 1.000000e+00 : f32
    %173 = vector.broadcast %cst_36 : f32 to vector<8x128xf32>
    %174 = arith.addf %173, %172 : vector<8x128xf32>
    %175 = arith.divf %173, %174 : vector<8x128xf32>
    %176 = vector.extract_strided_slice %169 {offsets = [0, 128], sizes = [8, 128], strides = [1, 1]} : vector<8x512xf32> to vector<8x128xf32>
    %177 = arith.negf %176 : vector<8x128xf32>
    %178 = math.exp %177 : vector<8x128xf32>
    %cst_37 = arith.constant 1.000000e+00 : f32
    %179 = vector.broadcast %cst_37 : f32 to vector<8x128xf32>
    %180 = arith.addf %179, %178 : vector<8x128xf32>
    %181 = arith.divf %179, %180 : vector<8x128xf32>
    %182 = vector.extract_strided_slice %169 {offsets = [0, 256], sizes = [8, 128], strides = [1, 1]} : vector<8x512xf32> to vector<8x128xf32>
    %183 = math.tanh %182 : vector<8x128xf32>
    %184 = vector.extract_strided_slice %169 {offsets = [0, 384], sizes = [8, 128], strides = [1, 1]} : vector<8x512xf32> to vector<8x128xf32>
    %185 = arith.negf %184 : vector<8x128xf32>
    %186 = math.exp %185 : vector<8x128xf32>
    %cst_38 = arith.constant 1.000000e+00 : f32
    %187 = vector.broadcast %cst_38 : f32 to vector<8x128xf32>
    %188 = arith.addf %187, %186 : vector<8x128xf32>
    %189 = arith.divf %187, %188 : vector<8x128xf32>
    %190 = arith.mulf %181, %166 : vector<8x128xf32>
    %191 = arith.mulf %175, %183 : vector<8x128xf32>
    %192 = arith.addf %190, %191 : vector<8x128xf32>
    %193 = math.tanh %192 : vector<8x128xf32>
    %194 = arith.mulf %189, %193 : vector<8x128xf32>
    %195 = vector.shape_cast %17 : vector<8x1xi1> to vector<8x1xi1>
    %196 = vector.broadcast %195 : vector<8x1xi1> to vector<8x128xi1>
    %197 = arith.select %196, %194, %163 : vector<8x128xi1>, vector<8x128xf32>
    %198 = vector.shape_cast %17 : vector<8x1xi1> to vector<8x1xi1>
    %199 = vector.broadcast %198 : vector<8x1xi1> to vector<8x128xi1>
    %200 = arith.select %199, %192, %166 : vector<8x128xi1>, vector<8x128xf32>
    %c40 = arith.constant 40 : index
    %c0_39 = arith.constant 0 : index
    %201 = vector.load %arg13[%c40, %c0_39] : memref<80x512xf32, #tpu.memory_space<vmem>>, vector<8x512xf32>
    %cst_40 = arith.constant dense<0.000000e+00> : vector<8x512xf32>
    %202 = tpu.matmul %197, %28, %cst_40 {dimension_numbers = #tpu.dot_dimension_numbers<[1], [0], [0], [1], [0, 0, 1, 1], [], []>} : vector<8x128xf32>, vector<128x512xf32>, vector<8x512xf32> -> vector<8x512xf32>
    %203 = arith.addf %202, %201 : vector<8x512xf32>
    %204 = vector.extract_strided_slice %203 {offsets = [0, 0], sizes = [8, 128], strides = [1, 1]} : vector<8x512xf32> to vector<8x128xf32>
    %205 = arith.negf %204 : vector<8x128xf32>
    %206 = math.exp %205 : vector<8x128xf32>
    %cst_41 = arith.constant 1.000000e+00 : f32
    %207 = vector.broadcast %cst_41 : f32 to vector<8x128xf32>
    %208 = arith.addf %207, %206 : vector<8x128xf32>
    %209 = arith.divf %207, %208 : vector<8x128xf32>
    %210 = vector.extract_strided_slice %203 {offsets = [0, 128], sizes = [8, 128], strides = [1, 1]} : vector<8x512xf32> to vector<8x128xf32>
    %211 = arith.negf %210 : vector<8x128xf32>
    %212 = math.exp %211 : vector<8x128xf32>
    %cst_42 = arith.constant 1.000000e+00 : f32
    %213 = vector.broadcast %cst_42 : f32 to vector<8x128xf32>
    %214 = arith.addf %213, %212 : vector<8x128xf32>
    %215 = arith.divf %213, %214 : vector<8x128xf32>
    %216 = vector.extract_strided_slice %203 {offsets = [0, 256], sizes = [8, 128], strides = [1, 1]} : vector<8x512xf32> to vector<8x128xf32>
    %217 = math.tanh %216 : vector<8x128xf32>
    %218 = vector.extract_strided_slice %203 {offsets = [0, 384], sizes = [8, 128], strides = [1, 1]} : vector<8x512xf32> to vector<8x128xf32>
    %219 = arith.negf %218 : vector<8x128xf32>
    %220 = math.exp %219 : vector<8x128xf32>
    %cst_43 = arith.constant 1.000000e+00 : f32
    %221 = vector.broadcast %cst_43 : f32 to vector<8x128xf32>
    %222 = arith.addf %221, %220 : vector<8x128xf32>
    %223 = arith.divf %221, %222 : vector<8x128xf32>
    %224 = arith.mulf %215, %200 : vector<8x128xf32>
    %225 = arith.mulf %209, %217 : vector<8x128xf32>
    %226 = arith.addf %224, %225 : vector<8x128xf32>
    %227 = math.tanh %226 : vector<8x128xf32>
    %228 = arith.mulf %223, %227 : vector<8x128xf32>
    %229 = vector.shape_cast %19 : vector<8x1xi1> to vector<8x1xi1>
    %230 = vector.broadcast %229 : vector<8x1xi1> to vector<8x128xi1>
    %231 = arith.select %230, %228, %197 : vector<8x128xi1>, vector<8x128xf32>
    %232 = vector.shape_cast %19 : vector<8x1xi1> to vector<8x1xi1>
    %233 = vector.broadcast %232 : vector<8x1xi1> to vector<8x128xi1>
    %234 = arith.select %233, %226, %200 : vector<8x128xi1>, vector<8x128xf32>
    %c48 = arith.constant 48 : index
    %c0_44 = arith.constant 0 : index
    %235 = vector.load %arg13[%c48, %c0_44] : memref<80x512xf32, #tpu.memory_space<vmem>>, vector<8x512xf32>
    %cst_45 = arith.constant dense<0.000000e+00> : vector<8x512xf32>
    %236 = tpu.matmul %231, %28, %cst_45 {dimension_numbers = #tpu.dot_dimension_numbers<[1], [0], [0], [1], [0, 0, 1, 1], [], []>} : vector<8x128xf32>, vector<128x512xf32>, vector<8x512xf32> -> vector<8x512xf32>
    %237 = arith.addf %236, %235 : vector<8x512xf32>
    %238 = vector.extract_strided_slice %237 {offsets = [0, 0], sizes = [8, 128], strides = [1, 1]} : vector<8x512xf32> to vector<8x128xf32>
    %239 = arith.negf %238 : vector<8x128xf32>
    %240 = math.exp %239 : vector<8x128xf32>
    %cst_46 = arith.constant 1.000000e+00 : f32
    %241 = vector.broadcast %cst_46 : f32 to vector<8x128xf32>
    %242 = arith.addf %241, %240 : vector<8x128xf32>
    %243 = arith.divf %241, %242 : vector<8x128xf32>
    %244 = vector.extract_strided_slice %237 {offsets = [0, 128], sizes = [8, 128], strides = [1, 1]} : vector<8x512xf32> to vector<8x128xf32>
    %245 = arith.negf %244 : vector<8x128xf32>
    %246 = math.exp %245 : vector<8x128xf32>
    %cst_47 = arith.constant 1.000000e+00 : f32
    %247 = vector.broadcast %cst_47 : f32 to vector<8x128xf32>
    %248 = arith.addf %247, %246 : vector<8x128xf32>
    %249 = arith.divf %247, %248 : vector<8x128xf32>
    %250 = vector.extract_strided_slice %237 {offsets = [0, 256], sizes = [8, 128], strides = [1, 1]} : vector<8x512xf32> to vector<8x128xf32>
    %251 = math.tanh %250 : vector<8x128xf32>
    %252 = vector.extract_strided_slice %237 {offsets = [0, 384], sizes = [8, 128], strides = [1, 1]} : vector<8x512xf32> to vector<8x128xf32>
    %253 = arith.negf %252 : vector<8x128xf32>
    %254 = math.exp %253 : vector<8x128xf32>
    %cst_48 = arith.constant 1.000000e+00 : f32
    %255 = vector.broadcast %cst_48 : f32 to vector<8x128xf32>
    %256 = arith.addf %255, %254 : vector<8x128xf32>
    %257 = arith.divf %255, %256 : vector<8x128xf32>
    %258 = arith.mulf %249, %234 : vector<8x128xf32>
    %259 = arith.mulf %243, %251 : vector<8x128xf32>
    %260 = arith.addf %258, %259 : vector<8x128xf32>
    %261 = math.tanh %260 : vector<8x128xf32>
    %262 = arith.mulf %257, %261 : vector<8x128xf32>
    %263 = vector.shape_cast %21 : vector<8x1xi1> to vector<8x1xi1>
    %264 = vector.broadcast %263 : vector<8x1xi1> to vector<8x128xi1>
    %265 = arith.select %264, %262, %231 : vector<8x128xi1>, vector<8x128xf32>
    %266 = vector.shape_cast %21 : vector<8x1xi1> to vector<8x1xi1>
    %267 = vector.broadcast %266 : vector<8x1xi1> to vector<8x128xi1>
    %268 = arith.select %267, %260, %234 : vector<8x128xi1>, vector<8x128xf32>
    %c56 = arith.constant 56 : index
    %c0_49 = arith.constant 0 : index
    %269 = vector.load %arg13[%c56, %c0_49] : memref<80x512xf32, #tpu.memory_space<vmem>>, vector<8x512xf32>
    %cst_50 = arith.constant dense<0.000000e+00> : vector<8x512xf32>
    %270 = tpu.matmul %265, %28, %cst_50 {dimension_numbers = #tpu.dot_dimension_numbers<[1], [0], [0], [1], [0, 0, 1, 1], [], []>} : vector<8x128xf32>, vector<128x512xf32>, vector<8x512xf32> -> vector<8x512xf32>
    %271 = arith.addf %270, %269 : vector<8x512xf32>
    %272 = vector.extract_strided_slice %271 {offsets = [0, 0], sizes = [8, 128], strides = [1, 1]} : vector<8x512xf32> to vector<8x128xf32>
    %273 = arith.negf %272 : vector<8x128xf32>
    %274 = math.exp %273 : vector<8x128xf32>
    %cst_51 = arith.constant 1.000000e+00 : f32
    %275 = vector.broadcast %cst_51 : f32 to vector<8x128xf32>
    %276 = arith.addf %275, %274 : vector<8x128xf32>
    %277 = arith.divf %275, %276 : vector<8x128xf32>
    %278 = vector.extract_strided_slice %271 {offsets = [0, 128], sizes = [8, 128], strides = [1, 1]} : vector<8x512xf32> to vector<8x128xf32>
    %279 = arith.negf %278 : vector<8x128xf32>
    %280 = math.exp %279 : vector<8x128xf32>
    %cst_52 = arith.constant 1.000000e+00 : f32
    %281 = vector.broadcast %cst_52 : f32 to vector<8x128xf32>
    %282 = arith.addf %281, %280 : vector<8x128xf32>
    %283 = arith.divf %281, %282 : vector<8x128xf32>
    %284 = vector.extract_strided_slice %271 {offsets = [0, 256], sizes = [8, 128], strides = [1, 1]} : vector<8x512xf32> to vector<8x128xf32>
    %285 = math.tanh %284 : vector<8x128xf32>
    %286 = vector.extract_strided_slice %271 {offsets = [0, 384], sizes = [8, 128], strides = [1, 1]} : vector<8x512xf32> to vector<8x128xf32>
    %287 = arith.negf %286 : vector<8x128xf32>
    %288 = math.exp %287 : vector<8x128xf32>
    %cst_53 = arith.constant 1.000000e+00 : f32
    %289 = vector.broadcast %cst_53 : f32 to vector<8x128xf32>
    %290 = arith.addf %289, %288 : vector<8x128xf32>
    %291 = arith.divf %289, %290 : vector<8x128xf32>
    %292 = arith.mulf %283, %268 : vector<8x128xf32>
    %293 = arith.mulf %277, %285 : vector<8x128xf32>
    %294 = arith.addf %292, %293 : vector<8x128xf32>
    %295 = math.tanh %294 : vector<8x128xf32>
    %296 = arith.mulf %291, %295 : vector<8x128xf32>
    %297 = vector.shape_cast %23 : vector<8x1xi1> to vector<8x1xi1>
    %298 = vector.broadcast %297 : vector<8x1xi1> to vector<8x128xi1>
    %299 = arith.select %298, %296, %265 : vector<8x128xi1>, vector<8x128xf32>
    %300 = vector.shape_cast %23 : vector<8x1xi1> to vector<8x1xi1>
    %301 = vector.broadcast %300 : vector<8x1xi1> to vector<8x128xi1>
    %302 = arith.select %301, %294, %268 : vector<8x128xi1>, vector<8x128xf32>
    %c64 = arith.constant 64 : index
    %c0_54 = arith.constant 0 : index
    %303 = vector.load %arg13[%c64, %c0_54] : memref<80x512xf32, #tpu.memory_space<vmem>>, vector<8x512xf32>
    %cst_55 = arith.constant dense<0.000000e+00> : vector<8x512xf32>
    %304 = tpu.matmul %299, %28, %cst_55 {dimension_numbers = #tpu.dot_dimension_numbers<[1], [0], [0], [1], [0, 0, 1, 1], [], []>} : vector<8x128xf32>, vector<128x512xf32>, vector<8x512xf32> -> vector<8x512xf32>
    %305 = arith.addf %304, %303 : vector<8x512xf32>
    %306 = vector.extract_strided_slice %305 {offsets = [0, 0], sizes = [8, 128], strides = [1, 1]} : vector<8x512xf32> to vector<8x128xf32>
    %307 = arith.negf %306 : vector<8x128xf32>
    %308 = math.exp %307 : vector<8x128xf32>
    %cst_56 = arith.constant 1.000000e+00 : f32
    %309 = vector.broadcast %cst_56 : f32 to vector<8x128xf32>
    %310 = arith.addf %309, %308 : vector<8x128xf32>
    %311 = arith.divf %309, %310 : vector<8x128xf32>
    %312 = vector.extract_strided_slice %305 {offsets = [0, 128], sizes = [8, 128], strides = [1, 1]} : vector<8x512xf32> to vector<8x128xf32>
    %313 = arith.negf %312 : vector<8x128xf32>
    %314 = math.exp %313 : vector<8x128xf32>
    %cst_57 = arith.constant 1.000000e+00 : f32
    %315 = vector.broadcast %cst_57 : f32 to vector<8x128xf32>
    %316 = arith.addf %315, %314 : vector<8x128xf32>
    %317 = arith.divf %315, %316 : vector<8x128xf32>
    %318 = vector.extract_strided_slice %305 {offsets = [0, 256], sizes = [8, 128], strides = [1, 1]} : vector<8x512xf32> to vector<8x128xf32>
    %319 = math.tanh %318 : vector<8x128xf32>
    %320 = vector.extract_strided_slice %305 {offsets = [0, 384], sizes = [8, 128], strides = [1, 1]} : vector<8x512xf32> to vector<8x128xf32>
    %321 = arith.negf %320 : vector<8x128xf32>
    %322 = math.exp %321 : vector<8x128xf32>
    %cst_58 = arith.constant 1.000000e+00 : f32
    %323 = vector.broadcast %cst_58 : f32 to vector<8x128xf32>
    %324 = arith.addf %323, %322 : vector<8x128xf32>
    %325 = arith.divf %323, %324 : vector<8x128xf32>
    %326 = arith.mulf %317, %302 : vector<8x128xf32>
    %327 = arith.mulf %311, %319 : vector<8x128xf32>
    %328 = arith.addf %326, %327 : vector<8x128xf32>
    %329 = math.tanh %328 : vector<8x128xf32>
    %330 = arith.mulf %325, %329 : vector<8x128xf32>
    %331 = vector.shape_cast %25 : vector<8x1xi1> to vector<8x1xi1>
    %332 = vector.broadcast %331 : vector<8x1xi1> to vector<8x128xi1>
    %333 = arith.select %332, %330, %299 : vector<8x128xi1>, vector<8x128xf32>
    %334 = vector.shape_cast %25 : vector<8x1xi1> to vector<8x1xi1>
    %335 = vector.broadcast %334 : vector<8x1xi1> to vector<8x128xi1>
    %336 = arith.select %335, %328, %302 : vector<8x128xi1>, vector<8x128xf32>
    %c72 = arith.constant 72 : index
    %c0_59 = arith.constant 0 : index
    %337 = vector.load %arg13[%c72, %c0_59] : memref<80x512xf32, #tpu.memory_space<vmem>>, vector<8x512xf32>
    %cst_60 = arith.constant dense<0.000000e+00> : vector<8x512xf32>
    %338 = tpu.matmul %333, %28, %cst_60 {dimension_numbers = #tpu.dot_dimension_numbers<[1], [0], [0], [1], [0, 0, 1, 1], [], []>} : vector<8x128xf32>, vector<128x512xf32>, vector<8x512xf32> -> vector<8x512xf32>
    %339 = arith.addf %338, %337 : vector<8x512xf32>
    %340 = vector.extract_strided_slice %339 {offsets = [0, 0], sizes = [8, 128], strides = [1, 1]} : vector<8x512xf32> to vector<8x128xf32>
    %341 = arith.negf %340 : vector<8x128xf32>
    %342 = math.exp %341 : vector<8x128xf32>
    %cst_61 = arith.constant 1.000000e+00 : f32
    %343 = vector.broadcast %cst_61 : f32 to vector<8x128xf32>
    %344 = arith.addf %343, %342 : vector<8x128xf32>
    %345 = arith.divf %343, %344 : vector<8x128xf32>
    %346 = vector.extract_strided_slice %339 {offsets = [0, 128], sizes = [8, 128], strides = [1, 1]} : vector<8x512xf32> to vector<8x128xf32>
    %347 = arith.negf %346 : vector<8x128xf32>
    %348 = math.exp %347 : vector<8x128xf32>
    %cst_62 = arith.constant 1.000000e+00 : f32
    %349 = vector.broadcast %cst_62 : f32 to vector<8x128xf32>
    %350 = arith.addf %349, %348 : vector<8x128xf32>
    %351 = arith.divf %349, %350 : vector<8x128xf32>
    %352 = vector.extract_strided_slice %339 {offsets = [0, 256], sizes = [8, 128], strides = [1, 1]} : vector<8x512xf32> to vector<8x128xf32>
    %353 = math.tanh %352 : vector<8x128xf32>
    %354 = vector.extract_strided_slice %339 {offsets = [0, 384], sizes = [8, 128], strides = [1, 1]} : vector<8x512xf32> to vector<8x128xf32>
    %355 = arith.negf %354 : vector<8x128xf32>
    %356 = math.exp %355 : vector<8x128xf32>
    %cst_63 = arith.constant 1.000000e+00 : f32
    %357 = vector.broadcast %cst_63 : f32 to vector<8x128xf32>
    %358 = arith.addf %357, %356 : vector<8x128xf32>
    %359 = arith.divf %357, %358 : vector<8x128xf32>
    %360 = arith.mulf %351, %336 : vector<8x128xf32>
    %361 = arith.mulf %345, %353 : vector<8x128xf32>
    %362 = arith.addf %360, %361 : vector<8x128xf32>
    %363 = math.tanh %362 : vector<8x128xf32>
    %364 = arith.mulf %359, %363 : vector<8x128xf32>
    %365 = vector.shape_cast %27 : vector<8x1xi1> to vector<8x1xi1>
    %366 = vector.broadcast %365 : vector<8x1xi1> to vector<8x128xi1>
    %367 = arith.select %366, %364, %333 : vector<8x128xi1>, vector<8x128xf32>
    %c0_64 = arith.constant 0 : index
    %c0_65 = arith.constant 0 : index
    %368 = vector.load %arg2[%c0_64, %c0_65] : memref<8x12xf32, #tpu.memory_space<vmem>>, vector<8x12xf32>
    %c0_66 = arith.constant 0 : index
    %c0_67 = arith.constant 0 : index
    %369 = vector.load %arg6[%c0_66, %c0_67] : memref<12x512xf32, #tpu.memory_space<vmem>>, vector<12x512xf32>
    %cst_68 = arith.constant dense<0.000000e+00> : vector<8x512xf32>
    %370 = tpu.matmul %368, %369, %cst_68 {dimension_numbers = #tpu.dot_dimension_numbers<[1], [0], [0], [1], [0, 0, 1, 1], [], []>} : vector<8x12xf32>, vector<12x512xf32>, vector<8x512xf32> -> vector<8x512xf32>
    %c0_69 = arith.constant 0 : index
    %c0_70 = arith.constant 0 : index
    %371 = vector.load %arg7[%c0_69, %c0_70] : memref<128x512xf32, #tpu.memory_space<vmem>>, vector<128x512xf32>
    %cst_71 = arith.constant dense<0.000000e+00> : vector<8x512xf32>
    %372 = tpu.matmul %367, %371, %cst_71 {dimension_numbers = #tpu.dot_dimension_numbers<[1], [0], [0], [1], [0, 0, 1, 1], [], []>} : vector<8x128xf32>, vector<128x512xf32>, vector<8x512xf32> -> vector<8x512xf32>
    %373 = arith.addf %370, %372 : vector<8x512xf32>
    %c0_72 = arith.constant 0 : index
    %c0_73 = arith.constant 0 : index
    %374 = vector.load %arg9[%c0_72, %c0_73] : memref<1x512xf32, #tpu.memory_space<vmem>>, vector<1x512xf32>
    %375 = vector.broadcast %374 : vector<1x512xf32> to vector<8x512xf32>
    %376 = arith.addf %373, %375 : vector<8x512xf32>
    %c0_74 = arith.constant 0 : index
    %c0_75 = arith.constant 0 : index
    %377 = vector.load %arg8[%c0_74, %c0_75] : memref<128x512xf32, #tpu.memory_space<vmem>>, vector<128x512xf32>
    %cst_76 = arith.constant 0.000000e+00 : f32
    %378 = vector.broadcast %cst_76 : f32 to vector<1x128xf32>
    %cst_77 = arith.constant 0.000000e+00 : f32
    %379 = vector.broadcast %cst_77 : f32 to vector<1x128xf32>
    %cst_78 = arith.constant dense<0.000000e+00> : vector<1x512xf32>
    %380 = tpu.matmul %378, %377, %cst_78 {dimension_numbers = #tpu.dot_dimension_numbers<[1], [0], [0], [1], [0, 0, 1, 1], [], []>} : vector<1x128xf32>, vector<128x512xf32>, vector<1x512xf32> -> vector<1x512xf32>
    %381 = vector.extract_strided_slice %376 {offsets = [0, 0], sizes = [1, 512], strides = [1, 1]} : vector<8x512xf32> to vector<1x512xf32>
    %382 = arith.addf %380, %381 : vector<1x512xf32>
    %383 = vector.extract_strided_slice %382 {offsets = [0, 0], sizes = [1, 128], strides = [1, 1]} : vector<1x512xf32> to vector<1x128xf32>
    %384 = arith.negf %383 : vector<1x128xf32>
    %385 = math.exp %384 : vector<1x128xf32>
    %cst_79 = arith.constant 1.000000e+00 : f32
    %386 = vector.broadcast %cst_79 : f32 to vector<1x128xf32>
    %387 = arith.addf %386, %385 : vector<1x128xf32>
    %388 = arith.divf %386, %387 : vector<1x128xf32>
    %389 = vector.extract_strided_slice %382 {offsets = [0, 128], sizes = [1, 128], strides = [1, 1]} : vector<1x512xf32> to vector<1x128xf32>
    %390 = arith.negf %389 : vector<1x128xf32>
    %391 = math.exp %390 : vector<1x128xf32>
    %cst_80 = arith.constant 1.000000e+00 : f32
    %392 = vector.broadcast %cst_80 : f32 to vector<1x128xf32>
    %393 = arith.addf %392, %391 : vector<1x128xf32>
    %394 = arith.divf %392, %393 : vector<1x128xf32>
    %395 = vector.extract_strided_slice %382 {offsets = [0, 256], sizes = [1, 128], strides = [1, 1]} : vector<1x512xf32> to vector<1x128xf32>
    %396 = math.tanh %395 : vector<1x128xf32>
    %397 = vector.extract_strided_slice %382 {offsets = [0, 384], sizes = [1, 128], strides = [1, 1]} : vector<1x512xf32> to vector<1x128xf32>
    %398 = arith.negf %397 : vector<1x128xf32>
    %399 = math.exp %398 : vector<1x128xf32>
    %cst_81 = arith.constant 1.000000e+00 : f32
    %400 = vector.broadcast %cst_81 : f32 to vector<1x128xf32>
    %401 = arith.addf %400, %399 : vector<1x128xf32>
    %402 = arith.divf %400, %401 : vector<1x128xf32>
    %403 = arith.mulf %394, %379 : vector<1x128xf32>
    %404 = arith.mulf %388, %396 : vector<1x128xf32>
    %405 = arith.addf %403, %404 : vector<1x128xf32>
    %406 = math.tanh %405 : vector<1x128xf32>
    %407 = arith.mulf %402, %406 : vector<1x128xf32>
    %cst_82 = arith.constant dense<0.000000e+00> : vector<1x512xf32>
    %408 = tpu.matmul %407, %377, %cst_82 {dimension_numbers = #tpu.dot_dimension_numbers<[1], [0], [0], [1], [0, 0, 1, 1], [], []>} : vector<1x128xf32>, vector<128x512xf32>, vector<1x512xf32> -> vector<1x512xf32>
    %409 = vector.extract_strided_slice %376 {offsets = [1, 0], sizes = [1, 512], strides = [1, 1]} : vector<8x512xf32> to vector<1x512xf32>
    %410 = arith.addf %408, %409 : vector<1x512xf32>
    %411 = vector.extract_strided_slice %410 {offsets = [0, 0], sizes = [1, 128], strides = [1, 1]} : vector<1x512xf32> to vector<1x128xf32>
    %412 = arith.negf %411 : vector<1x128xf32>
    %413 = math.exp %412 : vector<1x128xf32>
    %cst_83 = arith.constant 1.000000e+00 : f32
    %414 = vector.broadcast %cst_83 : f32 to vector<1x128xf32>
    %415 = arith.addf %414, %413 : vector<1x128xf32>
    %416 = arith.divf %414, %415 : vector<1x128xf32>
    %417 = vector.extract_strided_slice %410 {offsets = [0, 128], sizes = [1, 128], strides = [1, 1]} : vector<1x512xf32> to vector<1x128xf32>
    %418 = arith.negf %417 : vector<1x128xf32>
    %419 = math.exp %418 : vector<1x128xf32>
    %cst_84 = arith.constant 1.000000e+00 : f32
    %420 = vector.broadcast %cst_84 : f32 to vector<1x128xf32>
    %421 = arith.addf %420, %419 : vector<1x128xf32>
    %422 = arith.divf %420, %421 : vector<1x128xf32>
    %423 = vector.extract_strided_slice %410 {offsets = [0, 256], sizes = [1, 128], strides = [1, 1]} : vector<1x512xf32> to vector<1x128xf32>
    %424 = math.tanh %423 : vector<1x128xf32>
    %425 = vector.extract_strided_slice %410 {offsets = [0, 384], sizes = [1, 128], strides = [1, 1]} : vector<1x512xf32> to vector<1x128xf32>
    %426 = arith.negf %425 : vector<1x128xf32>
    %427 = math.exp %426 : vector<1x128xf32>
    %cst_85 = arith.constant 1.000000e+00 : f32
    %428 = vector.broadcast %cst_85 : f32 to vector<1x128xf32>
    %429 = arith.addf %428, %427 : vector<1x128xf32>
    %430 = arith.divf %428, %429 : vector<1x128xf32>
    %431 = arith.mulf %422, %405 : vector<1x128xf32>
    %432 = arith.mulf %416, %424 : vector<1x128xf32>
    %433 = arith.addf %431, %432 : vector<1x128xf32>
    %434 = math.tanh %433 : vector<1x128xf32>
    %435 = arith.mulf %430, %434 : vector<1x128xf32>
    %cst_86 = arith.constant dense<0.000000e+00> : vector<1x512xf32>
    %436 = tpu.matmul %435, %377, %cst_86 {dimension_numbers = #tpu.dot_dimension_numbers<[1], [0], [0], [1], [0, 0, 1, 1], [], []>} : vector<1x128xf32>, vector<128x512xf32>, vector<1x512xf32> -> vector<1x512xf32>
    %437 = vector.extract_strided_slice %376 {offsets = [2, 0], sizes = [1, 512], strides = [1, 1]} : vector<8x512xf32> to vector<1x512xf32>
    %438 = arith.addf %436, %437 : vector<1x512xf32>
    %439 = vector.extract_strided_slice %438 {offsets = [0, 0], sizes = [1, 128], strides = [1, 1]} : vector<1x512xf32> to vector<1x128xf32>
    %440 = arith.negf %439 : vector<1x128xf32>
    %441 = math.exp %440 : vector<1x128xf32>
    %cst_87 = arith.constant 1.000000e+00 : f32
    %442 = vector.broadcast %cst_87 : f32 to vector<1x128xf32>
    %443 = arith.addf %442, %441 : vector<1x128xf32>
    %444 = arith.divf %442, %443 : vector<1x128xf32>
    %445 = vector.extract_strided_slice %438 {offsets = [0, 128], sizes = [1, 128], strides = [1, 1]} : vector<1x512xf32> to vector<1x128xf32>
    %446 = arith.negf %445 : vector<1x128xf32>
    %447 = math.exp %446 : vector<1x128xf32>
    %cst_88 = arith.constant 1.000000e+00 : f32
    %448 = vector.broadcast %cst_88 : f32 to vector<1x128xf32>
    %449 = arith.addf %448, %447 : vector<1x128xf32>
    %450 = arith.divf %448, %449 : vector<1x128xf32>
    %451 = vector.extract_strided_slice %438 {offsets = [0, 256], sizes = [1, 128], strides = [1, 1]} : vector<1x512xf32> to vector<1x128xf32>
    %452 = math.tanh %451 : vector<1x128xf32>
    %453 = vector.extract_strided_slice %438 {offsets = [0, 384], sizes = [1, 128], strides = [1, 1]} : vector<1x512xf32> to vector<1x128xf32>
    %454 = arith.negf %453 : vector<1x128xf32>
    %455 = math.exp %454 : vector<1x128xf32>
    %cst_89 = arith.constant 1.000000e+00 : f32
    %456 = vector.broadcast %cst_89 : f32 to vector<1x128xf32>
    %457 = arith.addf %456, %455 : vector<1x128xf32>
    %458 = arith.divf %456, %457 : vector<1x128xf32>
    %459 = arith.mulf %450, %433 : vector<1x128xf32>
    %460 = arith.mulf %444, %452 : vector<1x128xf32>
    %461 = arith.addf %459, %460 : vector<1x128xf32>
    %462 = math.tanh %461 : vector<1x128xf32>
    %463 = arith.mulf %458, %462 : vector<1x128xf32>
    %cst_90 = arith.constant dense<0.000000e+00> : vector<1x512xf32>
    %464 = tpu.matmul %463, %377, %cst_90 {dimension_numbers = #tpu.dot_dimension_numbers<[1], [0], [0], [1], [0, 0, 1, 1], [], []>} : vector<1x128xf32>, vector<128x512xf32>, vector<1x512xf32> -> vector<1x512xf32>
    %465 = vector.extract_strided_slice %376 {offsets = [3, 0], sizes = [1, 512], strides = [1, 1]} : vector<8x512xf32> to vector<1x512xf32>
    %466 = arith.addf %464, %465 : vector<1x512xf32>
    %467 = vector.extract_strided_slice %466 {offsets = [0, 0], sizes = [1, 128], strides = [1, 1]} : vector<1x512xf32> to vector<1x128xf32>
    %468 = arith.negf %467 : vector<1x128xf32>
    %469 = math.exp %468 : vector<1x128xf32>
    %cst_91 = arith.constant 1.000000e+00 : f32
    %470 = vector.broadcast %cst_91 : f32 to vector<1x128xf32>
    %471 = arith.addf %470, %469 : vector<1x128xf32>
    %472 = arith.divf %470, %471 : vector<1x128xf32>
    %473 = vector.extract_strided_slice %466 {offsets = [0, 128], sizes = [1, 128], strides = [1, 1]} : vector<1x512xf32> to vector<1x128xf32>
    %474 = arith.negf %473 : vector<1x128xf32>
    %475 = math.exp %474 : vector<1x128xf32>
    %cst_92 = arith.constant 1.000000e+00 : f32
    %476 = vector.broadcast %cst_92 : f32 to vector<1x128xf32>
    %477 = arith.addf %476, %475 : vector<1x128xf32>
    %478 = arith.divf %476, %477 : vector<1x128xf32>
    %479 = vector.extract_strided_slice %466 {offsets = [0, 256], sizes = [1, 128], strides = [1, 1]} : vector<1x512xf32> to vector<1x128xf32>
    %480 = math.tanh %479 : vector<1x128xf32>
    %481 = vector.extract_strided_slice %466 {offsets = [0, 384], sizes = [1, 128], strides = [1, 1]} : vector<1x512xf32> to vector<1x128xf32>
    %482 = arith.negf %481 : vector<1x128xf32>
    %483 = math.exp %482 : vector<1x128xf32>
    %cst_93 = arith.constant 1.000000e+00 : f32
    %484 = vector.broadcast %cst_93 : f32 to vector<1x128xf32>
    %485 = arith.addf %484, %483 : vector<1x128xf32>
    %486 = arith.divf %484, %485 : vector<1x128xf32>
    %487 = arith.mulf %478, %461 : vector<1x128xf32>
    %488 = arith.mulf %472, %480 : vector<1x128xf32>
    %489 = arith.addf %487, %488 : vector<1x128xf32>
    %490 = math.tanh %489 : vector<1x128xf32>
    %491 = arith.mulf %486, %490 : vector<1x128xf32>
    %cst_94 = arith.constant dense<0.000000e+00> : vector<1x512xf32>
    %492 = tpu.matmul %491, %377, %cst_94 {dimension_numbers = #tpu.dot_dimension_numbers<[1], [0], [0], [1], [0, 0, 1, 1], [], []>} : vector<1x128xf32>, vector<128x512xf32>, vector<1x512xf32> -> vector<1x512xf32>
    %493 = vector.extract_strided_slice %376 {offsets = [4, 0], sizes = [1, 512], strides = [1, 1]} : vector<8x512xf32> to vector<1x512xf32>
    %494 = arith.addf %492, %493 : vector<1x512xf32>
    %495 = vector.extract_strided_slice %494 {offsets = [0, 0], sizes = [1, 128], strides = [1, 1]} : vector<1x512xf32> to vector<1x128xf32>
    %496 = arith.negf %495 : vector<1x128xf32>
    %497 = math.exp %496 : vector<1x128xf32>
    %cst_95 = arith.constant 1.000000e+00 : f32
    %498 = vector.broadcast %cst_95 : f32 to vector<1x128xf32>
    %499 = arith.addf %498, %497 : vector<1x128xf32>
    %500 = arith.divf %498, %499 : vector<1x128xf32>
    %501 = vector.extract_strided_slice %494 {offsets = [0, 128], sizes = [1, 128], strides = [1, 1]} : vector<1x512xf32> to vector<1x128xf32>
    %502 = arith.negf %501 : vector<1x128xf32>
    %503 = math.exp %502 : vector<1x128xf32>
    %cst_96 = arith.constant 1.000000e+00 : f32
    %504 = vector.broadcast %cst_96 : f32 to vector<1x128xf32>
    %505 = arith.addf %504, %503 : vector<1x128xf32>
    %506 = arith.divf %504, %505 : vector<1x128xf32>
    %507 = vector.extract_strided_slice %494 {offsets = [0, 256], sizes = [1, 128], strides = [1, 1]} : vector<1x512xf32> to vector<1x128xf32>
    %508 = math.tanh %507 : vector<1x128xf32>
    %509 = vector.extract_strided_slice %494 {offsets = [0, 384], sizes = [1, 128], strides = [1, 1]} : vector<1x512xf32> to vector<1x128xf32>
    %510 = arith.negf %509 : vector<1x128xf32>
    %511 = math.exp %510 : vector<1x128xf32>
    %cst_97 = arith.constant 1.000000e+00 : f32
    %512 = vector.broadcast %cst_97 : f32 to vector<1x128xf32>
    %513 = arith.addf %512, %511 : vector<1x128xf32>
    %514 = arith.divf %512, %513 : vector<1x128xf32>
    %515 = arith.mulf %506, %489 : vector<1x128xf32>
    %516 = arith.mulf %500, %508 : vector<1x128xf32>
    %517 = arith.addf %515, %516 : vector<1x128xf32>
    %518 = math.tanh %517 : vector<1x128xf32>
    %519 = arith.mulf %514, %518 : vector<1x128xf32>
    %cst_98 = arith.constant dense<0.000000e+00> : vector<1x512xf32>
    %520 = tpu.matmul %519, %377, %cst_98 {dimension_numbers = #tpu.dot_dimension_numbers<[1], [0], [0], [1], [0, 0, 1, 1], [], []>} : vector<1x128xf32>, vector<128x512xf32>, vector<1x512xf32> -> vector<1x512xf32>
    %521 = vector.extract_strided_slice %376 {offsets = [5, 0], sizes = [1, 512], strides = [1, 1]} : vector<8x512xf32> to vector<1x512xf32>
    %522 = arith.addf %520, %521 : vector<1x512xf32>
    %523 = vector.extract_strided_slice %522 {offsets = [0, 0], sizes = [1, 128], strides = [1, 1]} : vector<1x512xf32> to vector<1x128xf32>
    %524 = arith.negf %523 : vector<1x128xf32>
    %525 = math.exp %524 : vector<1x128xf32>
    %cst_99 = arith.constant 1.000000e+00 : f32
    %526 = vector.broadcast %cst_99 : f32 to vector<1x128xf32>
    %527 = arith.addf %526, %525 : vector<1x128xf32>
    %528 = arith.divf %526, %527 : vector<1x128xf32>
    %529 = vector.extract_strided_slice %522 {offsets = [0, 128], sizes = [1, 128], strides = [1, 1]} : vector<1x512xf32> to vector<1x128xf32>
    %530 = arith.negf %529 : vector<1x128xf32>
    %531 = math.exp %530 : vector<1x128xf32>
    %cst_100 = arith.constant 1.000000e+00 : f32
    %532 = vector.broadcast %cst_100 : f32 to vector<1x128xf32>
    %533 = arith.addf %532, %531 : vector<1x128xf32>
    %534 = arith.divf %532, %533 : vector<1x128xf32>
    %535 = vector.extract_strided_slice %522 {offsets = [0, 256], sizes = [1, 128], strides = [1, 1]} : vector<1x512xf32> to vector<1x128xf32>
    %536 = math.tanh %535 : vector<1x128xf32>
    %537 = vector.extract_strided_slice %522 {offsets = [0, 384], sizes = [1, 128], strides = [1, 1]} : vector<1x512xf32> to vector<1x128xf32>
    %538 = arith.negf %537 : vector<1x128xf32>
    %539 = math.exp %538 : vector<1x128xf32>
    %cst_101 = arith.constant 1.000000e+00 : f32
    %540 = vector.broadcast %cst_101 : f32 to vector<1x128xf32>
    %541 = arith.addf %540, %539 : vector<1x128xf32>
    %542 = arith.divf %540, %541 : vector<1x128xf32>
    %543 = arith.mulf %534, %517 : vector<1x128xf32>
    %544 = arith.mulf %528, %536 : vector<1x128xf32>
    %545 = arith.addf %543, %544 : vector<1x128xf32>
    %546 = math.tanh %545 : vector<1x128xf32>
    %547 = arith.mulf %542, %546 : vector<1x128xf32>
    %cst_102 = arith.constant dense<0.000000e+00> : vector<1x512xf32>
    %548 = tpu.matmul %547, %377, %cst_102 {dimension_numbers = #tpu.dot_dimension_numbers<[1], [0], [0], [1], [0, 0, 1, 1], [], []>} : vector<1x128xf32>, vector<128x512xf32>, vector<1x512xf32> -> vector<1x512xf32>
    %549 = vector.extract_strided_slice %376 {offsets = [6, 0], sizes = [1, 512], strides = [1, 1]} : vector<8x512xf32> to vector<1x512xf32>
    %550 = arith.addf %548, %549 : vector<1x512xf32>
    %551 = vector.extract_strided_slice %550 {offsets = [0, 0], sizes = [1, 128], strides = [1, 1]} : vector<1x512xf32> to vector<1x128xf32>
    %552 = arith.negf %551 : vector<1x128xf32>
    %553 = math.exp %552 : vector<1x128xf32>
    %cst_103 = arith.constant 1.000000e+00 : f32
    %554 = vector.broadcast %cst_103 : f32 to vector<1x128xf32>
    %555 = arith.addf %554, %553 : vector<1x128xf32>
    %556 = arith.divf %554, %555 : vector<1x128xf32>
    %557 = vector.extract_strided_slice %550 {offsets = [0, 128], sizes = [1, 128], strides = [1, 1]} : vector<1x512xf32> to vector<1x128xf32>
    %558 = arith.negf %557 : vector<1x128xf32>
    %559 = math.exp %558 : vector<1x128xf32>
    %cst_104 = arith.constant 1.000000e+00 : f32
    %560 = vector.broadcast %cst_104 : f32 to vector<1x128xf32>
    %561 = arith.addf %560, %559 : vector<1x128xf32>
    %562 = arith.divf %560, %561 : vector<1x128xf32>
    %563 = vector.extract_strided_slice %550 {offsets = [0, 256], sizes = [1, 128], strides = [1, 1]} : vector<1x512xf32> to vector<1x128xf32>
    %564 = math.tanh %563 : vector<1x128xf32>
    %565 = vector.extract_strided_slice %550 {offsets = [0, 384], sizes = [1, 128], strides = [1, 1]} : vector<1x512xf32> to vector<1x128xf32>
    %566 = arith.negf %565 : vector<1x128xf32>
    %567 = math.exp %566 : vector<1x128xf32>
    %cst_105 = arith.constant 1.000000e+00 : f32
    %568 = vector.broadcast %cst_105 : f32 to vector<1x128xf32>
    %569 = arith.addf %568, %567 : vector<1x128xf32>
    %570 = arith.divf %568, %569 : vector<1x128xf32>
    %571 = arith.mulf %562, %545 : vector<1x128xf32>
    %572 = arith.mulf %556, %564 : vector<1x128xf32>
    %573 = arith.addf %571, %572 : vector<1x128xf32>
    %574 = math.tanh %573 : vector<1x128xf32>
    %575 = arith.mulf %570, %574 : vector<1x128xf32>
    %cst_106 = arith.constant dense<0.000000e+00> : vector<1x512xf32>
    %576 = tpu.matmul %575, %377, %cst_106 {dimension_numbers = #tpu.dot_dimension_numbers<[1], [0], [0], [1], [0, 0, 1, 1], [], []>} : vector<1x128xf32>, vector<128x512xf32>, vector<1x512xf32> -> vector<1x512xf32>
    %577 = vector.extract_strided_slice %376 {offsets = [7, 0], sizes = [1, 512], strides = [1, 1]} : vector<8x512xf32> to vector<1x512xf32>
    %578 = arith.addf %576, %577 : vector<1x512xf32>
    %579 = vector.extract_strided_slice %578 {offsets = [0, 0], sizes = [1, 128], strides = [1, 1]} : vector<1x512xf32> to vector<1x128xf32>
    %580 = arith.negf %579 : vector<1x128xf32>
    %581 = math.exp %580 : vector<1x128xf32>
    %cst_107 = arith.constant 1.000000e+00 : f32
    %582 = vector.broadcast %cst_107 : f32 to vector<1x128xf32>
    %583 = arith.addf %582, %581 : vector<1x128xf32>
    %584 = arith.divf %582, %583 : vector<1x128xf32>
    %585 = vector.extract_strided_slice %578 {offsets = [0, 128], sizes = [1, 128], strides = [1, 1]} : vector<1x512xf32> to vector<1x128xf32>
    %586 = arith.negf %585 : vector<1x128xf32>
    %587 = math.exp %586 : vector<1x128xf32>
    %cst_108 = arith.constant 1.000000e+00 : f32
    %588 = vector.broadcast %cst_108 : f32 to vector<1x128xf32>
    %589 = arith.addf %588, %587 : vector<1x128xf32>
    %590 = arith.divf %588, %589 : vector<1x128xf32>
    %591 = vector.extract_strided_slice %578 {offsets = [0, 256], sizes = [1, 128], strides = [1, 1]} : vector<1x512xf32> to vector<1x128xf32>
    %592 = math.tanh %591 : vector<1x128xf32>
    %593 = vector.extract_strided_slice %578 {offsets = [0, 384], sizes = [1, 128], strides = [1, 1]} : vector<1x512xf32> to vector<1x128xf32>
    %594 = arith.negf %593 : vector<1x128xf32>
    %595 = math.exp %594 : vector<1x128xf32>
    %cst_109 = arith.constant 1.000000e+00 : f32
    %596 = vector.broadcast %cst_109 : f32 to vector<1x128xf32>
    %597 = arith.addf %596, %595 : vector<1x128xf32>
    %598 = arith.divf %596, %597 : vector<1x128xf32>
    %599 = arith.mulf %590, %573 : vector<1x128xf32>
    %600 = arith.mulf %584, %592 : vector<1x128xf32>
    %601 = arith.addf %599, %600 : vector<1x128xf32>
    %602 = math.tanh %601 : vector<1x128xf32>
    %603 = arith.mulf %598, %602 : vector<1x128xf32>
    %604 = tpu.concatenate %407, %435, %463, %491, %519, %547, %575, %603 in 0 : vector<1x128xf32>, vector<1x128xf32>, vector<1x128xf32>, vector<1x128xf32>, vector<1x128xf32>, vector<1x128xf32>, vector<1x128xf32>, vector<1x128xf32> -> vector<8x128xf32>
    %c0_110 = arith.constant 0 : index
    %c0_111 = arith.constant 0 : index
    %605 = vector.load %arg10[%c0_110, %c0_111] : memref<128x128xf32, #tpu.memory_space<vmem>>, vector<128x128xf32>
    %cst_112 = arith.constant dense<0.000000e+00> : vector<8x128xf32>
    %606 = tpu.matmul %604, %605, %cst_112 {dimension_numbers = #tpu.dot_dimension_numbers<[1], [0], [0], [1], [0, 0, 1, 1], [], []>} : vector<8x128xf32>, vector<128x128xf32>, vector<8x128xf32> -> vector<8x128xf32>
    %c0_113 = arith.constant 0 : index
    %c0_114 = arith.constant 0 : index
    %607 = vector.load %arg11[%c0_113, %c0_114] : memref<1x128xf32, #tpu.memory_space<vmem>>, vector<1x128xf32>
    %608 = vector.broadcast %607 : vector<1x128xf32> to vector<8x128xf32>
    %609 = arith.addf %606, %608 : vector<8x128xf32>
    %610 = tpu.iota {dimensions = array<i32: 1>} : vector<8x128xi32>
    %c6_i32_115 = arith.constant 6 : i32
    %611 = vector.broadcast %c6_i32_115 : i32 to vector<8x128xi32>
    %612 = arith.cmpi slt, %610, %611 : vector<8x128xi32>
    %cst_116 = arith.constant -1.000000e+30 : f32
    %613 = vector.broadcast %cst_116 : f32 to vector<8x128xf32>
    %614 = arith.select %612, %609, %613 : vector<8x128xi1>, vector<8x128xf32>
    %cst_117 = arith.constant dense<0xFF800000> : vector<8xf32>
    %615 = vector.multi_reduction <maximumf>, %614, %cst_117 [1] : vector<8x128xf32> to vector<8xf32>
    %616 = vector.shape_cast %615 : vector<8xf32> to vector<8x1xf32>
    %617 = vector.broadcast %616 : vector<8x1xf32> to vector<8x128xf32>
    %618 = arith.subf %614, %617 : vector<8x128xf32>
    %619 = math.exp %618 : vector<8x128xf32>
    %cst_118 = arith.constant dense<0.000000e+00> : vector<8xf32>
    %620 = vector.multi_reduction <add>, %619, %cst_118 [1] : vector<8x128xf32> to vector<8xf32>
    %621 = vector.shape_cast %620 : vector<8xf32> to vector<8x1xf32>
    %622 = math.log %621 : vector<8x1xf32>
    %623 = vector.broadcast %622 : vector<8x1xf32> to vector<8x128xf32>
    %624 = arith.subf %618, %623 : vector<8x128xf32>
    %c0_119 = arith.constant 0 : index
    %c0_120 = arith.constant 0 : index
    %625 = vector.load %arg12[%c0_119, %c0_120] : memref<8x128xf32, #tpu.memory_space<vmem>>, vector<8x128xf32>
    tpu.vector_store %arg12[%c0_119, %c0_120], %624 {strides = array<i32>} : memref<8x128xf32, #tpu.memory_space<vmem>>, vector<8x128xf32>,
    return
  }
}

</mosaic_0001>

<bundles_post_ra>
// kernel: forward.1
= control target key start
LH: loop header
LB: loop body
LE: loop exit
PB: predicated region body
PF: predicated region fallthrough
CT: control target
= control target key end

     0   :  { %vm78_vm0 = vcmask 64512   ;;  %v6048_v8 = vmov 0.0   ;;  %s7936_s0 = inlined_call_operand.vmem [shape: f32[80,8], index: 0, kind: input, shape index: {}]   ;;  %s7937_s1 = inlined_call_operand.vmem [shape: s32[8,1], index: 1, kind: input, shape index: {}]   ;;  %s7938_s2 = inlined_call_operand.vmem [shape: f32[8,12], index: 2, kind: input, shape index: {}]   ;;  %s7939_s3 = inlined_call_operand.vmem [shape: f32[8,512], index: 3, kind: input, shape index: {}]   ;;  %s7940_s4 = inlined_call_operand.vmem [shape: f32[128,512], index: 4, kind: input, shape index: {}]   ;;  %s7941_s5 = inlined_call_operand.vmem [shape: f32[1,512], index: 5, kind: input, shape index: {}]   ;;  %s7942_s6 = inlined_call_operand.vmem [shape: f32[12,512], index: 6, kind: input, shape index: {}]   ;;  %s7943_s7 = inlined_call_operand.vmem [shape: f32[128,512], index: 7, kind: input, shape index: {}]   ;;  %s7944_s8 = inlined_call_operand.vmem [shape: f32[128,512], index: 8, kind: input, shape index: {}]   ;;  %s7945_s9 = inlined_call_operand.vmem [shape: f32[1,512], index: 9, kind: input, shape index: {}]   ;;  %s7946_s10 = inlined_call_operand.vmem [shape: f32[128,128], index: 10, kind: input, shape index: {}]   ;;  %s7947_s11 = inlined_call_operand.vmem [shape: f32[1,128], index: 11, kind: input, shape index: {}]   ;;  %s7948_s12 = inlined_call_operand.hbm [shape: f32[8,128], index: 12, kind: output, shape index: {}]  }
   0x1   :  { %v53_v0 = vld [vmem:[%s7939_s3 + $0x8] sm:$0xff]  ;;  %v52_v1 = vld [vmem:[%s7939_s3] sm:$0xff]  ;;  %v55_v5 = vld [vmem:[%s7939_s3 + $0x18] sm:$0xff]  ;;  %173 = vmatprep.mubr.f32.mxu0 %v6048_v8  ;;  %221 = vmatprep.mubr.f32.mxu1 %v6048_v8 }
   0x2   :  { %109 = vmatprep.subr.mxu0 %v53_v0  ;;  %5638 = vmatprep.subr.mxu1 %v53_v0  ;;  %v6128_v2 = vld [vmem:[%s7936_s0] sm:$0xff]  ;;  %v411_v4 = vld [vmem:[%s7940_s4 + $0x8] sm:$0xff]  ;;  %v54_v10 = vld [vmem:[%s7939_s3 + $0x10] sm:$0xff] }
   0x3   :  { %v6133_v3 = vld [vmem:[%s7936_s0 + $0x40] sm:$0xff]  ;;  %110 = vmatpush1.msra.mxu0 %v52_v1  ;;  %5639 = vmatpush1.msra.mxu1 %v52_v1  ;;  %v415_v6 = vld [vmem:[%s7940_s4 + $0x28] sm:$0xff]  ;;  %v413_v23 = vld [vmem:[%s7940_s4 + $0x18] sm:$0xff] }
   0x4   :  { %v410_v7 = vld [vmem:[%s7940_s4] sm:$0xff]  ;;  %v6149_v9 = vpack.c.bf16 %v415_v6, %v411_v4  ;;  %v6160_v12 = vld [vmem:[%s7936_s0 + $0x8] sm:$0xff]  ;;  %4251 = vmatmul.mubr.msk.f32.vlgmr.msra.gmra.mrb[0].mxu0 %vm78_vm0, %v6128_v2  ;;  %4259 = vmatmul.mubr.msk.f32.vlgmr.msra.gmra.mrb[0].mxu1 %vm78_vm0, %v6133_v3  ;;  %v417_v24 = vld [vmem:[%s7940_s4 + $0x38] sm:$0xff] }
   0x5   :  { %v414_v11 = vld [vmem:[%s7940_s4 + $0x20] sm:$0xff]  ;;  %v419_v14 = vld [vmem:[%s7940_s4 + $0x48] sm:$0xff]  ;;  %234 = vmatprep.subr.mxu1 %v55_v5  ;;  %179 = vmatprep.mubr.f32.mxu0 %v6048_v8  ;;  %v6207_v26 = vpack.c.bf16 %v417_v24, %v413_v23  ;;  %v412_v29 = vld [vmem:[%s7940_s4 + $0x10] sm:$0xff] }
   0x6   :  { %v6166_v13 = vpack.c.bf16 %v414_v11, %v410_v7  ;;  %v423_v15 = vld [vmem:[%s7940_s4 + $0x68] sm:$0xff]  ;;  %v418_v16 = vld [vmem:[%s7940_s4 + $0x40] sm:$0xff]  ;;  %4387 = vmatprep.subr.bf16.mxu0 %v6149_v9  ;;  %235 = vmatpush1.msra.mxu1 %v54_v10  ;;  %v416_v30 = vld [vmem:[%s7940_s4 + $0x30] sm:$0xff] }
   0x7   :  { %v6181_v17 = vld [vmem:[%s7936_s0 + $0x48] sm:$0xff]  ;;  %v6183_v18 = vpack.c.bf16 %v423_v15, %v419_v14  ;;  %v422_v19 = vld [vmem:[%s7940_s4 + $0x60] sm:$0xff]  ;;  %227 = vmatprep.mubr.f32.mxu1 %v6048_v8  ;;  %v44_v32 = vld [vmem:[%s7936_s0 + $0x10] sm:$0xff]  ;;  %v6233_v33 = vpack.c.bf16 %v416_v30, %v412_v29  ;;  %4419 = vmatprep.subr.bf16.mxu1 %v6207_v26 }
   0x8   :  { %v427_v20 = vld [vmem:[%s7940_s4 + $0x88] sm:$0xff]  ;;  %4389 = vmatpush1.bf16.msra.mxu0 %v6166_v13  ;;  %v6192_v21 = vpack.c.bf16 %v422_v19, %v418_v16  ;;  %v426_v27 = vld [vmem:[%s7940_s4 + $0x80] sm:$0xff]  ;;  %4260 = vmatmul.mubr.msk.f32.gmra.mrb[2].mxu1 %vm78_vm0, %v6181_v17  ;;  %v421_v36 = vld [vmem:[%s7940_s4 + $0x58] sm:$0xff] }
   0x9   :  { %v431_v22 = vld [vmem:[%s7940_s4 + $0xa8] sm:$0xff]  ;;  %v430_v28 = vld [vmem:[%s7940_s4 + $0xa0] sm:$0xff]  ;;  %4252 = vmatmul.mubr.msk.f32.gmra.mrb[2].mxu0 %vm78_vm0, %v6160_v12  ;;  %4391 = vmatprep.subr.bf16.mxu0 %v6183_v18  ;;  %v425_v37 = vld [vmem:[%s7940_s4 + $0x78] sm:$0xff] }
   0xa   :  { %v6205_v25 = vpack.c.bf16 %v431_v22, %v427_v20  ;;  %v435_v31 = vld [vmem:[%s7940_s4 + $0xc8] sm:$0xff]  ;;  %185 = vmatprep.mubr.f32.mxu0 %v6048_v8  ;;  %298 = vmatprep.mubr.f32.mxu1 %v6048_v8  ;;  %v6240_v35 = vpack.c.bf16 %v430_v28, %v426_v27  ;;  %v420_v38 = vld [vmem:[%s7940_s4 + $0x50] sm:$0xff]  ;;  %v434_v40 = vld [vmem:[%s7940_s4 + $0xc0] sm:$0xff]  ;;  %v6261_v42 = vpack.c.bf16 %v425_v37, %v421_v36 }
   0xb   :  { %v439_v34 = vld [vmem:[%s7940_s4 + $0xe8] sm:$0xff]  ;;  %v438_v41 = vld [vmem:[%s7940_s4 + $0xe0] sm:$0xff]  ;;  %v424_v43 = vld [vmem:[%s7940_s4 + $0x70] sm:$0xff] }
   0xc   :  { %4393 = vmatpush1.bf16.msra.mxu0 %v6192_v21  ;;  %v6253_v39 = vpack.c.bf16 %v439_v34, %v435_v31  ;;  %4261 = vmatmul.mubr.msk.f32.vlgmr.msra.gmra.mrb[4].mxu1 %vm78_vm0, %v6128_v2  ;;  %v443_v44 = vld [vmem:[%s7940_s4 + $0x108] sm:$0xff]  ;;  %v45_v46 = vld [vmem:[%s7936_s0 + $0x18] sm:$0xff]  ;;  %v6280_v47 = vpack.c.bf16 %v424_v43, %v420_v38  ;;  %v6290_v50 = vpack.c.bf16 %v438_v41, %v434_v40  ;;  %v442_v51 = vld [vmem:[%s7940_s4 + $0x100] sm:$0xff] }
   0xd   :  { %4395 = vmatprep.subr.bf16.mxu0 %v6205_v25  ;;  %4253 = vmatmul.mubr.msk.f32.gmra.mrb[4].mxu0 %vm78_vm0, %v44_v32  ;;  %v447_v45 = vld [vmem:[%s7940_s4 + $0x128] sm:$0xff]  ;;  %v429_v48 = vld [vmem:[%s7940_s4 + $0x98] sm:$0xff]  ;;  %v446_v52 = vld [vmem:[%s7940_s4 + $0x120] sm:$0xff] }
   0xe   :  { %4421 = vmatpush1.bf16.msra.mxu1 %v6233_v33  ;;  %191 = vmatprep.mubr.f32.mxu0 %v6048_v8  ;;  %v433_v49 = vld [vmem:[%s7940_s4 + $0xb8] sm:$0xff]  ;;  %v6300_v53 = vpack.c.bf16 %v447_v45, %v443_v44  ;;  %v428_v55 = vld [vmem:[%s7940_s4 + $0x90] sm:$0xff]  ;;  %v451_v57 = vld [vmem:[%s7940_s4 + $0x148] sm:$0xff]  ;;  %v6332_v62 = vpack.c.bf16 %v446_v52, %v442_v51 }
   0xf   :  { %304 = vmatprep.mubr.f32.mxu1 %v6048_v8  ;;  %4423 = vmatprep.subr.bf16.mxu1 %v6261_v42  ;;  %v6302_v54 = vpack.c.bf16 %v433_v49, %v429_v48  ;;  %v432_v56 = vld [vmem:[%s7940_s4 + $0xb0] sm:$0xff]  ;;  %v455_v58 = vld [vmem:[%s7940_s4 + $0x168] sm:$0xff]  ;;  %v437_v59 = vld [vmem:[%s7940_s4 + $0xd8] sm:$0xff] }
  0x10   :  { %4397 = vmatpush1.bf16.msra.mxu0 %v6240_v35  ;;  %4262 = vmatmul.mubr.msk.f32.gmra.mrb[6].mxu1 %vm78_vm0, %v6160_v12  ;;  %v441_v60 = vld [vmem:[%s7940_s4 + $0xf8] sm:$0xff]  ;;  %v46_v61 = vld [vmem:[%s7936_s0 + $0x20] sm:$0xff]  ;;  %v6334_v63 = vpack.c.bf16 %v432_v56, %v428_v55  ;;  %v6344_v2 = vpack.c.bf16 %v455_v58, %v451_v57  ;;  %v459_v5 = vld [vmem:[%s7940_s4 + $0x188] sm:$0xff] }
  0x11   :  { %4399 = vmatprep.subr.bf16.mxu0 %v6253_v39  ;;  %4254 = vmatmul.mubr.msk.f32.gmra.mrb[6].mxu0 %vm78_vm0, %v45_v46  ;;  %v450_v0 = vld [vmem:[%s7940_s4 + $0x140] sm:$0xff]  ;;  %v6346_v4 = vpack.c.bf16 %v441_v60, %v437_v59  ;;  %v436_v6 = vld [vmem:[%s7940_s4 + $0xd0] sm:$0xff]  ;;  %v463_v10 = vld [vmem:[%s7940_s4 + $0x1a8] sm:$0xff] }
  0x12   :  { %4425 = vmatpush1.bf16.msra.mxu1 %v6280_v47  ;;  %197 = vmatprep.mubr.f32.mxu0 %v6048_v8  ;;  %v454_v1 = vld [vmem:[%s7940_s4 + $0x160] sm:$0xff]  ;;  %v440_v7 = vld [vmem:[%s7940_s4 + $0xf0] sm:$0xff]  ;;  %v445_v11 = vld [vmem:[%s7940_s4 + $0x118] sm:$0xff]  ;;  %v6387_v22 = vpack.c.bf16 %v463_v10, %v459_v5 }
  0x13   :  { %310 = vmatprep.mubr.f32.mxu1 %v6048_v8  ;;  %4427 = vmatprep.subr.bf16.mxu1 %v6302_v54  ;;  %v449_v12 = vld [vmem:[%s7940_s4 + $0x138] sm:$0xff]  ;;  %v47_v14 = vld [vmem:[%s7936_s0 + $0x28] sm:$0xff]  ;;  %v6375_v15 = vpack.c.bf16 %v454_v1, %v450_v0  ;;  %v6377_v16 = vpack.c.bf16 %v440_v7, %v436_v6  ;;  %v458_v19 = vld [vmem:[%s7940_s4 + $0x180] sm:$0xff] }
  0x14   :  { %4401 = vmatpush1.bf16.msra.mxu0 %v6290_v50  ;;  %4263 = vmatmul.mubr.msk.f32.gmra.mrb[8].mxu1 %vm78_vm0, %v44_v32  ;;  %v462_v20 = vld [vmem:[%s7940_s4 + $0x1a0] sm:$0xff]  ;;  %v467_v23 = vld [vmem:[%s7940_s4 + $0x1c8] sm:$0xff]  ;;  %v6392_v24 = vpack.c.bf16 %v449_v12, %v445_v11  ;;  %v444_v27 = vld [vmem:[%s7940_s4 + $0x110] sm:$0xff] }
  0x15   :  { %4403 = vmatprep.subr.bf16.mxu0 %v6300_v53  ;;  %4255 = vmatmul.mubr.msk.f32.gmra.mrb[8].mxu0 %vm78_vm0, %v46_v61  ;;  %v448_v28 = vld [vmem:[%s7940_s4 + $0x130] sm:$0xff]  ;;  %v471_v29 = vld [vmem:[%s7940_s4 + $0x1e8] sm:$0xff]  ;;  %v453_v30 = vld [vmem:[%s7940_s4 + $0x158] sm:$0xff]  ;;  %v6418_v34 = vpack.c.bf16 %v462_v20, %v458_v19 }
  0x16   :  { %203 = vmatprep.mubr.f32.mxu0 %v6048_v8  ;;  %316 = vmatprep.mubr.f32.mxu1 %v6048_v8  ;;  %v457_v31 = vld [vmem:[%s7940_s4 + $0x178] sm:$0xff]  ;;  %v48_v32 = vld [vmem:[%s7936_s0 + $0x30] sm:$0xff]  ;;  %v466_v36 = vld [vmem:[%s7940_s4 + $0x1c0] sm:$0xff]  ;;  %v6426_v38 = vpack.c.bf16 %v448_v28, %v444_v27 }
  0x17   :  { %4429 = vmatpush1.bf16.msra.mxu1 %v6334_v63  ;;  %v470_v37 = vld [vmem:[%s7940_s4 + $0x1e0] sm:$0xff] }
  0x18   :  { %4405 = vmatpush1.bf16.msra.mxu0 %v6332_v62  ;;  %4431 = vmatprep.subr.bf16.mxu1 %v6346_v4 }
  0x19   :  { %4407 = vmatprep.subr.bf16.mxu0 %v6344_v2  ;;  %4256 = vmatmul.mubr.msk.f32.gmra.mrb[10].mxu0 %vm78_vm0, %v47_v14 }
  0x1a   :  { %4264 = vmatmul.mubr.msk.f32.gmra.mrb[10].mxu1 %vm78_vm0, %v45_v46  ;;  %209 = vmatprep.mubr.f32.mxu0 %v6048_v8 }
  0x1b   :  { %322 = vmatprep.mubr.f32.mxu1 %v6048_v8  ;;  %4433 = vmatpush1.bf16.msra.mxu1 %v6377_v16 }
  0x1c   :  { %4409 = vmatpush1.bf16.msra.mxu0 %v6375_v15 }
  0x1d   :  { %17 = vsyncpa [#allocation4], 0  ;;  %4411 = vmatprep.subr.bf16.mxu0 %v6387_v22  ;;  %v6429_v40 = vpack.c.bf16 %v471_v29, %v467_v23  ;;  %4435 = vmatprep.subr.bf16.mxu1 %v6392_v24  ;;  %v6432_v41 = vpack.c.bf16 %v457_v31, %v453_v30  ;;  %v452_v43 = vld [vmem:[%s7940_s4 + $0x150] sm:$0xff]  ;;  %v6443_v45 = vld [vmem:[%s7937_s1] sm:$0xff]  ;;  %v6459_v51 = vpack.c.bf16 %v470_v37, %v466_v36  ;;  %v6049_v60 = vmov 0   ;;  %s6053_s16 = smov [#allocation3]  }
  0x1e   :  { %v456_v44 = vld [vmem:[%s7940_s4 + $0x170] sm:$0xff]  ;;  %4257 = vmatmul.mubr.msk.f32.gmra.mrb[12].mxu0 %vm78_vm0, %v48_v32  ;;  %4265 = vmatmul.mubr.msk.f32.gmra.mrb[12].mxu1 %vm78_vm0, %v46_v61  ;;  %v461_v46 = vld [vmem:[%s7940_s4 + $0x198] sm:$0xff]  ;;  %vm400_vm1 = vcmp.gt.s32.totalorder %v6443_v45, 0  ;;  %vm401_vm2 = vcmp.gt.s32.totalorder %v6443_v45, 1  ;;  %vm404_vm3 = vcmp.gt.s32.totalorder %v6443_v45, 4  ;;  %vm406_vm4 = vcmp.gt.s32.totalorder %v6443_v45, 6 }
  0x1f   :  { %v465_v48 = vld [vmem:[%s7940_s4 + $0x1b8] sm:$0xff]  ;;  %215 = vmatprep.mubr.f32.mxu0 %v6048_v8  ;;  %328 = vmatprep.mubr.f32.mxu1 %v6048_v8  ;;  %v6462_v52 = vpack.c.bf16 %v456_v44, %v452_v43  ;;  %v460_v56 = vld [vmem:[%s7940_s4 + $0x190] sm:$0xff]  ;;  %v644_v61 = vsel %vm400_vm1, 1, %v6049_v60  ;;  %v821_v7 = vsel %vm401_vm2, 1, %v6049_v60  ;;  %v1352_v11 = vsel %vm404_vm3, 1, %v6049_v60 }
  0x20   :  { %v49_v49 = vld [vmem:[%s7936_s0 + $0x38] sm:$0xff]  ;;  %4413 = vmatpush1.bf16.msra.mxu0 %v6418_v34  ;;  %4437 = vmatpush1.bf16.msra.mxu1 %v6426_v38  ;;  %v6467_v55 = vpack.c.bf16 %v465_v48, %v461_v46  ;;  %v464_v57 = vld [vmem:[%s7940_s4 + $0x1b0] sm:$0xff]  ;;  %v1706_v12 = vsel %vm406_vm4, 1, %v6049_v60  ;;  %vm408_vm5 = vcmp.gt.s32.totalorder %v6443_v45, 8  ;;  %v7949_v23 = vlaneseq  ;;  %v56_v29 = vld [vmem:[%s7941_s5] sm:$0xf] }
  0x21   :  { %4415 = vmatprep.subr.bf16.mxu0 %v6429_v40  ;;  %4439 = vmatprep.subr.bf16.mxu1 %v6432_v41  ;;  %v469_v58 = vld [vmem:[%s7940_s4 + $0x1d8] sm:$0xff]  ;;  %v6488_v0 = vpack.c.bf16 %v464_v57, %v460_v56  ;;  %v468_v5 = vld [vmem:[%s7940_s4 + $0x1d0] sm:$0xff]  ;;  %vm402_vm7 = vcmp.gt.s32.totalorder %v6443_v45, 2  ;;  %vm403_vm8 = vcmp.gt.s32.totalorder %v6443_v45, 3  ;;  %vm405_vm9 = vcmp.gt.s32.totalorder %v6443_v45, 5  ;;  %s4243_s0 = sshll.u32 %s6053_s16, 4  ;;  %s4244_s0 = int_to_ptr.vmem [resolvable:$true] %s4243_s0 }
  0x22   :  { %4258 = vmatmul.mubr.msk.f32.gmra.mrb[14].mxu0 %vm78_vm0, %v49_v49  ;;  %4266 = vmatmul.mubr.msk.f32.gmra.mrb[14].mxu1 %vm78_vm0, %v47_v14  ;;  %v473_v59 = vld [vmem:[%s7940_s4 + $0x1f8] sm:$0xff]  ;;  %v472_v6 = vld [vmem:[%s7940_s4 + $0x1f0] sm:$0xff]  ;;  %v6571_v27 = vshrl.u32 %v7949_v23, 7  ;;  %vm407_vm10 = vcmp.gt.s32.totalorder %v6443_v45, 7  ;;  %vm409_vm11 = vcmp.gt.s32.totalorder %v6443_v45, 9  ;;  %vm2462_vm4 = vcmask 1043456   ;;  %p6029_p1 = scmp.lt.s32.totalorder %s4244_s0, %s4244_s0 }
  0x23   :  { %334 = vmatprep.mubr.f32.mxu1 %v6048_v8  ;;  %542 = vmatprep.mubr.f32.mxu0 %v6048_v8  ;;  %v6492_v1 = vpack.c.bf16 %v473_v59, %v469_v58  ;;  %v6506_v10 = vpack.c.bf16 %v472_v6, %v468_v5 }
  0x24   :  { %4417 = vmatpush1.bf16.msra.mxu0 %v6459_v51  ;;  %4441 = vmatpush1.bf16.msra.mxu1 %v6462_v52  ;;  %v60_v28 = vsub.s32 0, %v6571_v27  ;;  %v64_v30 = vsub.s32 1, %v6571_v27  ;;  %v7950_v56 = vsub.s32 3, %v6571_v27 }
  0x25   :  { %4443 = vmatprep.subr.bf16.mxu1 %v6467_v55  ;;  %5730 = vset.pattern.permute.xlu0 %v6049_v60 }
  0x26   :  { %4267 = vmatmul.mubr.msk.f32.gmra.mrb[16].mxu1 %vm78_vm0, %v48_v32  ;;  %646 = vperm.xlu0 %5730, %v644_v61   ;;  %v6580_v31 = vrot.slane %v56_v29, %v60_v28  ;;  %v6584_v32 = vrot.slane %v56_v29, %v64_v30  ;;  %v6596_v58 = vrot.slane %v56_v29, %v7950_v56 }
  0x27   :  { %543 = vmatmul.mubr.f32.vlgmr.msra.gmra.mrb[0].mxu0 %v6048_v8  ;;  %340 = vmatprep.mubr.f32.mxu1 %v6048_v8 }
  0x28   :  { %4445 = vmatpush1.bf16.msra.mxu1 %v6488_v0  ;;  %4451 = vmatprep.subr.bf16.mxu0 %v6149_v9 }
  0x29   :  { %4447 = vmatprep.subr.bf16.mxu1 %v6492_v1  ;;  %4453 = vmatpush1.bf16.msra.mxu0 %v6166_v13 }
  0x2a   :  { %4268 = vmatmul.mubr.msk.f32.gmra.mrb[18].mxu1 %vm78_vm0, %v49_v49  ;;  %823 = vperm.xlu0 %5730, %v821_v7   ;;  %v68_v49 = vsub.s32 2, %v6571_v27 }
  0x2b   :  { %346 = vmatprep.mubr.f32.mxu1 %v6048_v8  ;;  %4455 = vmatprep.subr.bf16.mxu0 %v6183_v18 }
  0x2c   :  { %4449 = vmatpush1.bf16.msra.mxu1 %v6506_v10  ;;  %719 = vmatprep.mubr.f32.mxu0 %v6048_v8  ;;  %v6592_v57 = vrot.slane %v56_v29, %v68_v49 }
  0x2d   :  { %4483 = vmatprep.subr.bf16.mxu1 %v6207_v26  ;;  %4457 = vmatpush1.bf16.msra.mxu0 %v6192_v21 }
  0x2e   :  { %4269 = vmatmul.mubr.msk.f32.gmra.mrb[20].mxu1 %vm78_vm0, %v6133_v3  ;;  %1354 = vperm.xlu0 %5730, %v1352_v11   ;;  %v2060_v3 = vsel %vm408_vm5, 1, %v6049_v60  ;;  %vm6050_vm5 = vmmov 1  }
  0x2f   :  { %352 = vmatprep.mubr.f32.mxu1 %v6048_v8  ;;  %4459 = vmatprep.subr.bf16.mxu0 %v6205_v25 }
  0x30   :  { %5731 = vset.pattern.permute.xlu1 %v6049_v60 }
  0x31   :  { %4461 = vmatpush1.bf16.msra.mxu0 %v6240_v35 }
  0x32   :  { %4270 = vmatmul.mubr.msk.f32.gmra.mrb[22].mxu1 %vm78_vm0, %v6181_v17  ;;  %1708 = vperm.xlu0 %5730, %v1706_v12  }
  0x33   :  { %613 = vmatprep.mubr.f32.mxu1 %v6048_v8  ;;  %4463 = vmatprep.subr.bf16.mxu0 %v6253_v39 }
  0x35   :  { %4465 = vmatpush1.bf16.msra.mxu0 %v6290_v50 }
  0x36   :  { %614 = vmatmul.mubr.f32.vlgmr.msra.gmra.mrb[4].mxu1 %v6048_v8  ;;  %2062 = vperm.xlu0 %5730, %v2060_v3  }
  0x37   :  { %4485 = vmatpush1.bf16.msra.mxu1 %v6233_v33  ;;  %4467 = vmatprep.subr.bf16.mxu0 %v6300_v53 }
  0x38   :  { %4487 = vmatprep.subr.bf16.mxu1 %v6261_v42  ;;  %790 = vmatprep.mubr.f32.mxu1 %v6048_v8 }
  0x39   :  { %4469 = vmatpush1.bf16.msra.mxu0 %v6332_v62 }
  0x3a   :  { %4471 = vmatprep.subr.bf16.mxu0 %v6344_v2 }
  0x3b   :  { %4489 = vmatpush1.bf16.msra.mxu1 %v6280_v47 }
  0x3c   :  { %4491 = vmatprep.subr.bf16.mxu1 %v6302_v54 }
  0x3d   :  { %4473 = vmatpush1.bf16.msra.mxu0 %v6375_v15 }
  0x3e   :  { %4475 = vmatprep.subr.bf16.mxu0 %v6387_v22 }
  0x3f   :  { %4493 = vmatpush1.bf16.msra.mxu1 %v6334_v63 }
  0x40   :  { %4495 = vmatprep.subr.bf16.mxu1 %v6346_v4 }
  0x41   :  { %4477 = vmatpush1.bf16.msra.mxu0 %v6418_v34 }
  0x42   :  { %4479 = vmatprep.subr.bf16.mxu0 %v6429_v40 }
  0x43   :  { %4497 = vmatpush1.bf16.msra.mxu1 %v6377_v16 }
  0x44   :  { %4499 = vmatprep.subr.bf16.mxu1 %v6392_v24 }
  0x45   :  { %4481 = vmatpush1.bf16.msra.mxu0 %v6459_v51 }
  0x46   :  { %4515 = vmatprep.subr.bf16.mxu0 %v6149_v9 }
  0x47   :  { %4501 = vmatpush1.bf16.msra.mxu1 %v6426_v38 }
  0x48   :  { %4503 = vmatprep.subr.bf16.mxu1 %v6432_v41 }
  0x4b   :  { %4505 = vmatpush1.bf16.msra.mxu1 %v6462_v52 }
  0x4c   :  { %4507 = vmatprep.subr.bf16.mxu1 %v6467_v55 }
  0x4f   :  { %4509 = vmatpush1.bf16.msra.mxu1 %v6488_v0 }
  0x50   :  { %4511 = vmatprep.subr.bf16.mxu1 %v6492_v1 }
  0x53   :  { %4513 = vmatpush1.bf16.msra.mxu1 %v6506_v10 }
  0x54   :  { %4547 = vmatprep.subr.bf16.mxu1 %v6207_v26 }
  0xd7   :  { %v6562_v17 = vpop.f32.mrb[0].mxu1 }
  0xd8   :  { %v6564_v14 = vpop.f32.mrb[1].mxu1 }
  0xdb   :  { %v6566_v19 = vpop.f32.mrb[2].mxu1 }
  0xdc   :  { %v6568_v20 = vpop.f32.mrb[3].mxu1 }
  0xfa   :  { %v544_v36 = vpop.f32.mrb[0].mxu0 }
  0xfb   :  { %v5640_v37 = vadd.f32 %v544_v36, %v6580_v31  ;;  %v546_v43 = vpop.f32.mrb[1].mxu0 }
  0xfc   :  { %v5641_v44 = vadd.f32 %v546_v43, %v6584_v32 }
  0xfd   :  { %v4271_v46 = vmul.f32 -1.442695, %v5640_v37 }
  0xfe   :  { %v4272_v48 = vmul.f32 -1.442695, %v5641_v44 }
  0xff   :  { %5732 = vpow2.f32 %v4271_v46 }
 0x100   :  { %5734 = vpow2.f32 %v4272_v48  ;;  %v647_v48 = vpop.permute.xlu0 %646 }
 0x101   :  { %vm648_vm6 = vcmp.eq.s32.totalorder %v647_v48, 1 }
 0x109   :  { %v5733_v59 = vpop.eup %5732  ;;  %v615_v61 = vpop.f32.mrb[4].mxu1 }
 0x10a   :  { %v5735_v5 = vpop.eup %5734  ;;  %v623_v6 = vadd.f32 1.0, %v5733_v59  ;;  %v5664_v7 = vadd.f32 %v615_v61, %v6592_v57  ;;  %v617_v11 = vpop.f32.mrb[5].mxu1 }
 0x10b   :  { %v629_v12 = vadd.f32 1.0, %v5735_v5  ;;  %v5665_v3 = vadd.f32 %v617_v11, %v6596_v58 }
 0x10c   :  { %5736 = vrcp.f32 %v623_v6 }
 0x10d   :  { %5738 = vrcp.f32 %v629_v12  ;;  %v4273_v36 = vmul.f32 -1.442695, %v5665_v3  ;;  %v1883_v3 = vsel %vm407_vm10, 1, %v6049_v60  ;;  %vm4118_vm10 = vcmask 1041408  }
 0x10e   :  { %5740 = vtanh.f32 %v5664_v7  ;;  %v1529_v7 = vsel %vm405_vm9, 1, %v6049_v60  ;;  %vm4116_vm9 = vcmask 1040384  }
 0x10f   :  { %5742 = vpow2.f32 %v4273_v36  ;;  %v2237_v36 = vsel %vm409_vm11, 1, %v6049_v60  ;;  %vm4120_vm11 = vcmask 1042432  }
 0x116   :  { %v5737_v37 = vpop.eup %5736 }
 0x117   :  { %v5739_v43 = vpop.eup %5738 }
 0x118   :  { %v5741_v44 = vpop.eup %5740  ;;  %v639_v29 = vmul.f32 0.0, %v5739_v43 }
 0x119   :  { %v5743_v46 = vpop.eup %5742  ;;  %v640_v23 = vmul.f32 %v5741_v44, %v5737_v37 }
 0x11a   :  { %v636_v56 = vadd.f32 1.0, %v5743_v46 }
 0x11b   :  { %v641_v59 = vadd.f32 %v640_v23, %v639_v29  ;;  %v998_v23 = vsel %vm402_vm7, 1, %v6049_v60 }
 0x11c   :  { %5744 = vrcp.f32 %v636_v56  ;;  %1000 = vperm.xlu1 %5731, %v998_v23   ;;  %v1175_v56 = vsel %vm403_vm8, 1, %v6049_v60  ;;  %vm2458_vm8 = vcmask 97280  }
 0x11d   :  { %5746 = vtanh.f32 %v641_v59  ;;  %v6600_v61 = vsel %vm648_vm6, %v641_v59, 0.0 }
 0x120   :  { %1177 = vperm.xlu1 %5731, %v1175_v56  }
 0x124   :  { %1531 = vperm.xlu1 %5731, %v1529_v7  }
 0x126   :  { %v5745_v5 = vpop.eup %5744 }
 0x127   :  { %v5747_v6 = vpop.eup %5746 }
 0x128   :  { %v643_v11 = vmul.f32 %v5747_v6, %v5745_v5  ;;  %1885 = vperm.xlu1 %5731, %v1883_v3  }
 0x12a   :  { %v6602_v12 = vsel %vm648_vm6, %v643_v11, 0.0  ;;  %4274 = vmatmul.mubr.msk.f32.vlgmr.msra.gmra.mrb[2].mxu0 %vm648_vm6, %v643_v11  ;;  %4275 = vmatmul.mubr.msk.f32.vlgmr.msra.gmra.mrb[6].mxu1 %vm648_vm6, %v643_v11  ;;  %vm7199_vm6 = vmpackc.low %vm2462_vm4, %vm6050_vm5 }
 0x12b   :  { %4517 = vmatpush1.bf16.msra.mxu0 %v6166_v13  ;;  %4549 = vmatpush1.bf16.msra.mxu1 %v6233_v33 }
 0x12c   :  { %4519 = vmatprep.subr.bf16.mxu0 %v6183_v18  ;;  %4551 = vmatprep.subr.bf16.mxu1 %v6261_v42 }
 0x12d   :  { %896 = vmatprep.mubr.f32.mxu0 %v6048_v8  ;;  %967 = vmatprep.mubr.f32.mxu1 %v6048_v8 }
 0x12e   :  { %2239 = vperm.xlu1 %5731, %v2237_v36  }
 0x12f   :  { %4521 = vmatpush1.bf16.msra.mxu0 %v6192_v21  ;;  %4553 = vmatpush1.bf16.msra.mxu1 %v6280_v47 }
 0x130   :  { %4523 = vmatprep.subr.bf16.mxu0 %v6205_v25  ;;  %4555 = vmatprep.subr.bf16.mxu1 %v6302_v54 }
 0x133   :  { %4525 = vmatpush1.bf16.msra.mxu0 %v6240_v35  ;;  %4557 = vmatpush1.bf16.msra.mxu1 %v6334_v63 }
 0x134   :  { %4527 = vmatprep.subr.bf16.mxu0 %v6253_v39  ;;  %4559 = vmatprep.subr.bf16.mxu1 %v6346_v4 }
 0x137   :  { %4529 = vmatpush1.bf16.msra.mxu0 %v6290_v50  ;;  %4561 = vmatpush1.bf16.msra.mxu1 %v6377_v16 }
 0x138   :  { %4531 = vmatprep.subr.bf16.mxu0 %v6300_v53  ;;  %4563 = vmatprep.subr.bf16.mxu1 %v6392_v24 }
 0x13b   :  { %4533 = vmatpush1.bf16.msra.mxu0 %v6332_v62  ;;  %4565 = vmatpush1.bf16.msra.mxu1 %v6426_v38 }
 0x13c   :  { %4535 = vmatprep.subr.bf16.mxu0 %v6344_v2  ;;  %4567 = vmatprep.subr.bf16.mxu1 %v6432_v41 }
 0x13f   :  { %4537 = vmatpush1.bf16.msra.mxu0 %v6375_v15  ;;  %4569 = vmatpush1.bf16.msra.mxu1 %v6462_v52 }
 0x140   :  { %4539 = vmatprep.subr.bf16.mxu0 %v6387_v22  ;;  %4571 = vmatprep.subr.bf16.mxu1 %v6467_v55 }
 0x143   :  { %4541 = vmatpush1.bf16.msra.mxu0 %v6418_v34  ;;  %4573 = vmatpush1.bf16.msra.mxu1 %v6488_v0 }
 0x144   :  { %4543 = vmatprep.subr.bf16.mxu0 %v6429_v40  ;;  %4575 = vmatprep.subr.bf16.mxu1 %v6492_v1 }
 0x147   :  { %4545 = vmatpush1.bf16.msra.mxu0 %v6459_v51  ;;  %4577 = vmatpush1.bf16.msra.mxu1 %v6506_v10 }
 0x148   :  { %4579 = vmatprep.subr.bf16.mxu0 %v6149_v9  ;;  %4611 = vmatprep.subr.bf16.mxu1 %v6207_v26 }
 0x1fd   :  { %v721_v37 = vpop.f32.mrb[2].mxu0  ;;  %v792_v43 = vpop.f32.mrb[6].mxu1 }
 0x1fe   :  { %v5642_v44 = vadd.f32 %v721_v37, %v6580_v31  ;;  %v723_v29 = vpop.f32.mrb[3].mxu0  ;;  %v794_v46 = vpop.f32.mrb[7].mxu1  ;;  %v5666_v45 = vadd.f32 %v792_v43, %v6592_v57 }
 0x1ff   :  { %v5643_v48 = vadd.f32 %v723_v29, %v6584_v32  ;;  %v5667_v6 = vadd.f32 %v794_v46, %v6596_v58  ;;  %v824_v46 = vpop.permute.xlu0 %823 }
 0x200   :  { %v4276_v59 = vmul.f32 -1.442695, %v5642_v44  ;;  %vm825_vm12 = vcmp.eq.s32.totalorder %v824_v46, 1 }
 0x201   :  { %v4277_v5 = vmul.f32 -1.442695, %v5643_v48  ;;  %v4278_v11 = vmul.f32 -1.442695, %v5667_v6 }
 0x202   :  { %5748 = vpow2.f32 %v4276_v59 }
 0x203   :  { %5750 = vpow2.f32 %v4277_v5 }
 0x204   :  { %5752 = vpow2.f32 %v4278_v11 }
 0x205   :  { %5754 = vtanh.f32 %v5666_v45 }
 0x20c   :  { %v5749_v23 = vpop.eup %5748 }
 0x20d   :  { %v5751_v60 = vpop.eup %5750  ;;  %v800_v56 = vadd.f32 1.0, %v5749_v23 }
 0x20e   :  { %v806_v7 = vadd.f32 1.0, %v5751_v60  ;;  %v5753_v3 = vpop.eup %5752 }
 0x20f   :  { %5756 = vrcp.f32 %v800_v56  ;;  %v5755_v36 = vpop.eup %5754  ;;  %v813_v48 = vadd.f32 1.0, %v5753_v3 }
 0x210   :  { %5758 = vrcp.f32 %v806_v7 }
 0x211   :  { %5760 = vrcp.f32 %v813_v48 }
 0x219   :  { %v5757_v37 = vpop.eup %5756 }
 0x21a   :  { %v5759_v44 = vpop.eup %5758  ;;  %v817_v29 = vmul.f32 %v5757_v37, %v5755_v36 }
 0x21b   :  { %v816_v59 = vmul.f32 %v5759_v44, %v6600_v61  ;;  %v5761_v6 = vpop.eup %5760 }
 0x21d   :  { %v818_v5 = vadd.f32 %v817_v29, %v816_v59 }
 0x21f   :  { %5762 = vtanh.f32 %v818_v5  ;;  %v6654_v43 = vsel %vm825_vm12, %v818_v5, %v6600_v61 }
 0x229   :  { %v5763_v11 = vpop.eup %5762 }
 0x22a   :  { %v820_v45 = vmul.f32 %v5763_v11, %v5761_v6 }
 0x22c   :  { %v6657_v23 = vsel %vm825_vm12, %v820_v45, %v6602_v12  ;;  %vm4123_vm12 = vcmask 1044480  }
 0x22d   :  { %897 = vmatmul.mubr.f32.vlgmr.msra.gmra.mrb[4].mxu0 %v6657_v23  ;;  %968 = vmatmul.mubr.f32.vlgmr.msra.gmra.mrb[8].mxu1 %v6657_v23 }
 0x22e   :  { %4581 = vmatpush1.bf16.msra.mxu0 %v6166_v13  ;;  %4613 = vmatpush1.bf16.msra.mxu1 %v6233_v33 }
 0x22f   :  { %4583 = vmatprep.subr.bf16.mxu0 %v6183_v18  ;;  %4615 = vmatprep.subr.bf16.mxu1 %v6261_v42 }
 0x230   :  { %1073 = vmatprep.mubr.f32.mxu0 %v6048_v8  ;;  %1144 = vmatprep.mubr.f32.mxu1 %v6048_v8 }
 0x232   :  { %4585 = vmatpush1.bf16.msra.mxu0 %v6192_v21  ;;  %4617 = vmatpush1.bf16.msra.mxu1 %v6280_v47 }
 0x233   :  { %4587 = vmatprep.subr.bf16.mxu0 %v6205_v25  ;;  %4619 = vmatprep.subr.bf16.mxu1 %v6302_v54 }
 0x236   :  { %4589 = vmatpush1.bf16.msra.mxu0 %v6240_v35  ;;  %4621 = vmatpush1.bf16.msra.mxu1 %v6334_v63 }
 0x237   :  { %4591 = vmatprep.subr.bf16.mxu0 %v6253_v39  ;;  %4623 = vmatprep.subr.bf16.mxu1 %v6346_v4 }
 0x23a   :  { %4593 = vmatpush1.bf16.msra.mxu0 %v6290_v50  ;;  %4625 = vmatpush1.bf16.msra.mxu1 %v6377_v16 }
 0x23b   :  { %4595 = vmatprep.subr.bf16.mxu0 %v6300_v53  ;;  %4627 = vmatprep.subr.bf16.mxu1 %v6392_v24 }
 0x23e   :  { %4597 = vmatpush1.bf16.msra.mxu0 %v6332_v62  ;;  %4629 = vmatpush1.bf16.msra.mxu1 %v6426_v38 }
 0x23f   :  { %4599 = vmatprep.subr.bf16.mxu0 %v6344_v2  ;;  %4631 = vmatprep.subr.bf16.mxu1 %v6432_v41 }
 0x242   :  { %4601 = vmatpush1.bf16.msra.mxu0 %v6375_v15  ;;  %4633 = vmatpush1.bf16.msra.mxu1 %v6462_v52 }
 0x243   :  { %4603 = vmatprep.subr.bf16.mxu0 %v6387_v22  ;;  %4635 = vmatprep.subr.bf16.mxu1 %v6467_v55 }
 0x246   :  { %4605 = vmatpush1.bf16.msra.mxu0 %v6418_v34  ;;  %4637 = vmatpush1.bf16.msra.mxu1 %v6488_v0 }
 0x247   :  { %4607 = vmatprep.subr.bf16.mxu0 %v6429_v40  ;;  %4639 = vmatprep.subr.bf16.mxu1 %v6492_v1 }
 0x24a   :  { %4609 = vmatpush1.bf16.msra.mxu0 %v6459_v51  ;;  %4641 = vmatpush1.bf16.msra.mxu1 %v6506_v10 }
 0x24b   :  { %4643 = vmatprep.subr.bf16.mxu0 %v6149_v9  ;;  %4675 = vmatprep.subr.bf16.mxu1 %v6207_v26 }
 0x300   :  { %v898_v61 = vpop.f32.mrb[4].mxu0  ;;  %v969_v12 = vpop.f32.mrb[8].mxu1 }
 0x301   :  { %v5644_v60 = vadd.f32 %v898_v61, %v6580_v31  ;;  %v900_v56 = vpop.f32.mrb[5].mxu0  ;;  %v971_v7 = vpop.f32.mrb[9].mxu1  ;;  %v5668_v48 = vadd.f32 %v969_v12, %v6592_v57 }
 0x302   :  { %v5645_v3 = vadd.f32 %v900_v56, %v6584_v32  ;;  %v5669_v44 = vadd.f32 %v971_v7, %v6596_v58 }
 0x303   :  { %v4279_v36 = vmul.f32 -1.442695, %v5644_v60 }
 0x304   :  { %v4280_v37 = vmul.f32 -1.442695, %v5645_v3  ;;  %v4281_v29 = vmul.f32 -1.442695, %v5669_v44 }
 0x305   :  { %5764 = vpow2.f32 %v4279_v36  ;;  %v1001_v36 = vpop.permute.xlu1 %1000 }
 0x306   :  { %5766 = vpow2.f32 %v4280_v37  ;;  %vm1002_vm13 = vcmp.eq.s32.totalorder %v1001_v36, 1 }
 0x307   :  { %5768 = vpow2.f32 %v4281_v29 }
 0x308   :  { %5770 = vtanh.f32 %v5668_v48 }
 0x30f   :  { %v5765_v59 = vpop.eup %5764 }
 0x310   :  { %v5767_v46 = vpop.eup %5766  ;;  %v977_v5 = vadd.f32 1.0, %v5765_v59 }
 0x311   :  { %v983_v6 = vadd.f32 1.0, %v5767_v46  ;;  %v5769_v11 = vpop.eup %5768 }
 0x312   :  { %5772 = vrcp.f32 %v977_v5  ;;  %v5771_v45 = vpop.eup %5770  ;;  %v990_v56 = vadd.f32 1.0, %v5769_v11 }
 0x313   :  { %5774 = vrcp.f32 %v983_v6 }
 0x314   :  { %5776 = vrcp.f32 %v990_v56 }
 0x31c   :  { %v5773_v61 = vpop.eup %5772 }
 0x31d   :  { %v5775_v60 = vpop.eup %5774  ;;  %v994_v3 = vmul.f32 %v5773_v61, %v5771_v45 }
 0x31e   :  { %v993_v7 = vmul.f32 %v5775_v60, %v6654_v43  ;;  %v5777_v44 = vpop.eup %5776 }
 0x320   :  { %v995_v37 = vadd.f32 %v994_v3, %v993_v7 }
 0x322   :  { %5778 = vtanh.f32 %v995_v37  ;;  %v6701_v12 = vsel %vm1002_vm13, %v995_v37, %v6654_v43 }
 0x32c   :  { %v5779_v29 = vpop.eup %5778 }
 0x32d   :  { %v997_v48 = vmul.f32 %v5779_v29, %v5777_v44 }
 0x32f   :  { %v6704_v59 = vsel %vm1002_vm13, %v997_v48, %v6657_v23  ;;  %vm4125_vm13 = vcmask 1045504  }
 0x330   :  { %1074 = vmatmul.mubr.f32.vlgmr.msra.gmra.mrb[6].mxu0 %v6704_v59  ;;  %1145 = vmatmul.mubr.f32.vlgmr.msra.gmra.mrb[10].mxu1 %v6704_v59 }
 0x331   :  { %4645 = vmatpush1.bf16.msra.mxu0 %v6166_v13  ;;  %4677 = vmatpush1.bf16.msra.mxu1 %v6233_v33 }
 0x332   :  { %4647 = vmatprep.subr.bf16.mxu0 %v6183_v18  ;;  %4679 = vmatprep.subr.bf16.mxu1 %v6261_v42 }
 0x333   :  { %1250 = vmatprep.mubr.f32.mxu0 %v6048_v8  ;;  %1321 = vmatprep.mubr.f32.mxu1 %v6048_v8 }
 0x335   :  { %4649 = vmatpush1.bf16.msra.mxu0 %v6192_v21  ;;  %4681 = vmatpush1.bf16.msra.mxu1 %v6280_v47 }
 0x336   :  { %4651 = vmatprep.subr.bf16.mxu0 %v6205_v25  ;;  %4683 = vmatprep.subr.bf16.mxu1 %v6302_v54 }
 0x339   :  { %4653 = vmatpush1.bf16.msra.mxu0 %v6240_v35  ;;  %4685 = vmatpush1.bf16.msra.mxu1 %v6334_v63 }
 0x33a   :  { %4655 = vmatprep.subr.bf16.mxu0 %v6253_v39  ;;  %4687 = vmatprep.subr.bf16.mxu1 %v6346_v4 }
 0x33d   :  { %4657 = vmatpush1.bf16.msra.mxu0 %v6290_v50  ;;  %4689 = vmatpush1.bf16.msra.mxu1 %v6377_v16 }
 0x33e   :  { %4659 = vmatprep.subr.bf16.mxu0 %v6300_v53  ;;  %4691 = vmatprep.subr.bf16.mxu1 %v6392_v24 }
 0x341   :  { %4661 = vmatpush1.bf16.msra.mxu0 %v6332_v62  ;;  %4693 = vmatpush1.bf16.msra.mxu1 %v6426_v38 }
 0x342   :  { %4663 = vmatprep.subr.bf16.mxu0 %v6344_v2  ;;  %4695 = vmatprep.subr.bf16.mxu1 %v6432_v41 }
 0x345   :  { %4665 = vmatpush1.bf16.msra.mxu0 %v6375_v15  ;;  %4697 = vmatpush1.bf16.msra.mxu1 %v6462_v52 }
 0x346   :  { %4667 = vmatprep.subr.bf16.mxu0 %v6387_v22  ;;  %4699 = vmatprep.subr.bf16.mxu1 %v6467_v55 }
 0x349   :  { %4669 = vmatpush1.bf16.msra.mxu0 %v6418_v34  ;;  %4701 = vmatpush1.bf16.msra.mxu1 %v6488_v0 }
 0x34a   :  { %4671 = vmatprep.subr.bf16.mxu0 %v6429_v40  ;;  %4703 = vmatprep.subr.bf16.mxu1 %v6492_v1 }
 0x34d   :  { %4673 = vmatpush1.bf16.msra.mxu0 %v6459_v51  ;;  %4705 = vmatpush1.bf16.msra.mxu1 %v6506_v10 }
 0x34e   :  { %4707 = vmatprep.subr.bf16.mxu0 %v6149_v9  ;;  %4739 = vmatprep.subr.bf16.mxu1 %v6207_v26 }
 0x403   :  { %v1075_v43 = vpop.f32.mrb[6].mxu0  ;;  %v1146_v23 = vpop.f32.mrb[10].mxu1 }
 0x404   :  { %v5646_v46 = vadd.f32 %v1075_v43, %v6580_v31  ;;  %v1077_v5 = vpop.f32.mrb[7].mxu0  ;;  %v1148_v6 = vpop.f32.mrb[11].mxu1  ;;  %v5670_v3 = vadd.f32 %v1146_v23, %v6592_v57 }
 0x405   :  { %v5647_v11 = vadd.f32 %v1077_v5, %v6584_v32  ;;  %v5671_v60 = vadd.f32 %v1148_v6, %v6596_v58  ;;  %v1178_v6 = vpop.permute.xlu1 %1177 }
 0x406   :  { %v4282_v45 = vmul.f32 -1.442695, %v5646_v46  ;;  %vm1179_vm14 = vcmp.eq.s32.totalorder %v1178_v6, 1 }
 0x407   :  { %v4283_v61 = vmul.f32 -1.442695, %v5647_v11  ;;  %v4284_v56 = vmul.f32 -1.442695, %v5671_v60 }
 0x408   :  { %5780 = vpow2.f32 %v4282_v45 }
 0x409   :  { %5782 = vpow2.f32 %v4283_v61 }
 0x40a   :  { %5784 = vpow2.f32 %v4284_v56 }
 0x40b   :  { %5786 = vtanh.f32 %v5670_v3 }
 0x412   :  { %v5781_v36 = vpop.eup %5780 }
 0x413   :  { %v5783_v7 = vpop.eup %5782  ;;  %v1154_v37 = vadd.f32 1.0, %v5781_v36 }
 0x414   :  { %v1160_v44 = vadd.f32 1.0, %v5783_v7  ;;  %v5785_v29 = vpop.eup %5784 }
 0x415   :  { %5788 = vrcp.f32 %v1154_v37  ;;  %v5787_v48 = vpop.eup %5786  ;;  %v1167_v11 = vadd.f32 1.0, %v5785_v29 }
 0x416   :  { %5790 = vrcp.f32 %v1160_v44 }
 0x417   :  { %5792 = vrcp.f32 %v1167_v11 }
 0x41f   :  { %v5789_v43 = vpop.eup %5788 }
 0x420   :  { %v5791_v46 = vpop.eup %5790  ;;  %v1171_v5 = vmul.f32 %v5789_v43, %v5787_v48 }
 0x421   :  { %v1170_v45 = vmul.f32 %v5791_v46, %v6701_v12  ;;  %v5793_v60 = vpop.eup %5792 }
 0x423   :  { %v1172_v61 = vadd.f32 %v1171_v5, %v1170_v45 }
 0x425   :  { %5794 = vtanh.f32 %v1172_v61  ;;  %v6748_v23 = vsel %vm1179_vm14, %v1172_v61, %v6701_v12 }
 0x42f   :  { %v5795_v56 = vpop.eup %5794 }
 0x430   :  { %v1174_v3 = vmul.f32 %v5795_v56, %v5793_v60 }
 0x432   :  { %v6751_v36 = vsel %vm1179_vm14, %v1174_v3, %v6704_v59  ;;  %vm6052_vm14 = vmmov 0  }
 0x433   :  { %1251 = vmatmul.mubr.f32.vlgmr.msra.gmra.mrb[8].mxu0 %v6751_v36  ;;  %1322 = vmatmul.mubr.f32.vlgmr.msra.gmra.mrb[12].mxu1 %v6751_v36 }
 0x434   :  { %4709 = vmatpush1.bf16.msra.mxu0 %v6166_v13  ;;  %4741 = vmatpush1.bf16.msra.mxu1 %v6233_v33 }
 0x435   :  { %4711 = vmatprep.subr.bf16.mxu0 %v6183_v18  ;;  %4743 = vmatprep.subr.bf16.mxu1 %v6261_v42 }
 0x436   :  { %1427 = vmatprep.mubr.f32.mxu0 %v6048_v8  ;;  %1498 = vmatprep.mubr.f32.mxu1 %v6048_v8 }
 0x438   :  { %4713 = vmatpush1.bf16.msra.mxu0 %v6192_v21  ;;  %4745 = vmatpush1.bf16.msra.mxu1 %v6280_v47 }
 0x439   :  { %4715 = vmatprep.subr.bf16.mxu0 %v6205_v25  ;;  %4747 = vmatprep.subr.bf16.mxu1 %v6302_v54 }
 0x43c   :  { %4717 = vmatpush1.bf16.msra.mxu0 %v6240_v35  ;;  %4749 = vmatpush1.bf16.msra.mxu1 %v6334_v63 }
 0x43d   :  { %4719 = vmatprep.subr.bf16.mxu0 %v6253_v39  ;;  %4751 = vmatprep.subr.bf16.mxu1 %v6346_v4 }
 0x440   :  { %4721 = vmatpush1.bf16.msra.mxu0 %v6290_v50  ;;  %4753 = vmatpush1.bf16.msra.mxu1 %v6377_v16 }
 0x441   :  { %4723 = vmatprep.subr.bf16.mxu0 %v6300_v53  ;;  %4755 = vmatprep.subr.bf16.mxu1 %v6392_v24 }
 0x444   :  { %4725 = vmatpush1.bf16.msra.mxu0 %v6332_v62  ;;  %4757 = vmatpush1.bf16.msra.mxu1 %v6426_v38 }
 0x445   :  { %4727 = vmatprep.subr.bf16.mxu0 %v6344_v2  ;;  %4759 = vmatprep.subr.bf16.mxu1 %v6432_v41 }
 0x448   :  { %4729 = vmatpush1.bf16.msra.mxu0 %v6375_v15  ;;  %4761 = vmatpush1.bf16.msra.mxu1 %v6462_v52 }
 0x449   :  { %4731 = vmatprep.subr.bf16.mxu0 %v6387_v22  ;;  %4763 = vmatprep.subr.bf16.mxu1 %v6467_v55 }
 0x44c   :  { %4733 = vmatpush1.bf16.msra.mxu0 %v6418_v34  ;;  %4765 = vmatpush1.bf16.msra.mxu1 %v6488_v0 }
 0x44d   :  { %4735 = vmatprep.subr.bf16.mxu0 %v6429_v40  ;;  %4767 = vmatprep.subr.bf16.mxu1 %v6492_v1 }
 0x450   :  { %4737 = vmatpush1.bf16.msra.mxu0 %v6459_v51  ;;  %4769 = vmatpush1.bf16.msra.mxu1 %v6506_v10 }
 0x451   :  { %4771 = vmatprep.subr.bf16.mxu0 %v6149_v9  ;;  %4803 = vmatprep.subr.bf16.mxu1 %v6207_v26 }
 0x506   :  { %v1252_v12 = vpop.f32.mrb[8].mxu0  ;;  %v1323_v59 = vpop.f32.mrb[12].mxu1 }
 0x507   :  { %v5648_v7 = vadd.f32 %v1252_v12, %v6580_v31  ;;  %v1254_v37 = vpop.f32.mrb[9].mxu0  ;;  %v1325_v44 = vpop.f32.mrb[13].mxu1  ;;  %v5672_v11 = vadd.f32 %v1323_v59, %v6592_v57 }
 0x508   :  { %v5649_v29 = vadd.f32 %v1254_v37, %v6584_v32  ;;  %v5673_v46 = vadd.f32 %v1325_v44, %v6596_v58  ;;  %v1355_v44 = vpop.permute.xlu0 %1354 }
 0x509   :  { %v4285_v48 = vmul.f32 -1.442695, %v5648_v7  ;;  %vm1356_vm15 = vcmp.eq.s32.totalorder %v1355_v44, 1 }
 0x50a   :  { %v4286_v43 = vmul.f32 -1.442695, %v5649_v29  ;;  %v4287_v5 = vmul.f32 -1.442695, %v5673_v46 }
 0x50b   :  { %5796 = vpow2.f32 %v4285_v48 }
 0x50c   :  { %5798 = vpow2.f32 %v4286_v43 }
 0x50d   :  { %5800 = vpow2.f32 %v4287_v5 }
 0x50e   :  { %5802 = vtanh.f32 %v5672_v11 }
 0x515   :  { %v5797_v45 = vpop.eup %5796 }
 0x516   :  { %v5799_v6 = vpop.eup %5798  ;;  %v1331_v61 = vadd.f32 1.0, %v5797_v45 }
 0x517   :  { %v1337_v60 = vadd.f32 1.0, %v5799_v6  ;;  %v5801_v56 = vpop.eup %5800 }
 0x518   :  { %5804 = vrcp.f32 %v1331_v61  ;;  %v5803_v3 = vpop.eup %5802  ;;  %v1344_v29 = vadd.f32 1.0, %v5801_v56 }
 0x519   :  { %5806 = vrcp.f32 %v1337_v60 }
 0x51a   :  { %5808 = vrcp.f32 %v1344_v29 }
 0x522   :  { %v5805_v12 = vpop.eup %5804 }
 0x523   :  { %v5807_v7 = vpop.eup %5806  ;;  %v1348_v37 = vmul.f32 %v5805_v12, %v5803_v3 }
 0x524   :  { %v1347_v48 = vmul.f32 %v5807_v7, %v6748_v23  ;;  %v5809_v46 = vpop.eup %5808 }
 0x526   :  { %v1349_v43 = vadd.f32 %v1348_v37, %v1347_v48 }
 0x528   :  { %5810 = vtanh.f32 %v1349_v43  ;;  %v6795_v59 = vsel %vm1356_vm15, %v1349_v43, %v6748_v23 }
 0x532   :  { %v5811_v5 = vpop.eup %5810 }
 0x533   :  { %v1351_v11 = vmul.f32 %v5811_v5, %v5809_v46 }
 0x535   :  { %v6798_v45 = vsel %vm1356_vm15, %v1351_v11, %v6751_v36  ;;  %vm4127_vm15 = vcmask 1046528  }
 0x536   :  { %1428 = vmatmul.mubr.f32.vlgmr.msra.gmra.mrb[10].mxu0 %v6798_v45  ;;  %1499 = vmatmul.mubr.f32.vlgmr.msra.gmra.mrb[14].mxu1 %v6798_v45 }
 0x537   :  { %4773 = vmatpush1.bf16.msra.mxu0 %v6166_v13  ;;  %4805 = vmatpush1.bf16.msra.mxu1 %v6233_v33 }
 0x538   :  { %4775 = vmatprep.subr.bf16.mxu0 %v6183_v18  ;;  %4807 = vmatprep.subr.bf16.mxu1 %v6261_v42 }
 0x539   :  { %1604 = vmatprep.mubr.f32.mxu0 %v6048_v8  ;;  %1675 = vmatprep.mubr.f32.mxu1 %v6048_v8 }
 0x53b   :  { %4777 = vmatpush1.bf16.msra.mxu0 %v6192_v21  ;;  %4809 = vmatpush1.bf16.msra.mxu1 %v6280_v47 }
 0x53c   :  { %4779 = vmatprep.subr.bf16.mxu0 %v6205_v25  ;;  %4811 = vmatprep.subr.bf16.mxu1 %v6302_v54 }
 0x53f   :  { %4781 = vmatpush1.bf16.msra.mxu0 %v6240_v35  ;;  %4813 = vmatpush1.bf16.msra.mxu1 %v6334_v63 }
 0x540   :  { %4783 = vmatprep.subr.bf16.mxu0 %v6253_v39  ;;  %4815 = vmatprep.subr.bf16.mxu1 %v6346_v4 }
 0x543   :  { %4785 = vmatpush1.bf16.msra.mxu0 %v6290_v50  ;;  %4817 = vmatpush1.bf16.msra.mxu1 %v6377_v16 }
 0x544   :  { %4787 = vmatprep.subr.bf16.mxu0 %v6300_v53  ;;  %4819 = vmatprep.subr.bf16.mxu1 %v6392_v24 }
 0x547   :  { %4789 = vmatpush1.bf16.msra.mxu0 %v6332_v62  ;;  %4821 = vmatpush1.bf16.msra.mxu1 %v6426_v38 }
 0x548   :  { %4791 = vmatprep.subr.bf16.mxu0 %v6344_v2  ;;  %4823 = vmatprep.subr.bf16.mxu1 %v6432_v41 }
 0x54b   :  { %4793 = vmatpush1.bf16.msra.mxu0 %v6375_v15  ;;  %4825 = vmatpush1.bf16.msra.mxu1 %v6462_v52 }
 0x54c   :  { %4795 = vmatprep.subr.bf16.mxu0 %v6387_v22  ;;  %4827 = vmatprep.subr.bf16.mxu1 %v6467_v55 }
 0x54f   :  { %4797 = vmatpush1.bf16.msra.mxu0 %v6418_v34  ;;  %4829 = vmatpush1.bf16.msra.mxu1 %v6488_v0 }
 0x550   :  { %4799 = vmatprep.subr.bf16.mxu0 %v6429_v40  ;;  %4831 = vmatprep.subr.bf16.mxu1 %v6492_v1 }
 0x553   :  { %4801 = vmatpush1.bf16.msra.mxu0 %v6459_v51  ;;  %4833 = vmatpush1.bf16.msra.mxu1 %v6506_v10 }
 0x554   :  { %4835 = vmatprep.subr.bf16.mxu0 %v6149_v9  ;;  %4867 = vmatprep.subr.bf16.mxu1 %v6207_v26 }
 0x609   :  { %v1429_v23 = vpop.f32.mrb[10].mxu0  ;;  %v1500_v36 = vpop.f32.mrb[14].mxu1 }
 0x60a   :  { %v5650_v6 = vadd.f32 %v1429_v23, %v6580_v31  ;;  %v1431_v61 = vpop.f32.mrb[11].mxu0  ;;  %v1502_v60 = vpop.f32.mrb[15].mxu1  ;;  %v5674_v29 = vadd.f32 %v1500_v36, %v6592_v57 }
 0x60b   :  { %v5651_v56 = vadd.f32 %v1431_v61, %v6584_v32  ;;  %v5675_v7 = vadd.f32 %v1502_v60, %v6596_v58  ;;  %v1532_v60 = vpop.permute.xlu1 %1531 }
 0x60c   :  { %v4288_v3 = vmul.f32 -1.442695, %v5650_v6  ;;  %vm1533_vm0 = vcmp.eq.s32.totalorder %v1532_v60, 1 }
 0x60d   :  { %v4289_v12 = vmul.f32 -1.442695, %v5651_v56  ;;  %v4290_v37 = vmul.f32 -1.442695, %v5675_v7 }
 0x60e   :  { %5812 = vpow2.f32 %v4288_v3 }
 0x60f   :  { %5814 = vpow2.f32 %v4289_v12 }
 0x610   :  { %5816 = vpow2.f32 %v4290_v37 }
 0x611   :  { %5818 = vtanh.f32 %v5674_v29 }
 0x618   :  { %v5813_v48 = vpop.eup %5812 }
 0x619   :  { %v5815_v44 = vpop.eup %5814  ;;  %v1508_v43 = vadd.f32 1.0, %v5813_v48 }
 0x61a   :  { %v1514_v46 = vadd.f32 1.0, %v5815_v44  ;;  %v5817_v5 = vpop.eup %5816 }
 0x61b   :  { %5820 = vrcp.f32 %v1508_v43  ;;  %v5819_v11 = vpop.eup %5818  ;;  %v1521_v56 = vadd.f32 1.0, %v5817_v5 }
 0x61c   :  { %5822 = vrcp.f32 %v1514_v46 }
 0x61d   :  { %5824 = vrcp.f32 %v1521_v56 }
 0x625   :  { %v5821_v23 = vpop.eup %5820 }
 0x626   :  { %v5823_v6 = vpop.eup %5822  ;;  %v1525_v61 = vmul.f32 %v5821_v23, %v5819_v11 }
 0x627   :  { %v1524_v3 = vmul.f32 %v5823_v6, %v6795_v59  ;;  %v5825_v7 = vpop.eup %5824 }
 0x629   :  { %v1526_v12 = vadd.f32 %v1525_v61, %v1524_v3 }
 0x62b   :  { %5826 = vtanh.f32 %v1526_v12  ;;  %v6842_v36 = vsel %vm1533_vm0, %v1526_v12, %v6795_v59 }
 0x635   :  { %v5827_v37 = vpop.eup %5826 }
 0x636   :  { %v1528_v29 = vmul.f32 %v5827_v37, %v5825_v7 }
 0x638   :  { %v6845_v48 = vsel %vm1533_vm0, %v1528_v29, %v6798_v45 }
 0x639   :  { %1605 = vmatmul.mubr.f32.vlgmr.msra.gmra.mrb[12].mxu0 %v6845_v48  ;;  %1676 = vmatmul.mubr.f32.vlgmr.msra.gmra.mrb[16].mxu1 %v6845_v48 }
 0x63a   :  { %4837 = vmatpush1.bf16.msra.mxu0 %v6166_v13  ;;  %4869 = vmatpush1.bf16.msra.mxu1 %v6233_v33 }
 0x63b   :  { %4839 = vmatprep.subr.bf16.mxu0 %v6183_v18  ;;  %4871 = vmatprep.subr.bf16.mxu1 %v6261_v42 }
 0x63c   :  { %1781 = vmatprep.mubr.f32.mxu0 %v6048_v8  ;;  %1852 = vmatprep.mubr.f32.mxu1 %v6048_v8 }
 0x63e   :  { %4841 = vmatpush1.bf16.msra.mxu0 %v6192_v21  ;;  %4873 = vmatpush1.bf16.msra.mxu1 %v6280_v47 }
 0x63f   :  { %4843 = vmatprep.subr.bf16.mxu0 %v6205_v25  ;;  %4875 = vmatprep.subr.bf16.mxu1 %v6302_v54 }
 0x642   :  { %4845 = vmatpush1.bf16.msra.mxu0 %v6240_v35  ;;  %4877 = vmatpush1.bf16.msra.mxu1 %v6334_v63 }
 0x643   :  { %4847 = vmatprep.subr.bf16.mxu0 %v6253_v39  ;;  %4879 = vmatprep.subr.bf16.mxu1 %v6346_v4 }
 0x646   :  { %4849 = vmatpush1.bf16.msra.mxu0 %v6290_v50  ;;  %4881 = vmatpush1.bf16.msra.mxu1 %v6377_v16 }
 0x647   :  { %4851 = vmatprep.subr.bf16.mxu0 %v6300_v53  ;;  %4883 = vmatprep.subr.bf16.mxu1 %v6392_v24 }
 0x64a   :  { %4853 = vmatpush1.bf16.msra.mxu0 %v6332_v62  ;;  %4885 = vmatpush1.bf16.msra.mxu1 %v6426_v38 }
 0x64b   :  { %4855 = vmatprep.subr.bf16.mxu0 %v6344_v2  ;;  %4887 = vmatprep.subr.bf16.mxu1 %v6432_v41 }
 0x64e   :  { %4857 = vmatpush1.bf16.msra.mxu0 %v6375_v15  ;;  %4889 = vmatpush1.bf16.msra.mxu1 %v6462_v52 }
 0x64f   :  { %4859 = vmatprep.subr.bf16.mxu0 %v6387_v22  ;;  %4891 = vmatprep.subr.bf16.mxu1 %v6467_v55 }
 0x652   :  { %4861 = vmatpush1.bf16.msra.mxu0 %v6418_v34  ;;  %4893 = vmatpush1.bf16.msra.mxu1 %v6488_v0 }
 0x653   :  { %4863 = vmatprep.subr.bf16.mxu0 %v6429_v40  ;;  %4895 = vmatprep.subr.bf16.mxu1 %v6492_v1 }
 0x656   :  { %4865 = vmatpush1.bf16.msra.mxu0 %v6459_v51  ;;  %4897 = vmatpush1.bf16.msra.mxu1 %v6506_v10 }
 0x657   :  { %4899 = vmatprep.subr.bf16.mxu0 %v6149_v9  ;;  %4931 = vmatprep.subr.bf16.mxu1 %v6207_v26 }
 0x70c   :  { %v1606_v59 = vpop.f32.mrb[12].mxu0  ;;  %v1677_v45 = vpop.f32.mrb[16].mxu1 }
 0x70d   :  { %v5652_v44 = vadd.f32 %v1606_v59, %v6580_v31  ;;  %v1608_v43 = vpop.f32.mrb[13].mxu0  ;;  %v1679_v46 = vpop.f32.mrb[17].mxu1  ;;  %v5676_v56 = vadd.f32 %v1677_v45, %v6592_v57 }
 0x70e   :  { %v5653_v5 = vadd.f32 %v1608_v43, %v6584_v32  ;;  %v5677_v6 = vadd.f32 %v1679_v46, %v6596_v58  ;;  %v1709_v46 = vpop.permute.xlu0 %1708 }
 0x70f   :  { %v4291_v11 = vmul.f32 -1.442695, %v5652_v44  ;;  %vm1710_vm1 = vcmp.eq.s32.totalorder %v1709_v46, 1 }
 0x710   :  { %v4292_v23 = vmul.f32 -1.442695, %v5653_v5  ;;  %v4293_v61 = vmul.f32 -1.442695, %v5677_v6 }
 0x711   :  { %5828 = vpow2.f32 %v4291_v11 }
 0x712   :  { %5830 = vpow2.f32 %v4292_v23 }
 0x713   :  { %5832 = vpow2.f32 %v4293_v61 }
 0x714   :  { %5834 = vtanh.f32 %v5676_v56 }
 0x71b   :  { %v5829_v3 = vpop.eup %5828 }
 0x71c   :  { %v5831_v60 = vpop.eup %5830  ;;  %v1685_v12 = vadd.f32 1.0, %v5829_v3 }
 0x71d   :  { %v1691_v7 = vadd.f32 1.0, %v5831_v60  ;;  %v5833_v37 = vpop.eup %5832 }
 0x71e   :  { %5836 = vrcp.f32 %v1685_v12  ;;  %v5835_v29 = vpop.eup %5834  ;;  %v1698_v5 = vadd.f32 1.0, %v5833_v37 }
 0x71f   :  { %5838 = vrcp.f32 %v1691_v7 }
 0x720   :  { %5840 = vrcp.f32 %v1698_v5 }
 0x728   :  { %v5837_v59 = vpop.eup %5836 }
 0x729   :  { %v5839_v44 = vpop.eup %5838  ;;  %v1702_v43 = vmul.f32 %v5837_v59, %v5835_v29 }
 0x72a   :  { %v1701_v11 = vmul.f32 %v5839_v44, %v6842_v36  ;;  %v5841_v6 = vpop.eup %5840 }
 0x72c   :  { %v1703_v23 = vadd.f32 %v1702_v43, %v1701_v11 }
 0x72e   :  { %5842 = vtanh.f32 %v1703_v23  ;;  %v6889_v45 = vsel %vm1710_vm1, %v1703_v23, %v6842_v36 }
 0x738   :  { %v5843_v61 = vpop.eup %5842 }
 0x739   :  { %v1705_v56 = vmul.f32 %v5843_v61, %v5841_v6 }
 0x73b   :  { %v6892_v3 = vsel %vm1710_vm1, %v1705_v56, %v6845_v48 }
 0x73c   :  { %1782 = vmatmul.mubr.f32.vlgmr.msra.gmra.mrb[14].mxu0 %v6892_v3  ;;  %1853 = vmatmul.mubr.f32.vlgmr.msra.gmra.mrb[18].mxu1 %v6892_v3 }
 0x73d   :  { %4901 = vmatpush1.bf16.msra.mxu0 %v6166_v13  ;;  %4933 = vmatpush1.bf16.msra.mxu1 %v6233_v33 }
 0x73e   :  { %4903 = vmatprep.subr.bf16.mxu0 %v6183_v18  ;;  %4935 = vmatprep.subr.bf16.mxu1 %v6261_v42 }
 0x73f   :  { %1958 = vmatprep.mubr.f32.mxu0 %v6048_v8  ;;  %2029 = vmatprep.mubr.f32.mxu1 %v6048_v8 }
 0x741   :  { %4905 = vmatpush1.bf16.msra.mxu0 %v6192_v21  ;;  %4937 = vmatpush1.bf16.msra.mxu1 %v6280_v47 }
 0x742   :  { %4907 = vmatprep.subr.bf16.mxu0 %v6205_v25  ;;  %4939 = vmatprep.subr.bf16.mxu1 %v6302_v54 }
 0x745   :  { %4909 = vmatpush1.bf16.msra.mxu0 %v6240_v35  ;;  %4941 = vmatpush1.bf16.msra.mxu1 %v6334_v63 }
 0x746   :  { %4911 = vmatprep.subr.bf16.mxu0 %v6253_v39  ;;  %4943 = vmatprep.subr.bf16.mxu1 %v6346_v4 }
 0x749   :  { %4913 = vmatpush1.bf16.msra.mxu0 %v6290_v50  ;;  %4945 = vmatpush1.bf16.msra.mxu1 %v6377_v16 }
 0x74a   :  { %4915 = vmatprep.subr.bf16.mxu0 %v6300_v53  ;;  %4947 = vmatprep.subr.bf16.mxu1 %v6392_v24 }
 0x74d   :  { %4917 = vmatpush1.bf16.msra.mxu0 %v6332_v62  ;;  %4949 = vmatpush1.bf16.msra.mxu1 %v6426_v38 }
 0x74e   :  { %4919 = vmatprep.subr.bf16.mxu0 %v6344_v2  ;;  %4951 = vmatprep.subr.bf16.mxu1 %v6432_v41 }
 0x751   :  { %4921 = vmatpush1.bf16.msra.mxu0 %v6375_v15  ;;  %4953 = vmatpush1.bf16.msra.mxu1 %v6462_v52 }
 0x752   :  { %4923 = vmatprep.subr.bf16.mxu0 %v6387_v22  ;;  %4955 = vmatprep.subr.bf16.mxu1 %v6467_v55 }
 0x755   :  { %4925 = vmatpush1.bf16.msra.mxu0 %v6418_v34  ;;  %4957 = vmatpush1.bf16.msra.mxu1 %v6488_v0 }
 0x756   :  { %4927 = vmatprep.subr.bf16.mxu0 %v6429_v40  ;;  %4959 = vmatprep.subr.bf16.mxu1 %v6492_v1 }
 0x759   :  { %4929 = vmatpush1.bf16.msra.mxu0 %v6459_v51  ;;  %4961 = vmatpush1.bf16.msra.mxu1 %v6506_v10 }
 0x75a   :  { %4963 = vmatprep.subr.bf16.mxu0 %v6149_v9  ;;  %4995 = vmatprep.subr.bf16.mxu1 %v6207_v26 }
 0x80f   :  { %v1783_v36 = vpop.f32.mrb[14].mxu0  ;;  %v1854_v48 = vpop.f32.mrb[18].mxu1 }
 0x810   :  { %v5654_v60 = vadd.f32 %v1783_v36, %v6580_v31  ;;  %v1785_v12 = vpop.f32.mrb[15].mxu0  ;;  %v1856_v7 = vpop.f32.mrb[19].mxu1  ;;  %v5678_v5 = vadd.f32 %v1854_v48, %v6592_v57 }
 0x811   :  { %v5655_v37 = vadd.f32 %v1785_v12, %v6584_v32  ;;  %v5679_v44 = vadd.f32 %v1856_v7, %v6596_v58  ;;  %v1886_v7 = vpop.permute.xlu1 %1885 }
 0x812   :  { %v4294_v29 = vmul.f32 -1.442695, %v5654_v60  ;;  %vm1887_vm2 = vcmp.eq.s32.totalorder %v1886_v7, 1 }
 0x813   :  { %v4295_v59 = vmul.f32 -1.442695, %v5655_v37  ;;  %v4296_v43 = vmul.f32 -1.442695, %v5679_v44 }
 0x814   :  { %5844 = vpow2.f32 %v4294_v29 }
 0x815   :  { %5846 = vpow2.f32 %v4295_v59 }
 0x816   :  { %5848 = vpow2.f32 %v4296_v43 }
 0x817   :  { %5850 = vtanh.f32 %v5678_v5 }
 0x81e   :  { %v5845_v9 = vpop.eup %5844 }
 0x81f   :  { %v5847_v11 = vpop.eup %5846  ;;  %v1862_v26 = vadd.f32 1.0, %v5845_v9  ;;  %v2259_v9 = vld [vmem:[%s7943_s7 + $0x38] sm:$0xff] }
 0x820   :  { %v1868_v46 = vadd.f32 1.0, %v5847_v11  ;;  %v5849_v23 = vpop.eup %5848  ;;  %v2252_v11 = vld [vmem:[%s7943_s7] sm:$0xff] }
 0x821   :  { %5852 = vrcp.f32 %v1862_v26  ;;  %v5851_v6 = vpop.eup %5850  ;;  %v1875_v60 = vadd.f32 1.0, %v5849_v23  ;;  %v2256_v26 = vld [vmem:[%s7943_s7 + $0x20] sm:$0xff] }
 0x822   :  { %5854 = vrcp.f32 %v1868_v46  ;;  %v5028_v23 = vpack.c.bf16 %v2256_v26, %v2252_v11  ;;  %v2286_v26 = vld [vmem:[%s7943_s7 + $0x110] sm:$0xff] }
 0x823   :  { %5856 = vrcp.f32 %v1875_v60  ;;  %v2265_v60 = vld [vmem:[%s7943_s7 + $0x68] sm:$0xff] }
 0x82b   :  { %v5853_v61 = vpop.eup %5852 }
 0x82c   :  { %v5855_v56 = vpop.eup %5854  ;;  %v1879_v36 = vmul.f32 %v5853_v61, %v5851_v6  ;;  %v2254_v6 = vld [vmem:[%s7943_s7 + $0x10] sm:$0xff] }
 0x82d   :  { %v1878_v12 = vmul.f32 %v5855_v56, %v6889_v45  ;;  %v5857_v29 = vpop.eup %5856  ;;  %v2258_v61 = vld [vmem:[%s7943_s7 + $0x30] sm:$0xff] }
 0x82e   :  { %v5060_v56 = vpack.c.bf16 %v2258_v61, %v2254_v6  ;;  %v2293_v6 = vld [vmem:[%s7943_s7 + $0x148] sm:$0xff] }
 0x82f   :  { %v1880_v37 = vadd.f32 %v1879_v36, %v1878_v12  ;;  %v2261_v36 = vld [vmem:[%s7943_s7 + $0x48] sm:$0xff]  ;;  %v2263_v12 = vld [vmem:[%s7943_s7 + $0x58] sm:$0xff] }
 0x830   :  { %v5030_v7 = vpack.c.bf16 %v2265_v60, %v2261_v36  ;;  %v2297_v61 = vld [vmem:[%s7943_s7 + $0x168] sm:$0xff]  ;;  %v2299_v60 = vld [vmem:[%s7943_s7 + $0x178] sm:$0xff] }
 0x831   :  { %5858 = vtanh.f32 %v1880_v37  ;;  %v6936_v48 = vsel %vm1887_vm2, %v1880_v37, %v6889_v45  ;;  %v2257_v45 = vld [vmem:[%s7943_s7 + $0x28] sm:$0xff]  ;;  %v2267_v37 = vld [vmem:[%s7943_s7 + $0x78] sm:$0xff]  ;;  %v5046_v36 = vpack.c.bf16 %v2297_v61, %v2293_v6 }
 0x83b   :  { %v5859_v59 = vpop.eup %5858 }
 0x83c   :  { %v1882_v44 = vmul.f32 %v5859_v59, %v5857_v29  ;;  %v2264_v29 = vld [vmem:[%s7943_s7 + $0x60] sm:$0xff]  ;;  %v5062_v59 = vpack.c.bf16 %v2267_v37, %v2263_v12 }
 0x83d   :  { %v2292_v12 = vld [vmem:[%s7943_s7 + $0x140] sm:$0xff] }
 0x83e   :  { %v6939_v43 = vsel %vm1887_vm2, %v1882_v44, %v6892_v3  ;;  %v2255_v3 = vld [vmem:[%s7943_s7 + $0x18] sm:$0xff] }
 0x83f   :  { %1959 = vmatmul.mubr.f32.vlgmr.msra.gmra.mrb[16].mxu0 %v6939_v43  ;;  %2030 = vmatmul.mubr.f32.vlgmr.msra.gmra.mrb[20].mxu1 %v6939_v43  ;;  %v5058_v46 = vpack.c.bf16 %v2259_v9, %v2255_v3  ;;  %v2284_v3 = vld [vmem:[%s7943_s7 + $0x100] sm:$0xff] }
 0x840   :  { %4965 = vmatpush1.bf16.msra.mxu0 %v6166_v13  ;;  %4997 = vmatpush1.bf16.msra.mxu1 %v6233_v33  ;;  %v224_v13 = vadd.f32 %v6562_v17, %v6580_v31 }
 0x841   :  { %4967 = vmatprep.subr.bf16.mxu0 %v6183_v18  ;;  %4999 = vmatprep.subr.bf16.mxu1 %v6261_v42  ;;  %v226_v18 = vadd.f32 %v6564_v14, %v6584_v32  ;;  %v2253_v14 = vld [vmem:[%s7943_s7 + $0x8] sm:$0xff] }
 0x842   :  { %2135 = vmatprep.mubr.f32.mxu0 %v6048_v8  ;;  %2206 = vmatprep.mubr.f32.mxu1 %v6048_v8  ;;  %v5026_v5 = vpack.c.bf16 %v2257_v45, %v2253_v14  ;;  %v2291_v45 = vld [vmem:[%s7943_s7 + $0x138] sm:$0xff] }
 0x844   :  { %4969 = vmatpush1.bf16.msra.mxu0 %v6192_v21  ;;  %5001 = vmatpush1.bf16.msra.mxu1 %v6280_v47 }
 0x845   :  { %4971 = vmatprep.subr.bf16.mxu0 %v6205_v25  ;;  %5003 = vmatprep.subr.bf16.mxu1 %v6302_v54 }
 0x848   :  { %4973 = vmatpush1.bf16.msra.mxu0 %v6240_v35  ;;  %5005 = vmatpush1.bf16.msra.mxu1 %v6334_v63 }
 0x849   :  { %4975 = vmatprep.subr.bf16.mxu0 %v6253_v39  ;;  %5007 = vmatprep.subr.bf16.mxu1 %v6346_v4 }
 0x84c   :  { %4977 = vmatpush1.bf16.msra.mxu0 %v6290_v50  ;;  %5009 = vmatpush1.bf16.msra.mxu1 %v6377_v16 }
 0x84d   :  { %4979 = vmatprep.subr.bf16.mxu0 %v6300_v53  ;;  %5011 = vmatprep.subr.bf16.mxu1 %v6392_v24 }
 0x850   :  { %4981 = vmatpush1.bf16.msra.mxu0 %v6332_v62  ;;  %5013 = vmatpush1.bf16.msra.mxu1 %v6426_v38 }
 0x851   :  { %4983 = vmatprep.subr.bf16.mxu0 %v6344_v2  ;;  %5015 = vmatprep.subr.bf16.mxu1 %v6432_v41  ;;  %v2063_v41 = vpop.permute.xlu0 %2062 }
 0x852   :  { %vm2064_vm3 = vcmp.eq.s32.totalorder %v2063_v41, 1  ;;  %v2278_v41 = vld [vmem:[%s7943_s7 + $0xd0] sm:$0xff] }
 0x854   :  { %4985 = vmatpush1.bf16.msra.mxu0 %v6375_v15  ;;  %5017 = vmatpush1.bf16.msra.mxu1 %v6462_v52 }
 0x855   :  { %4987 = vmatprep.subr.bf16.mxu0 %v6387_v22  ;;  %5019 = vmatprep.subr.bf16.mxu1 %v6467_v55 }
 0x858   :  { %4989 = vmatpush1.bf16.msra.mxu0 %v6418_v34  ;;  %5021 = vmatpush1.bf16.msra.mxu1 %v6488_v0 }
 0x859   :  { %4991 = vmatprep.subr.bf16.mxu0 %v6429_v40  ;;  %5023 = vmatprep.subr.bf16.mxu1 %v6492_v1 }
 0x85c   :  { %4993 = vmatpush1.bf16.msra.mxu0 %v6459_v51  ;;  %5025 = vmatpush1.bf16.msra.mxu1 %v6506_v10 }
 0x85d   :  { %5027 = vmatprep.subr.bf16.mxu0 %v5026_v5  ;;  %5059 = vmatprep.subr.bf16.mxu1 %v5058_v46  ;;  %v2288_v5 = vld [vmem:[%s7943_s7 + $0x120] sm:$0xff]  ;;  %v2290_v46 = vld [vmem:[%s7943_s7 + $0x130] sm:$0xff] }
 0x85e   :  { %v5044_v11 = vpack.c.bf16 %v2288_v5, %v2284_v3  ;;  %v232_v3 = vadd.f32 %v6568_v20, %v6584_v32 }
 0x912   :  { %v1960_v21 = vpop.f32.mrb[16].mxu0  ;;  %v2031_v25 = vpop.f32.mrb[20].mxu1 }
 0x913   :  { %v1961_v33 = vadd.f32 %v1960_v21, %v224_v13  ;;  %v1962_v35 = vpop.f32.mrb[17].mxu0  ;;  %v2033_v39 = vpop.f32.mrb[21].mxu1  ;;  %v5680_v62 = vadd.f32 %v2031_v25, %v6592_v57  ;;  %v2266_v13 = vld [vmem:[%s7943_s7 + $0x70] sm:$0xff]  ;;  %v2269_v21 = vld [vmem:[%s7943_s7 + $0x88] sm:$0xff] }
 0x914   :  { %v1963_v42 = vadd.f32 %v1962_v35, %v226_v18  ;;  %v5681_v53 = vadd.f32 %v2033_v39, %v6596_v58  ;;  %v2273_v25 = vld [vmem:[%s7943_s7 + $0xa8] sm:$0xff]  ;;  %v2275_v39 = vld [vmem:[%s7943_s7 + $0xb8] sm:$0xff] }
 0x915   :  { %v4297_v47 = vmul.f32 -1.442695, %v1961_v33  ;;  %v2271_v33 = vld [vmem:[%s7943_s7 + $0x98] sm:$0xff]  ;;  %v5034_v35 = vpack.c.bf16 %v2273_v25, %v2269_v21 }
 0x916   :  { %v4298_v50 = vmul.f32 -1.442695, %v1963_v42  ;;  %v4299_v54 = vmul.f32 -1.442695, %v5681_v53  ;;  %v2268_v42 = vld [vmem:[%s7943_s7 + $0x80] sm:$0xff]  ;;  %v2307_v21 = vld [vmem:[%s7943_s7 + $0x1b8] sm:$0xff] }
 0x917   :  { %5860 = vpow2.f32 %v4297_v47  ;;  %v2272_v47 = vld [vmem:[%s7943_s7 + $0xa0] sm:$0xff] }
 0x918   :  { %5862 = vpow2.f32 %v4298_v50  ;;  %v5066_v50 = vpack.c.bf16 %v2275_v39, %v2271_v33  ;;  %v5036_v53 = vpack.c.bf16 %v2272_v47, %v2268_v42  ;;  %v2304_v39 = vld [vmem:[%s7943_s7 + $0x1a0] sm:$0xff]  ;;  %v2302_v42 = vld [vmem:[%s7943_s7 + $0x190] sm:$0xff] }
 0x919   :  { %5864 = vpow2.f32 %v4299_v54  ;;  %v2270_v54 = vld [vmem:[%s7943_s7 + $0x90] sm:$0xff] }
 0x91a   :  { %5866 = vtanh.f32 %v5680_v62  ;;  %v2274_v62 = vld [vmem:[%s7943_s7 + $0xb0] sm:$0xff] }
 0x921   :  { %v5861_v63 = vpop.eup %5860 }
 0x922   :  { %v5863_v2 = vpop.eup %5862  ;;  %v2039_v4 = vadd.f32 1.0, %v5861_v63  ;;  %v5068_v63 = vpack.c.bf16 %v2274_v62, %v2270_v54  ;;  %v2313_v54 = vld [vmem:[%s7943_s7 + $0x1e8] sm:$0xff] }
 0x923   :  { %v2045_v15 = vadd.f32 1.0, %v5863_v2  ;;  %v5865_v16 = vpop.eup %5864  ;;  %v2277_v2 = vld [vmem:[%s7943_s7 + $0xc8] sm:$0xff] }
 0x924   :  { %5868 = vrcp.f32 %v2039_v4  ;;  %v5867_v22 = vpop.eup %5866  ;;  %v2052_v40 = vadd.f32 1.0, %v5865_v16  ;;  %v2281_v4 = vld [vmem:[%s7943_s7 + $0xe8] sm:$0xff] }
 0x925   :  { %5870 = vrcp.f32 %v2045_v15  ;;  %v2279_v15 = vld [vmem:[%s7943_s7 + $0xd8] sm:$0xff]  ;;  %v5038_v16 = vpack.c.bf16 %v2281_v4, %v2277_v2 }
 0x926   :  { %5872 = vrcp.f32 %v2052_v40  ;;  %v2311_v2 = vld [vmem:[%s7943_s7 + $0x1d8] sm:$0xff] }
 0x927   :  { %v2315_v4 = vld [vmem:[%s7943_s7 + $0x1f8] sm:$0xff] }
 0x92e   :  { %v5869_v24 = vpop.eup %5868 }
 0x92f   :  { %v5871_v34 = vpop.eup %5870  ;;  %v2056_v38 = vmul.f32 %v5869_v24, %v5867_v22  ;;  %v2283_v22 = vld [vmem:[%s7943_s7 + $0xf8] sm:$0xff]  ;;  %v2276_v24 = vld [vmem:[%s7943_s7 + $0xc0] sm:$0xff] }
 0x930   :  { %v2055_v51 = vmul.f32 %v5871_v34, %v6936_v48  ;;  %v5873_v0 = vpop.eup %5872  ;;  %v2280_v34 = vld [vmem:[%s7943_s7 + $0xe0] sm:$0xff] }
 0x931   :  { %v5040_v40 = vpack.c.bf16 %v2280_v34, %v2276_v24  ;;  %v2310_v24 = vld [vmem:[%s7943_s7 + $0x1d0] sm:$0xff] }
 0x932   :  { %v2057_v52 = vadd.f32 %v2056_v38, %v2055_v51  ;;  %v5070_v38 = vpack.c.bf16 %v2283_v22, %v2279_v15  ;;  %v2282_v51 = vld [vmem:[%s7943_s7 + $0xf0] sm:$0xff]  ;;  %v2308_v15 = vld [vmem:[%s7943_s7 + $0x1c0] sm:$0xff] }
 0x933   :  { %v2312_v22 = vld [vmem:[%s7943_s7 + $0x1e0] sm:$0xff]  ;;  %v2314_v34 = vld [vmem:[%s7943_s7 + $0x1f0] sm:$0xff] }
 0x934   :  { %5874 = vtanh.f32 %v2057_v52  ;;  %v6983_v55 = vsel %vm2064_vm3, %v2057_v52, %v6936_v48  ;;  %v2260_v48 = vld [vmem:[%s7943_s7 + $0x40] sm:$0xff]  ;;  %v5072_v52 = vpack.c.bf16 %v2282_v51, %v2278_v41  ;;  %v2249_v41 = vld [vmem:[%s7942_s6 + $0x28] sm:$0xf]  ;;  %v5088_v51 = vpack.c.bf16 %v2314_v34, %v2310_v24  ;;  %v2646_v34 = vld [vmem:[%s7944_s8 + $0x18] sm:$0xff] }
 0x935   :  { %v5032_v44 = vpack.c.bf16 %v2264_v29, %v2260_v48  ;;  %v2294_v29 = vld [vmem:[%s7943_s7 + $0x150] sm:$0xff]  ;;  %v2664_v24 = vld [vmem:[%s7944_s8 + $0xa8] sm:$0xff] }
 0x93e   :  { %v5875_v1 = vpop.eup %5874 }
 0x93f   :  { %v2059_v10 = vmul.f32 %v5875_v1, %v5873_v0  ;;  %v2285_v0 = vld [vmem:[%s7943_s7 + $0x108] sm:$0xff] }
 0x940   :  { %v2289_v1 = vld [vmem:[%s7943_s7 + $0x128] sm:$0xff] }
 0x941   :  { %v6986_v17 = vsel %vm2064_vm3, %v2059_v10, %v6939_v43  ;;  %v2262_v43 = vld [vmem:[%s7943_s7 + $0x50] sm:$0xff]  ;;  %v2287_v10 = vld [vmem:[%s7943_s7 + $0x118] sm:$0xff]  ;;  %v5042_v14 = vpack.c.bf16 %v2289_v1, %v2285_v0  ;;  %v2648_v0 = vld [vmem:[%s7944_s8 + $0x28] sm:$0xff] }
 0x942   :  { %2136 = vmatmul.mubr.f32.vlgmr.msra.gmra.mrb[18].mxu0 %v6986_v17  ;;  %2207 = vmatmul.mubr.f32.vlgmr.msra.gmra.mrb[22].mxu1 %v6986_v17  ;;  %v5064_v18 = vpack.c.bf16 %v2266_v13, %v2262_v43  ;;  %v5074_v9 = vpack.c.bf16 %v2291_v45, %v2287_v10  ;;  %v2305_v13 = vld [vmem:[%s7943_s7 + $0x1a8] sm:$0xff]  ;;  %v230_v45 = vadd.f32 %v6566_v19, %v6580_v31 }
 0x943   :  { %2380 = vmatprep.mubr.f32.mxu0 %v6048_v8  ;;  %2451 = vmatprep.mubr.f32.mxu1 %v6048_v8 }
 0x944   :  { %5029 = vmatpush1.bf16.msra.mxu0 %v5028_v23  ;;  %5061 = vmatpush1.bf16.msra.mxu1 %v5060_v56  ;;  %v5076_v23 = vpack.c.bf16 %v2290_v46, %v2286_v26  ;;  %v2295_v56 = vld [vmem:[%s7943_s7 + $0x158] sm:$0xff] }
 0x945   :  { %5031 = vmatprep.subr.bf16.mxu0 %v5030_v7  ;;  %5063 = vmatprep.subr.bf16.mxu1 %v5062_v59  ;;  %v2296_v7 = vld [vmem:[%s7943_s7 + $0x160] sm:$0xff]  ;;  %v5078_v37 = vpack.c.bf16 %v2299_v60, %v2295_v56  ;;  %v2298_v59 = vld [vmem:[%s7943_s7 + $0x170] sm:$0xff] }
 0x946   :  { %v5048_v48 = vpack.c.bf16 %v2296_v7, %v2292_v12  ;;  %v5080_v43 = vpack.c.bf16 %v2298_v59, %v2294_v29 }
 0x948   :  { %5033 = vmatpush1.bf16.msra.mxu0 %v5032_v44  ;;  %5065 = vmatpush1.bf16.msra.mxu1 %v5064_v18  ;;  %v2301_v44 = vld [vmem:[%s7943_s7 + $0x188] sm:$0xff]  ;;  %v2303_v18 = vld [vmem:[%s7943_s7 + $0x198] sm:$0xff] }
 0x949   :  { %5035 = vmatprep.subr.bf16.mxu0 %v5034_v35  ;;  %5067 = vmatprep.subr.bf16.mxu1 %v5066_v50  ;;  %v5050_v25 = vpack.c.bf16 %v2305_v13, %v2301_v44  ;;  %v5082_v33 = vpack.c.bf16 %v2307_v21, %v2303_v18  ;;  %v2300_v35 = vld [vmem:[%s7943_s7 + $0x180] sm:$0xff]  ;;  %v2306_v50 = vld [vmem:[%s7943_s7 + $0x1b0] sm:$0xff]  ;;  %v2240_v21 = vpop.permute.xlu1 %2239 }
 0x94a   :  { %v5052_v47 = vpack.c.bf16 %v2304_v39, %v2300_v35  ;;  %v5084_v62 = vpack.c.bf16 %v2306_v50, %v2302_v42  ;;  %v2643_v13 = vld [vmem:[%s7944_s8] sm:$0xff]  ;;  %v2652_v39 = vld [vmem:[%s7944_s8 + $0x48] sm:$0xff]  ;;  %vm2241_vm7 = vcmp.eq.s32.totalorder %v2240_v21, 1 }
 0x94b   :  { %v2647_v18 = vld [vmem:[%s7944_s8 + $0x20] sm:$0xff]  ;;  %v2656_v42 = vld [vmem:[%s7944_s8 + $0x68] sm:$0xff] }
 0x94c   :  { %5037 = vmatpush1.bf16.msra.mxu0 %v5036_v53  ;;  %5069 = vmatpush1.bf16.msra.mxu1 %v5068_v63  ;;  %v2309_v53 = vld [vmem:[%s7943_s7 + $0x1c8] sm:$0xff] }
 0x94d   :  { %5039 = vmatprep.subr.bf16.mxu0 %v5038_v16  ;;  %5071 = vmatprep.subr.bf16.mxu1 %v5070_v38  ;;  %v5054_v63 = vpack.c.bf16 %v2313_v54, %v2309_v53  ;;  %v5086_v16 = vpack.c.bf16 %v2315_v4, %v2311_v2  ;;  %v5056_v38 = vpack.c.bf16 %v2312_v22, %v2308_v15  ;;  %v2246_v54 = vld [vmem:[%s7942_s6 + $0x10] sm:$0xff]  ;;  %v2651_v2 = vld [vmem:[%s7944_s8 + $0x40] sm:$0xff]  ;;  %v2660_v22 = vld [vmem:[%s7944_s8 + $0x88] sm:$0xff] }
 0x94e   :  { %v7237_v53 = vpack.c.bf16 %v2647_v18, %v2643_v13  ;;  %v2655_v4 = vld [vmem:[%s7944_s8 + $0x60] sm:$0xff]  ;;  %v2670_v13 = vld [vmem:[%s7944_s8 + $0xd8] sm:$0xff] }
 0x94f   :  { %v2674_v18 = vld [vmem:[%s7944_s8 + $0xf8] sm:$0xff] }
 0x950   :  { %5041 = vmatpush1.bf16.msra.mxu0 %v5040_v40  ;;  %5073 = vmatpush1.bf16.msra.mxu1 %v5072_v52  ;;  %v2245_v40 = vld [vmem:[%s7942_s6 + $0x8] sm:$0xff] }
 0x951   :  { %5043 = vmatprep.subr.bf16.mxu0 %v5042_v14  ;;  %5075 = vmatprep.subr.bf16.mxu1 %v5074_v9  ;;  %v2644_v52 = vld [vmem:[%s7944_s8 + $0x8] sm:$0xff]  ;;  %v5090_v1 = vpack.c.bf16 %v2249_v41, %v2245_v40  ;;  %v7272_v41 = vpack.c.bf16 %v2655_v4, %v2651_v2 }
 0x952   :  { %v7196_v10 = vpack.c.bf16 %v2648_v0, %v2644_v52  ;;  %v2663_v52 = vld [vmem:[%s7944_s8 + $0xa0] sm:$0xff]  ;;  %v7283_v0 = vpack.c.bf16 %v2664_v24, %v2660_v22 }
 0x953   :  { %v2695_v22 = vld [vmem:[%s7944_s8 + $0x1a0] sm:$0xff] }
 0x954   :  { %5045 = vmatpush1.bf16.msra.mxu0 %v5044_v11  ;;  %5077 = vmatpush1.bf16.msra.mxu1 %v5076_v23 }
 0x955   :  { %5047 = vmatprep.subr.bf16.mxu0 %v5046_v36  ;;  %5079 = vmatprep.subr.bf16.mxu1 %v5078_v37 }
 0x958   :  { %5049 = vmatpush1.bf16.msra.mxu0 %v5048_v48  ;;  %5081 = vmatpush1.bf16.msra.mxu1 %v5080_v43  ;;  %v2248_v43 = vld [vmem:[%s7942_s6 + $0x20] sm:$0xf] }
 0x959   :  { %5051 = vmatprep.subr.bf16.mxu0 %v5050_v25  ;;  %5083 = vmatprep.subr.bf16.mxu1 %v5082_v33  ;;  %v2247_v25 = vld [vmem:[%s7942_s6 + $0x18] sm:$0xff] }
 0x95a   :  { %v2251_v33 = vld [vmem:[%s7942_s6 + $0x38] sm:$0xf] }
 0x95c   :  { %5053 = vmatpush1.bf16.msra.mxu0 %v5052_v47  ;;  %5085 = vmatpush1.bf16.msra.mxu1 %v5084_v62  ;;  %v5096_v62 = vpack.c.bf16 %v2251_v33, %v2247_v25  ;;  %v2683_v25 = vld [vmem:[%s7944_s8 + $0x140] sm:$0xff] }
 0x95d   :  { %5055 = vmatprep.subr.bf16.mxu0 %v5054_v63  ;;  %5087 = vmatprep.subr.bf16.mxu1 %v5086_v16  ;;  %v2250_v63 = vld [vmem:[%s7942_s6 + $0x30] sm:$0xf]  ;;  %v7252_v16 = vpack.c.bf16 %v2656_v42, %v2652_v39  ;;  %v2687_v33 = vld [vmem:[%s7944_s8 + $0x160] sm:$0xff]  ;;  %v7400_v39 = vpack.c.bf16 %v2674_v18, %v2670_v13 }
 0x95e   :  { %v5099_v40 = vpack.c.bf16 %v2250_v63, %v2246_v54  ;;  %v2669_v42 = vld [vmem:[%s7944_s8 + $0xd0] sm:$0xff]  ;;  %v2696_v54 = vld [vmem:[%s7944_s8 + $0x1a8] sm:$0xff]  ;;  %v2682_v63 = vld [vmem:[%s7944_s8 + $0x138] sm:$0xff]  ;;  %v7422_v2 = vpack.c.bf16 %v2687_v33, %v2683_v25 }
 0x95f   :  { %v2701_v13 = vld [vmem:[%s7944_s8 + $0x1d0] sm:$0xff] }
 0x960   :  { %5057 = vmatpush1.bf16.msra.mxu0 %v5056_v38  ;;  %5089 = vmatpush1.bf16.msra.mxu1 %v5088_v51  ;;  %v2243_v38 = vld [vmem:[%s7938_s2] sm:$0xff]  ;;  %v2705_v18 = vld [vmem:[%s7944_s8 + $0x1f0] sm:$0xff] }
 0x961   :  { %5103 = vmatprep.subr.bf16.mxu0 %v7196_v10  ;;  %5092 = vmatprep.subr.msk.bf16.mxu1 %vm7199_vm6, %v5090_v1  ;;  %v2659_v51 = vld [vmem:[%s7944_s8 + $0x80] sm:$0xff]  ;;  %v2645_v1 = vld [vmem:[%s7944_s8 + $0x10] sm:$0xff]  ;;  %v7524_v25 = vpack.c.bf16 %v2705_v18, %v2701_v13 }
 0xa15   :  { %v2137_v5 = vpop.f32.mrb[18].mxu0  ;;  %v2208_v9 = vpop.f32.mrb[22].mxu1 }
 0xa16   :  { %v2138_v11 = vadd.f32 %v2137_v5, %v230_v45  ;;  %v2139_v26 = vpop.f32.mrb[19].mxu0  ;;  %v2210_v46 = vpop.f32.mrb[23].mxu1  ;;  %v5682_v60 = vadd.f32 %v2208_v9, %v6592_v57  ;;  %v2244_v57 = vld [vmem:[%s7942_s6] sm:$0xff]  ;;  %v2649_v45 = vld [vmem:[%s7944_s8 + $0x30] sm:$0xff]  ;;  %v2672_v9 = vld [vmem:[%s7944_s8 + $0xe8] sm:$0xff] }
 0xa17   :  { %v2140_v23 = vadd.f32 %v2139_v26, %v232_v3  ;;  %v5683_v56 = vadd.f32 %v2210_v46, %v6596_v58  ;;  %v5093_v50 = vpack.c.bf16 %v2248_v43, %v2244_v57  ;;  %v2668_v3 = vld [vmem:[%s7944_s8 + $0xc8] sm:$0xff]  ;;  %v2658_v26 = vld [vmem:[%s7944_s8 + $0x78] sm:$0xff]  ;;  %v7311_v46 = vpack.c.bf16 %v2663_v52, %v2659_v51 }
 0xa18   :  { %v4300_v6 = vmul.f32 -1.442695, %v2138_v11  ;;  %v2654_v11 = vld [vmem:[%s7944_s8 + $0x58] sm:$0xff]  ;;  %v7323_v14 = vpack.c.bf16 %v2672_v9, %v2668_v3  ;;  %v2684_v57 = vld [vmem:[%s7944_s8 + $0x148] sm:$0xff]  ;;  %v2699_v9 = vld [vmem:[%s7944_s8 + $0x1c0] sm:$0xff] }
 0xa19   :  { %v4301_v61 = vmul.f32 -1.442695, %v2140_v23  ;;  %v4302_v36 = vmul.f32 -1.442695, %v5683_v56  ;;  %v7313_v23 = vpack.c.bf16 %v2649_v45, %v2645_v1  ;;  %v7325_v56 = vpack.c.bf16 %v2658_v26, %v2654_v11  ;;  %v2688_v43 = vld [vmem:[%s7944_s8 + $0x168] sm:$0xff]  ;;  %v2686_v52 = vld [vmem:[%s7944_s8 + $0x158] sm:$0xff] }
 0xa1a   :  { %5876 = vpow2.f32 %v4300_v6  ;;  %v2667_v6 = vld [vmem:[%s7944_s8 + $0xc0] sm:$0xff]  ;;  %v2704_v51 = vld [vmem:[%s7944_s8 + $0x1e8] sm:$0xff]  ;;  %v2690_v1 = vld [vmem:[%s7944_s8 + $0x178] sm:$0xff] }
 0xa1b   :  { %5878 = vpow2.f32 %v4301_v61  ;;  %v2671_v61 = vld [vmem:[%s7944_s8 + $0xe0] sm:$0xff]  ;;  %v7469_v26 = vpack.c.bf16 %v2690_v1, %v2686_v52 }
 0xa1c   :  { %5880 = vpow2.f32 %v4302_v36  ;;  %v2653_v36 = vld [vmem:[%s7944_s8 + $0x50] sm:$0xff] }
 0xa1d   :  { %5882 = vtanh.f32 %v5682_v60  ;;  %v2657_v60 = vld [vmem:[%s7944_s8 + $0x70] sm:$0xff] }
 0xa24   :  { %v5877_v12 = vpop.eup %5876 }
 0xa25   :  { %v5879_v19 = vpop.eup %5878  ;;  %v2216_v31 = vadd.f32 1.0, %v5877_v12  ;;  %v2676_v12 = vld [vmem:[%s7944_s8 + $0x108] sm:$0xff] }
 0xa26   :  { %v2222_v20 = vadd.f32 1.0, %v5879_v19  ;;  %v5881_v32 = vpop.eup %5880  ;;  %v2680_v19 = vld [vmem:[%s7944_s8 + $0x128] sm:$0xff] }
 0xa27   :  { %5884 = vrcp.f32 %v2216_v31  ;;  %v5883_v7 = vpop.eup %5882  ;;  %v2229_v59 = vadd.f32 1.0, %v5881_v32  ;;  %v2662_v31 = vld [vmem:[%s7944_s8 + $0x98] sm:$0xff]  ;;  %v7349_v32 = vpack.c.bf16 %v2671_v61, %v2667_v6  ;;  %v2703_v6 = vld [vmem:[%s7944_s8 + $0x1e0] sm:$0xff]  ;;  %v2685_v61 = vld [vmem:[%s7944_s8 + $0x150] sm:$0xff] }
 0xa28   :  { %5886 = vrcp.f32 %v2222_v20  ;;  %v2666_v20 = vld [vmem:[%s7944_s8 + $0xb8] sm:$0xff] }
 0xa29   :  { %5888 = vrcp.f32 %v2229_v59  ;;  %v7363_v59 = vpack.c.bf16 %v2666_v20, %v2662_v31 }
 0xa31   :  { %v5885_v37 = vpop.eup %5884 }
 0xa32   :  { %v5887_v48 = vpop.eup %5886  ;;  %v2233_v29 = vmul.f32 %v5885_v37, %v5883_v7  ;;  %v7351_v7 = vpack.c.bf16 %v2657_v60, %v2653_v36  ;;  %v2675_v37 = vld [vmem:[%s7944_s8 + $0x100] sm:$0xff]  ;;  %v2689_v36 = vld [vmem:[%s7944_s8 + $0x170] sm:$0xff]  ;;  %v2694_v60 = vld [vmem:[%s7944_s8 + $0x198] sm:$0xff] }
 0xa33   :  { %v2232_v44 = vmul.f32 %v5887_v48, %v6983_v55  ;;  %v5889_v55 = vpop.eup %5888  ;;  %v2679_v48 = vld [vmem:[%s7944_s8 + $0x120] sm:$0xff]  ;;  %v7490_v31 = vpack.c.bf16 %v2689_v36, %v2685_v61 }
 0xa35   :  { %v2234_v58 = vadd.f32 %v2233_v29, %v2232_v44  ;;  %v7361_v29 = vpack.c.bf16 %v2680_v19, %v2676_v12  ;;  %v2661_v44 = vld [vmem:[%s7944_s8 + $0x90] sm:$0xff]  ;;  %v2698_v12 = vld [vmem:[%s7944_s8 + $0x1b8] sm:$0xff]  ;;  %v7488_v19 = vpack.c.bf16 %v2703_v6, %v2699_v9 }
 0xa36   :  { %v7494_v20 = vpack.c.bf16 %v2698_v12, %v2694_v60  ;;  %v7953_v60 = vsub.s32 3, %v6571_v27 }
 0xa37   :  { %5890 = vtanh.f32 %v2234_v58  ;;  %v2665_v58 = vld [vmem:[%s7944_s8 + $0xb0] sm:$0xff] }
 0xa38   :  { %v7388_v21 = vpack.c.bf16 %v2665_v58, %v2661_v44  ;;  %v2702_v44 = vld [vmem:[%s7944_s8 + $0x1d8] sm:$0xff] }
 0xa39   :  { %v2706_v58 = vld [vmem:[%s7944_s8 + $0x1f8] sm:$0xff] }
 0xa41   :  { %v5891_v35 = vpop.eup %5890 }
 0xa42   :  { %v2236_v47 = vmul.f32 %v5891_v35, %v5889_v55  ;;  %v7386_v55 = vpack.c.bf16 %v2679_v48, %v2675_v37  ;;  %v7398_v35 = vpack.c.bf16 %v2688_v43, %v2684_v57  ;;  %v2693_v37 = vld [vmem:[%s7944_s8 + $0x190] sm:$0xff]  ;;  %v7513_v43 = vpack.c.bf16 %v2706_v58, %v2702_v44 }
 0xa43   :  { %v2697_v48 = vld [vmem:[%s7944_s8 + $0x1b0] sm:$0xff] }
 0xa44   :  { %v2242_v15 = vsel %vm2241_vm7, %v2236_v47, %v6986_v17  ;;  %v2650_v17 = vld [vmem:[%s7944_s8 + $0x38] sm:$0xff]  ;;  %v2673_v47 = vld [vmem:[%s7944_s8 + $0xf0] sm:$0xff]  ;;  %v7510_v57 = vpack.c.bf16 %v2697_v48, %v2693_v37 }
 0xa45   :  { %2381 = vmatmul.mubr.f32.vlgmr.msra.gmra.mrb[20].mxu0 %v2242_v15  ;;  %2452 = vmatmul.mubr.f32.vlgmr.msra.gmra.mrb[24].mxu1 %v2242_v15  ;;  %v7295_v5 = vpack.c.bf16 %v2650_v17, %v2646_v34  ;;  %v7424_v4 = vpack.c.bf16 %v2673_v47, %v2669_v42  ;;  %v2691_v15 = vld [vmem:[%s7944_s8 + $0x180] sm:$0xff]  ;;  %v2677_v17 = vld [vmem:[%s7944_s8 + $0x110] sm:$0xff] }
 0xa46   :  { %5095 = vmatpush1.bf16.msk.msra.mxu1 %vm7199_vm6, %v5093_v50  ;;  %5105 = vmatpush1.bf16.msra.mxu0 %v7237_v53  ;;  %v2692_v50 = vld [vmem:[%s7944_s8 + $0x188] sm:$0xff]  ;;  %v7458_v45 = vpack.c.bf16 %v2695_v22, %v2691_v15  ;;  %v2617_v22 = vld [vmem:[%s7945_s9] sm:$0xf] }
 0xa47   :  { %2539 = vmatprep.mubr.f32.mxu1 %v6048_v8  ;;  %5098 = vmatprep.subr.msk.bf16.mxu1 %vm7199_vm6, %v5096_v62  ;;  %v2678_v62 = vld [vmem:[%s7944_s8 + $0x118] sm:$0xff]  ;;  %v7434_v24 = vpack.c.bf16 %v2696_v54, %v2692_v50  ;;  %v2630_v61 = vrot.slane %v2617_v22, %v68_v49 }
 0xa48   :  { %5107 = vmatprep.subr.bf16.mxu0 %v7252_v16  ;;  %2771 = vmatprep.mubr.f32.mxu0 %v6048_v8  ;;  %v7436_v34 = vpack.c.bf16 %v2682_v63, %v2678_v62 }
 0xa49   :  { %4305 = vmatmul.mubr.msk.f32.vlgmr.msra.gmra.mrb[26].mxu1 %vm2458_vm8, %v2243_v38 }
 0xa4a   :  { %5101 = vmatpush1.bf16.msk.msra.mxu1 %vm7199_vm6, %v5099_v40  ;;  %5109 = vmatpush1.bf16.msra.mxu0 %v7272_v41  ;;  %v2700_v40 = vld [vmem:[%s7944_s8 + $0x1c8] sm:$0xff] }
 0xa4b   :  { %2610 = vmatprep.mubr.f32.mxu1 %v6048_v8  ;;  %5111 = vmatprep.subr.bf16.mxu0 %v7283_v0  ;;  %v7467_v11 = vpack.c.bf16 %v2704_v51, %v2700_v40 }
 0xa4c   :  { %5135 = vmatprep.subr.bf16.mxu1 %v7295_v5 }
 0xa4d   :  { %4308 = vmatmul.mubr.msk.f32.vlgmr.msra.gmra.mrb[24].mxu1 %vm2458_vm8, %v2243_v38  ;;  %v2681_v38 = vld [vmem:[%s7944_s8 + $0x130] sm:$0xff] }
 0xa4e   :  { %5113 = vmatpush1.bf16.msra.mxu0 %v7311_v46  ;;  %5137 = vmatpush1.bf16.msra.mxu1 %v7313_v23  ;;  %v7460_v3 = vpack.c.bf16 %v2681_v38, %v2677_v17  ;;  %v2622_v17 = vrot.slane %v2617_v22, %v60_v28  ;;  %v2626_v38 = vrot.slane %v2617_v22, %v64_v30 }
 0xa4f   :  { %5115 = vmatprep.subr.bf16.mxu0 %v7323_v14  ;;  %5139 = vmatprep.subr.bf16.mxu1 %v7325_v56  ;;  %v2634_v28 = vrot.slane %v2617_v22, %v7953_v60 }
 0xa50   :  { %2842 = vmatprep.mubr.f32.mxu1 %v6048_v8 }
 0xa52   :  { %5117 = vmatpush1.bf16.msra.mxu0 %v7349_v32  ;;  %5141 = vmatpush1.bf16.msra.mxu1 %v7351_v7 }
 0xa53   :  { %5119 = vmatprep.subr.bf16.mxu0 %v7361_v29  ;;  %5143 = vmatprep.subr.bf16.mxu1 %v7363_v59 }
 0xa56   :  { %5121 = vmatpush1.bf16.msra.mxu0 %v7386_v55  ;;  %5145 = vmatpush1.bf16.msra.mxu1 %v7388_v21 }
 0xa57   :  { %5123 = vmatprep.subr.bf16.mxu0 %v7398_v35  ;;  %5147 = vmatprep.subr.bf16.mxu1 %v7400_v39 }
 0xa5a   :  { %5125 = vmatpush1.bf16.msra.mxu0 %v7422_v2  ;;  %5149 = vmatpush1.bf16.msra.mxu1 %v7424_v4 }
 0xa5b   :  { %5127 = vmatprep.subr.bf16.mxu0 %v7434_v24  ;;  %5151 = vmatprep.subr.bf16.mxu1 %v7436_v34 }
 0xa5e   :  { %5129 = vmatpush1.bf16.msra.mxu0 %v7458_v45  ;;  %5153 = vmatpush1.bf16.msra.mxu1 %v7460_v3 }
 0xa5f   :  { %5131 = vmatprep.subr.bf16.mxu0 %v7467_v11  ;;  %5155 = vmatprep.subr.bf16.mxu1 %v7469_v26 }
 0xa62   :  { %5133 = vmatpush1.bf16.msra.mxu0 %v7488_v19  ;;  %5157 = vmatpush1.bf16.msra.mxu1 %v7490_v31 }
 0xa63   :  { %5159 = vmatprep.subr.bf16.mxu1 %v7494_v20  ;;  %5167 = vmatprep.subr.bf16.mxu0 %v7196_v10 }
 0xa65   :  { %2772 = vmatmul.mubr.f32.vlgmr.msra.gmra.mrb[22].mxu0 %v6048_v8 }
 0xa66   :  { %5161 = vmatpush1.bf16.msra.mxu1 %v7510_v57  ;;  %5169 = vmatpush1.bf16.msra.mxu0 %v7237_v53 }
 0xa67   :  { %5163 = vmatprep.subr.bf16.mxu1 %v7513_v43  ;;  %5171 = vmatprep.subr.bf16.mxu0 %v7252_v16 }
 0xa68   :  { %2949 = vmatprep.mubr.f32.mxu0 %v6048_v8 }
 0xa6a   :  { %5165 = vmatpush1.bf16.msra.mxu1 %v7524_v25  ;;  %5173 = vmatpush1.bf16.msra.mxu0 %v7272_v41 }
 0xa6b   :  { %5199 = vmatprep.subr.bf16.mxu1 %v7295_v5  ;;  %5175 = vmatprep.subr.bf16.mxu0 %v7283_v0 }
 0xa6d   :  { %2843 = vmatmul.mubr.f32.vlgmr.msra.gmra.mrb[28].mxu1 %v6048_v8 }
 0xa6e   :  { %5201 = vmatpush1.bf16.msra.mxu1 %v7313_v23  ;;  %5177 = vmatpush1.bf16.msra.mxu0 %v7311_v46 }
 0xa6f   :  { %5203 = vmatprep.subr.bf16.mxu1 %v7325_v56  ;;  %5179 = vmatprep.subr.bf16.mxu0 %v7323_v14 }
 0xa70   :  { %3020 = vmatprep.mubr.f32.mxu1 %v6048_v8 }
 0xa72   :  { %5205 = vmatpush1.bf16.msra.mxu1 %v7351_v7  ;;  %5181 = vmatpush1.bf16.msra.mxu0 %v7349_v32 }
 0xa73   :  { %5207 = vmatprep.subr.bf16.mxu1 %v7363_v59  ;;  %5183 = vmatprep.subr.bf16.mxu0 %v7361_v29 }
 0xa76   :  { %5209 = vmatpush1.bf16.msra.mxu1 %v7388_v21  ;;  %5185 = vmatpush1.bf16.msra.mxu0 %v7386_v55 }
 0xa77   :  { %5211 = vmatprep.subr.bf16.mxu1 %v7400_v39  ;;  %5187 = vmatprep.subr.bf16.mxu0 %v7398_v35 }
 0xa7a   :  { %5213 = vmatpush1.bf16.msra.mxu1 %v7424_v4  ;;  %5189 = vmatpush1.bf16.msra.mxu0 %v7422_v2 }
 0xa7b   :  { %5215 = vmatprep.subr.bf16.mxu1 %v7436_v34  ;;  %5191 = vmatprep.subr.bf16.mxu0 %v7434_v24 }
 0xa7e   :  { %5217 = vmatpush1.bf16.msra.mxu1 %v7460_v3  ;;  %5193 = vmatpush1.bf16.msra.mxu0 %v7458_v45 }
 0xa7f   :  { %5219 = vmatprep.subr.bf16.mxu1 %v7469_v26  ;;  %5195 = vmatprep.subr.bf16.mxu0 %v7467_v11 }
 0xa82   :  { %5221 = vmatpush1.bf16.msra.mxu1 %v7490_v31  ;;  %5197 = vmatpush1.bf16.msra.mxu0 %v7488_v19 }
 0xa83   :  { %5223 = vmatprep.subr.bf16.mxu1 %v7494_v20  ;;  %5231 = vmatprep.subr.bf16.mxu0 %v7196_v10 }
 0xa86   :  { %5225 = vmatpush1.bf16.msra.mxu1 %v7510_v57 }
 0xa87   :  { %5227 = vmatprep.subr.bf16.mxu1 %v7513_v43 }
 0xa8a   :  { %5229 = vmatpush1.bf16.msra.mxu1 %v7524_v25 }
 0xa8b   :  { %5263 = vmatprep.subr.bf16.mxu1 %v7295_v5 }
 0xb18   :  { %v2382_v33 = vpop.f32.mrb[20].mxu0 }
 0xb19   :  { %v2384_v42 = vpop.f32.mrb[21].mxu0 }
 0xb1c   :  { %v2541_v47 = vpop.f32.mrb[26].mxu1 }
 0xb1d   :  { %v2542_v50 = vadd.f32 %v2541_v47, %v2382_v33  ;;  %v2543_v54 = vpop.f32.mrb[27].mxu1 }
 0xb1e   :  { %v2544_v62 = vadd.f32 %v2543_v54, %v2384_v42 }
 0xb1f   :  { %v7571_v40 = vadd.f32 %v2622_v17, %v2542_v50 }
 0xb20   :  { %v2612_v63 = vpop.f32.mrb[24].mxu1  ;;  %v7573_v51 = vadd.f32 %v2626_v38, %v2544_v62 }
 0xb21   :  { %v2614_v15 = vpop.f32.mrb[25].mxu1  ;;  %v7581_v30 = vadd.f32 %v2630_v61, %v2612_v63 }
 0xb22   :  { %v7583_v37 = vadd.f32 %v2634_v28, %v2614_v15  ;;  %v2878_v60 = vrot.slane %v7573_v51, 1 }
 0xb24   :  { %v2880_v28 = vrot.slane %v7583_v37, 1 }
 0xb38   :  { %v2773_v52 = vpop.f32.mrb[22].mxu0 }
 0xb39   :  { %v2774_v1 = vadd.f32 %v2773_v52, %v7571_v40  ;;  %v2775_v9 = vpop.f32.mrb[23].mxu0 }
 0xb3a   :  { %v2776_v6 = vadd.f32 %v2775_v9, %v7573_v51  ;;  %v2877_v9 = vrot.slane %v7571_v40, 1 }
 0xb3b   :  { %v4309_v36 = vmul.f32 -1.442695, %v2774_v1 }
 0xb3c   :  { %v4310_v12 = vmul.f32 -1.442695, %v2776_v6  ;;  %v2879_v6 = vrot.slane %v7581_v30, 1 }
 0xb3d   :  { %5892 = vpow2.f32 %v4309_v36 }
 0xb3e   :  { %5894 = vpow2.f32 %v4310_v12 }
 0xb40   :  { %v2844_v48 = vpop.f32.mrb[28].mxu1 }
 0xb41   :  { %v2845_v44 = vadd.f32 %v2844_v48, %v7581_v30  ;;  %v2846_v58 = vpop.f32.mrb[29].mxu1 }
 0xb42   :  { %v2847_v13 = vadd.f32 %v2846_v58, %v7583_v37 }
 0xb44   :  { %v4311_v18 = vmul.f32 -1.442695, %v2847_v13 }
 0xb46   :  { %5896 = vpow2.f32 %v4311_v18 }
 0xb47   :  { %v5893_v33 = vpop.eup %5892  ;;  %5898 = vtanh.f32 %v2845_v44 }
 0xb48   :  { %v5895_v49 = vpop.eup %5894  ;;  %v2852_v42 = vadd.f32 1.0, %v5893_v33 }
 0xb49   :  { %v2858_v27 = vadd.f32 1.0, %v5895_v49 }
 0xb4a   :  { %5900 = vrcp.f32 %v2852_v42 }
 0xb4b   :  { %5902 = vrcp.f32 %v2858_v27 }
 0xb50   :  { %v5897_v47 = vpop.eup %5896 }
 0xb51   :  { %v5899_v50 = vpop.eup %5898  ;;  %v2865_v15 = vadd.f32 1.0, %v5897_v47 }
 0xb53   :  { %5904 = vrcp.f32 %v2865_v15 }
 0xb54   :  { %v5901_v54 = vpop.eup %5900 }
 0xb55   :  { %v5903_v62 = vpop.eup %5902  ;;  %v2869_v63 = vmul.f32 %v5901_v54, %v5899_v50 }
 0xb56   :  { %v2868_v22 = vmul.f32 0.0, %v5903_v62 }
 0xb58   :  { %v7587_v17 = vadd.f32 %v2869_v63, %v2868_v22 }
 0xb5a   :  { %5906 = vtanh.f32 %v7587_v17 }
 0xb5d   :  { %v5905_v38 = vpop.eup %5904 }
 0xb64   :  { %v5907_v52 = vpop.eup %5906 }
 0xb65   :  { %v7590_v1 = vmul.f32 %v5907_v52, %v5905_v38 }
 0xb67   :  { %2950 = vmatmul.mubr.f32.vlgmr.msra.gmra.mrb[24].mxu0 %v7590_v1  ;;  %3021 = vmatmul.mubr.f32.vlgmr.msra.gmra.mrb[30].mxu1 %v7590_v1 }
 0xb68   :  { %5233 = vmatpush1.bf16.msra.mxu0 %v7237_v53  ;;  %5265 = vmatpush1.bf16.msra.mxu1 %v7313_v23 }
 0xb69   :  { %5235 = vmatprep.subr.bf16.mxu0 %v7252_v16  ;;  %5267 = vmatprep.subr.bf16.mxu1 %v7325_v56 }
 0xb6a   :  { %3123 = vmatprep.mubr.f32.mxu0 %v6048_v8  ;;  %3194 = vmatprep.mubr.f32.mxu1 %v6048_v8 }
 0xb6c   :  { %5237 = vmatpush1.bf16.msra.mxu0 %v7272_v41  ;;  %5269 = vmatpush1.bf16.msra.mxu1 %v7351_v7 }
 0xb6d   :  { %5239 = vmatprep.subr.bf16.mxu0 %v7283_v0  ;;  %5271 = vmatprep.subr.bf16.mxu1 %v7363_v59 }
 0xb70   :  { %5241 = vmatpush1.bf16.msra.mxu0 %v7311_v46  ;;  %5273 = vmatpush1.bf16.msra.mxu1 %v7388_v21 }
 0xb71   :  { %5243 = vmatprep.subr.bf16.mxu0 %v7323_v14  ;;  %5275 = vmatprep.subr.bf16.mxu1 %v7400_v39 }
 0xb74   :  { %5245 = vmatpush1.bf16.msra.mxu0 %v7349_v32  ;;  %5277 = vmatpush1.bf16.msra.mxu1 %v7424_v4 }
 0xb75   :  { %5247 = vmatprep.subr.bf16.mxu0 %v7361_v29  ;;  %5279 = vmatprep.subr.bf16.mxu1 %v7436_v34 }
 0xb78   :  { %5249 = vmatpush1.bf16.msra.mxu0 %v7386_v55  ;;  %5281 = vmatpush1.bf16.msra.mxu1 %v7460_v3 }
 0xb79   :  { %5251 = vmatprep.subr.bf16.mxu0 %v7398_v35  ;;  %5283 = vmatprep.subr.bf16.mxu1 %v7469_v26 }
 0xb7c   :  { %5253 = vmatpush1.bf16.msra.mxu0 %v7422_v2  ;;  %5285 = vmatpush1.bf16.msra.mxu1 %v7490_v31 }
 0xb7d   :  { %5255 = vmatprep.subr.bf16.mxu0 %v7434_v24  ;;  %5287 = vmatprep.subr.bf16.mxu1 %v7494_v20 }
 0xb80   :  { %5257 = vmatpush1.bf16.msra.mxu0 %v7458_v45  ;;  %5289 = vmatpush1.bf16.msra.mxu1 %v7510_v57 }
 0xb81   :  { %5259 = vmatprep.subr.bf16.mxu0 %v7467_v11  ;;  %5291 = vmatprep.subr.bf16.mxu1 %v7513_v43 }
 0xb84   :  { %5261 = vmatpush1.bf16.msra.mxu0 %v7488_v19  ;;  %5293 = vmatpush1.bf16.msra.mxu1 %v7524_v25 }
 0xb85   :  { %5295 = vmatprep.subr.bf16.mxu0 %v7196_v10  ;;  %5327 = vmatprep.subr.bf16.mxu1 %v7295_v5 }
 0xc3a   :  { %v2951_v61 = vpop.f32.mrb[24].mxu0  ;;  %v3022_v36 = vpop.f32.mrb[30].mxu1 }
 0xc3b   :  { %v2952_v12 = vadd.f32 %v2951_v61, %v2877_v9  ;;  %v3023_v48 = vadd.f32 %v3022_v36, %v2879_v6  ;;  %v2953_v44 = vpop.f32.mrb[25].mxu0  ;;  %v3024_v58 = vpop.f32.mrb[31].mxu1 }
 0xc3c   :  { %v2954_v13 = vadd.f32 %v2953_v44, %v2878_v60  ;;  %v3025_v18 = vadd.f32 %v3024_v58, %v2880_v28  ;;  %v3053_v28 = vrot.slane %v7581_v30, 2  ;;  %v3052_v44 = vrot.slane %v7573_v51, 2 }
 0xc3d   :  { %v4312_v33 = vmul.f32 -1.442695, %v2952_v12  ;;  %v3054_v58 = vrot.slane %v7583_v37, 2 }
 0xc3e   :  { %v4313_v49 = vmul.f32 -1.442695, %v2954_v13  ;;  %v4314_v42 = vmul.f32 -1.442695, %v3025_v18 }
 0xc3f   :  { %5908 = vpow2.f32 %v4312_v33 }
 0xc40   :  { %5910 = vpow2.f32 %v4313_v49 }
 0xc41   :  { %5912 = vpow2.f32 %v4314_v42 }
 0xc42   :  { %5914 = vtanh.f32 %v3023_v48 }
 0xc49   :  { %v5909_v27 = vpop.eup %5908 }
 0xc4a   :  { %v5911_v47 = vpop.eup %5910  ;;  %v3030_v50 = vadd.f32 1.0, %v5909_v27 }
 0xc4b   :  { %v3036_v54 = vadd.f32 1.0, %v5911_v47  ;;  %v5913_v62 = vpop.eup %5912 }
 0xc4c   :  { %5916 = vrcp.f32 %v3030_v50  ;;  %v5915_v63 = vpop.eup %5914  ;;  %v3043_v52 = vadd.f32 1.0, %v5913_v62 }
 0xc4d   :  { %5918 = vrcp.f32 %v3036_v54 }
 0xc4e   :  { %5920 = vrcp.f32 %v3043_v52 }
 0xc56   :  { %v5917_v15 = vpop.eup %5916 }
 0xc57   :  { %v5919_v22 = vpop.eup %5918  ;;  %v3047_v38 = vmul.f32 %v5917_v15, %v5915_v63 }
 0xc58   :  { %v3046_v9 = vmul.f32 %v5919_v22, %v7587_v17  ;;  %v5921_v61 = vpop.eup %5920  ;;  %v3051_v17 = vrot.slane %v7571_v40, 2 }
 0xc5a   :  { %v7633_v6 = vadd.f32 %v3047_v38, %v3046_v9 }
 0xc5c   :  { %5922 = vtanh.f32 %v7633_v6 }
 0xc66   :  { %v5923_v36 = vpop.eup %5922 }
 0xc67   :  { %v7636_v60 = vmul.f32 %v5923_v36, %v5921_v61 }
 0xc69   :  { %3124 = vmatmul.mubr.f32.vlgmr.msra.gmra.mrb[26].mxu0 %v7636_v60  ;;  %3195 = vmatmul.mubr.f32.vlgmr.msra.gmra.mrb[32].mxu1 %v7636_v60 }
 0xc6a   :  { %5297 = vmatpush1.bf16.msra.mxu0 %v7237_v53  ;;  %5329 = vmatpush1.bf16.msra.mxu1 %v7313_v23 }
 0xc6b   :  { %5299 = vmatprep.subr.bf16.mxu0 %v7252_v16  ;;  %5331 = vmatprep.subr.bf16.mxu1 %v7325_v56 }
 0xc6c   :  { %3297 = vmatprep.mubr.f32.mxu0 %v6048_v8  ;;  %3368 = vmatprep.mubr.f32.mxu1 %v6048_v8 }
 0xc6e   :  { %5301 = vmatpush1.bf16.msra.mxu0 %v7272_v41  ;;  %5333 = vmatpush1.bf16.msra.mxu1 %v7351_v7 }
 0xc6f   :  { %5303 = vmatprep.subr.bf16.mxu0 %v7283_v0  ;;  %5335 = vmatprep.subr.bf16.mxu1 %v7363_v59 }
 0xc72   :  { %5305 = vmatpush1.bf16.msra.mxu0 %v7311_v46  ;;  %5337 = vmatpush1.bf16.msra.mxu1 %v7388_v21 }
 0xc73   :  { %5307 = vmatprep.subr.bf16.mxu0 %v7323_v14  ;;  %5339 = vmatprep.subr.bf16.mxu1 %v7400_v39 }
 0xc76   :  { %5309 = vmatpush1.bf16.msra.mxu0 %v7349_v32  ;;  %5341 = vmatpush1.bf16.msra.mxu1 %v7424_v4 }
 0xc77   :  { %5311 = vmatprep.subr.bf16.mxu0 %v7361_v29  ;;  %5343 = vmatprep.subr.bf16.mxu1 %v7436_v34 }
 0xc7a   :  { %5313 = vmatpush1.bf16.msra.mxu0 %v7386_v55  ;;  %5345 = vmatpush1.bf16.msra.mxu1 %v7460_v3 }
 0xc7b   :  { %5315 = vmatprep.subr.bf16.mxu0 %v7398_v35  ;;  %5347 = vmatprep.subr.bf16.mxu1 %v7469_v26 }
 0xc7e   :  { %5317 = vmatpush1.bf16.msra.mxu0 %v7422_v2  ;;  %5349 = vmatpush1.bf16.msra.mxu1 %v7490_v31 }
 0xc7f   :  { %5319 = vmatprep.subr.bf16.mxu0 %v7434_v24  ;;  %5351 = vmatprep.subr.bf16.mxu1 %v7494_v20 }
 0xc82   :  { %5321 = vmatpush1.bf16.msra.mxu0 %v7458_v45  ;;  %5353 = vmatpush1.bf16.msra.mxu1 %v7510_v57 }
 0xc83   :  { %5323 = vmatprep.subr.bf16.mxu0 %v7467_v11  ;;  %5355 = vmatprep.subr.bf16.mxu1 %v7513_v43 }
 0xc86   :  { %5325 = vmatpush1.bf16.msra.mxu0 %v7488_v19  ;;  %5357 = vmatpush1.bf16.msra.mxu1 %v7524_v25 }
 0xc87   :  { %5359 = vmatprep.subr.bf16.mxu0 %v7196_v10  ;;  %5391 = vmatprep.subr.bf16.mxu1 %v7295_v5 }
 0xd3c   :  { %v3125_v12 = vpop.f32.mrb[26].mxu0  ;;  %v3196_v48 = vpop.f32.mrb[32].mxu1 }
 0xd3d   :  { %v3126_v13 = vadd.f32 %v3125_v12, %v3051_v17  ;;  %v3197_v18 = vadd.f32 %v3196_v48, %v3053_v28  ;;  %v3127_v33 = vpop.f32.mrb[27].mxu0  ;;  %v3198_v49 = vpop.f32.mrb[33].mxu1 }
 0xd3e   :  { %v3128_v42 = vadd.f32 %v3127_v33, %v3052_v44  ;;  %v3199_v27 = vadd.f32 %v3198_v49, %v3054_v58  ;;  %v4096_v58 = vrot.slane %v7636_v60, 7  ;;  %v3227_v60 = vrot.slane %v7581_v30, 3 }
 0xd3f   :  { %v4315_v47 = vmul.f32 -1.442695, %v3126_v13 }
 0xd40   :  { %v4316_v50 = vmul.f32 -1.442695, %v3128_v42  ;;  %v4317_v54 = vmul.f32 -1.442695, %v3199_v27  ;;  %v4117_v33 = vsel %vm4116_vm9, %v7590_v1, %v4096_v58  ;;  %v3225_v1 = vrot.slane %v7571_v40, 3 }
 0xd41   :  { %5924 = vpow2.f32 %v4315_v47  ;;  %v3226_v27 = vrot.slane %v7573_v51, 3  ;;  %v3228_v47 = vrot.slane %v7583_v37, 3 }
 0xd42   :  { %5926 = vpow2.f32 %v4316_v50 }
 0xd43   :  { %5928 = vpow2.f32 %v4317_v54 }
 0xd44   :  { %5930 = vtanh.f32 %v3197_v18 }
 0xd4b   :  { %v5925_v62 = vpop.eup %5924 }
 0xd4c   :  { %v5927_v63 = vpop.eup %5926  ;;  %v3204_v15 = vadd.f32 1.0, %v5925_v62 }
 0xd4d   :  { %v3210_v22 = vadd.f32 1.0, %v5927_v63  ;;  %v5929_v38 = vpop.eup %5928 }
 0xd4e   :  { %5932 = vrcp.f32 %v3204_v15  ;;  %v5931_v52 = vpop.eup %5930  ;;  %v3217_v17 = vadd.f32 1.0, %v5929_v38 }
 0xd4f   :  { %5934 = vrcp.f32 %v3210_v22 }
 0xd50   :  { %5936 = vrcp.f32 %v3217_v17 }
 0xd58   :  { %v5933_v9 = vpop.eup %5932 }
 0xd59   :  { %v5935_v61 = vpop.eup %5934  ;;  %v3221_v36 = vmul.f32 %v5933_v9, %v5931_v52 }
 0xd5a   :  { %v3220_v28 = vmul.f32 %v5935_v61, %v7633_v6  ;;  %v5937_v48 = vpop.eup %5936 }
 0xd5c   :  { %v7679_v12 = vadd.f32 %v3221_v36, %v3220_v28 }
 0xd5e   :  { %5938 = vtanh.f32 %v7679_v12 }
 0xd68   :  { %v5939_v44 = vpop.eup %5938 }
 0xd69   :  { %v3224_v13 = vmul.f32 %v5939_v44, %v5937_v48 }
 0xd6b   :  { %3298 = vmatmul.mubr.f32.vlgmr.msra.gmra.mrb[28].mxu0 %v3224_v13  ;;  %v4099_v18 = vrot.slane %v3224_v13, 6  ;;  %3369 = vmatmul.mubr.f32.vlgmr.msra.gmra.mrb[34].mxu1 %v3224_v13 }
 0xd6c   :  { %5361 = vmatpush1.bf16.msra.mxu0 %v7237_v53  ;;  %5393 = vmatpush1.bf16.msra.mxu1 %v7313_v23 }
 0xd6d   :  { %5363 = vmatprep.subr.bf16.mxu0 %v7252_v16  ;;  %5395 = vmatprep.subr.bf16.mxu1 %v7325_v56  ;;  %v7688_v6 = vsel %vm4118_vm10, %v4117_v33, %v4099_v18 }
 0xd6e   :  { %3471 = vmatprep.mubr.f32.mxu0 %v6048_v8  ;;  %3542 = vmatprep.mubr.f32.mxu1 %v6048_v8 }
 0xd70   :  { %5365 = vmatpush1.bf16.msra.mxu0 %v7272_v41  ;;  %5397 = vmatpush1.bf16.msra.mxu1 %v7351_v7 }
 0xd71   :  { %5367 = vmatprep.subr.bf16.mxu0 %v7283_v0  ;;  %5399 = vmatprep.subr.bf16.mxu1 %v7363_v59 }
 0xd74   :  { %5369 = vmatpush1.bf16.msra.mxu0 %v7311_v46  ;;  %5401 = vmatpush1.bf16.msra.mxu1 %v7388_v21 }
 0xd75   :  { %5371 = vmatprep.subr.bf16.mxu0 %v7323_v14  ;;  %5403 = vmatprep.subr.bf16.mxu1 %v7400_v39 }
 0xd78   :  { %5373 = vmatpush1.bf16.msra.mxu0 %v7349_v32  ;;  %5405 = vmatpush1.bf16.msra.mxu1 %v7424_v4 }
 0xd79   :  { %5375 = vmatprep.subr.bf16.mxu0 %v7361_v29  ;;  %5407 = vmatprep.subr.bf16.mxu1 %v7436_v34 }
 0xd7c   :  { %5377 = vmatpush1.bf16.msra.mxu0 %v7386_v55  ;;  %5409 = vmatpush1.bf16.msra.mxu1 %v7460_v3 }
 0xd7d   :  { %5379 = vmatprep.subr.bf16.mxu0 %v7398_v35  ;;  %5411 = vmatprep.subr.bf16.mxu1 %v7469_v26 }
 0xd80   :  { %5381 = vmatpush1.bf16.msra.mxu0 %v7422_v2  ;;  %5413 = vmatpush1.bf16.msra.mxu1 %v7490_v31 }
 0xd81   :  { %5383 = vmatprep.subr.bf16.mxu0 %v7434_v24  ;;  %5415 = vmatprep.subr.bf16.mxu1 %v7494_v20 }
 0xd84   :  { %5385 = vmatpush1.bf16.msra.mxu0 %v7458_v45  ;;  %5417 = vmatpush1.bf16.msra.mxu1 %v7510_v57 }
 0xd85   :  { %5387 = vmatprep.subr.bf16.mxu0 %v7467_v11  ;;  %5419 = vmatprep.subr.bf16.mxu1 %v7513_v43 }
 0xd88   :  { %5389 = vmatpush1.bf16.msra.mxu0 %v7488_v19  ;;  %5421 = vmatpush1.bf16.msra.mxu1 %v7524_v25 }
 0xd89   :  { %5423 = vmatprep.subr.bf16.mxu0 %v7196_v10  ;;  %5455 = vmatprep.subr.bf16.mxu1 %v7295_v5 }
 0xe3e   :  { %v3299_v49 = vpop.f32.mrb[28].mxu0  ;;  %v3370_v42 = vpop.f32.mrb[34].mxu1 }
 0xe3f   :  { %v3300_v50 = vadd.f32 %v3299_v49, %v3225_v1  ;;  %v3371_v54 = vadd.f32 %v3370_v42, %v3227_v60  ;;  %v3301_v62 = vpop.f32.mrb[29].mxu0  ;;  %v3372_v63 = vpop.f32.mrb[35].mxu1 }
 0xe40   :  { %v3302_v15 = vadd.f32 %v3301_v62, %v3226_v27  ;;  %v3373_v22 = vadd.f32 %v3372_v63, %v3228_v47  ;;  %v3400_v63 = vrot.slane %v7573_v51, 4 }
 0xe41   :  { %v4318_v38 = vmul.f32 -1.442695, %v3300_v50  ;;  %v3401_v50 = vrot.slane %v7581_v30, 4 }
 0xe42   :  { %v4319_v52 = vmul.f32 -1.442695, %v3302_v15  ;;  %v4320_v9 = vmul.f32 -1.442695, %v3373_v22  ;;  %v3402_v15 = vrot.slane %v7583_v37, 4 }
 0xe43   :  { %5940 = vpow2.f32 %v4318_v38 }
 0xe44   :  { %5942 = vpow2.f32 %v4319_v52 }
 0xe45   :  { %5944 = vpow2.f32 %v4320_v9 }
 0xe46   :  { %5946 = vtanh.f32 %v3371_v54 }
 0xe4d   :  { %v5941_v61 = vpop.eup %5940 }
 0xe4e   :  { %v5943_v36 = vpop.eup %5942  ;;  %v3378_v17 = vadd.f32 1.0, %v5941_v61 }
 0xe4f   :  { %v3384_v28 = vadd.f32 1.0, %v5943_v36  ;;  %v5945_v48 = vpop.eup %5944 }
 0xe50   :  { %5948 = vrcp.f32 %v3378_v17  ;;  %v5947_v44 = vpop.eup %5946  ;;  %v3391_v33 = vadd.f32 1.0, %v5945_v48 }
 0xe51   :  { %5950 = vrcp.f32 %v3384_v28 }
 0xe52   :  { %5952 = vrcp.f32 %v3391_v33 }
 0xe5a   :  { %v5949_v58 = vpop.eup %5948 }
 0xe5b   :  { %v5951_v13 = vpop.eup %5950  ;;  %v3395_v18 = vmul.f32 %v5949_v58, %v5947_v44 }
 0xe5c   :  { %v3394_v1 = vmul.f32 %v5951_v13, %v7679_v12  ;;  %v5953_v49 = vpop.eup %5952 }
 0xe5e   :  { %v7725_v60 = vadd.f32 %v3395_v18, %v3394_v1 }
 0xe60   :  { %5954 = vtanh.f32 %v7725_v60 }
 0xe6a   :  { %v5955_v42 = vpop.eup %5954 }
 0xe6b   :  { %v3398_v27 = vmul.f32 %v5955_v42, %v5953_v49 }
 0xe6d   :  { %3472 = vmatmul.mubr.f32.vlgmr.msra.gmra.mrb[30].mxu0 %v3398_v27  ;;  %v4102_v47 = vrot.slane %v3398_v27, 5  ;;  %3543 = vmatmul.mubr.f32.vlgmr.msra.gmra.mrb[36].mxu1 %v3398_v27 }
 0xe6e   :  { %5425 = vmatpush1.bf16.msra.mxu0 %v7237_v53  ;;  %5457 = vmatpush1.bf16.msra.mxu1 %v7313_v23 }
 0xe6f   :  { %5427 = vmatprep.subr.bf16.mxu0 %v7252_v16  ;;  %5459 = vmatprep.subr.bf16.mxu1 %v7325_v56  ;;  %v7733_v12 = vsel %vm4120_vm11, %v7688_v6, %v4102_v47  ;;  %v3399_v6 = vrot.slane %v7571_v40, 4 }
 0xe70   :  { %3645 = vmatprep.mubr.f32.mxu0 %v6048_v8  ;;  %3716 = vmatprep.mubr.f32.mxu1 %v6048_v8 }
 0xe72   :  { %5429 = vmatpush1.bf16.msra.mxu0 %v7272_v41  ;;  %5461 = vmatpush1.bf16.msra.mxu1 %v7351_v7 }
 0xe73   :  { %5431 = vmatprep.subr.bf16.mxu0 %v7283_v0  ;;  %5463 = vmatprep.subr.bf16.mxu1 %v7363_v59 }
 0xe76   :  { %5433 = vmatpush1.bf16.msra.mxu0 %v7311_v46  ;;  %5465 = vmatpush1.bf16.msra.mxu1 %v7388_v21 }
 0xe77   :  { %5435 = vmatprep.subr.bf16.mxu0 %v7323_v14  ;;  %5467 = vmatprep.subr.bf16.mxu1 %v7400_v39 }
 0xe7a   :  { %5437 = vmatpush1.bf16.msra.mxu0 %v7349_v32  ;;  %5469 = vmatpush1.bf16.msra.mxu1 %v7424_v4 }
 0xe7b   :  { %5439 = vmatprep.subr.bf16.mxu0 %v7361_v29  ;;  %5471 = vmatprep.subr.bf16.mxu1 %v7436_v34 }
 0xe7e   :  { %5441 = vmatpush1.bf16.msra.mxu0 %v7386_v55  ;;  %5473 = vmatpush1.bf16.msra.mxu1 %v7460_v3 }
 0xe7f   :  { %5443 = vmatprep.subr.bf16.mxu0 %v7398_v35  ;;  %5475 = vmatprep.subr.bf16.mxu1 %v7469_v26 }
 0xe82   :  { %5445 = vmatpush1.bf16.msra.mxu0 %v7422_v2  ;;  %5477 = vmatpush1.bf16.msra.mxu1 %v7490_v31 }
 0xe83   :  { %5447 = vmatprep.subr.bf16.mxu0 %v7434_v24  ;;  %5479 = vmatprep.subr.bf16.mxu1 %v7494_v20 }
 0xe86   :  { %5449 = vmatpush1.bf16.msra.mxu0 %v7458_v45  ;;  %5481 = vmatpush1.bf16.msra.mxu1 %v7510_v57 }
 0xe87   :  { %5451 = vmatprep.subr.bf16.mxu0 %v7467_v11  ;;  %5483 = vmatprep.subr.bf16.mxu1 %v7513_v43 }
 0xe8a   :  { %5453 = vmatpush1.bf16.msra.mxu0 %v7488_v19  ;;  %5485 = vmatpush1.bf16.msra.mxu1 %v7524_v25 }
 0xe8b   :  { %5487 = vmatprep.subr.bf16.mxu0 %v7196_v10  ;;  %5519 = vmatprep.subr.bf16.mxu1 %v7295_v5 }
 0xf40   :  { %v3473_v54 = vpop.f32.mrb[30].mxu0  ;;  %v3544_v62 = vpop.f32.mrb[36].mxu1 }
 0xf41   :  { %v3474_v22 = vadd.f32 %v3473_v54, %v3399_v6  ;;  %v3545_v38 = vadd.f32 %v3544_v62, %v3401_v50  ;;  %v3475_v52 = vpop.f32.mrb[31].mxu0  ;;  %v3546_v9 = vpop.f32.mrb[37].mxu1 }
 0xf42   :  { %v3476_v61 = vadd.f32 %v3475_v52, %v3400_v63  ;;  %v3547_v36 = vadd.f32 %v3546_v9, %v3402_v15  ;;  %v3574_v9 = vrot.slane %v7573_v51, 5 }
 0xf43   :  { %v4321_v17 = vmul.f32 -1.442695, %v3474_v22  ;;  %v3575_v22 = vrot.slane %v7581_v30, 5 }
 0xf44   :  { %v4322_v28 = vmul.f32 -1.442695, %v3476_v61  ;;  %v4323_v48 = vmul.f32 -1.442695, %v3547_v36  ;;  %v3576_v61 = vrot.slane %v7583_v37, 5 }
 0xf45   :  { %5956 = vpow2.f32 %v4321_v17 }
 0xf46   :  { %5958 = vpow2.f32 %v4322_v28 }
 0xf47   :  { %5960 = vpow2.f32 %v4323_v48 }
 0xf48   :  { %5962 = vtanh.f32 %v3545_v38 }
 0xf4f   :  { %v5957_v44 = vpop.eup %5956 }
 0xf50   :  { %v5959_v58 = vpop.eup %5958  ;;  %v3552_v13 = vadd.f32 1.0, %v5957_v44 }
 0xf51   :  { %v3558_v18 = vadd.f32 1.0, %v5959_v58  ;;  %v5961_v33 = vpop.eup %5960 }
 0xf52   :  { %5964 = vrcp.f32 %v3552_v13  ;;  %v5963_v1 = vpop.eup %5962  ;;  %v3565_v47 = vadd.f32 1.0, %v5961_v33 }
 0xf53   :  { %5966 = vrcp.f32 %v3558_v18 }
 0xf54   :  { %5968 = vrcp.f32 %v3565_v47 }
 0xf5c   :  { %v5965_v49 = vpop.eup %5964 }
 0xf5d   :  { %v5967_v42 = vpop.eup %5966  ;;  %v3569_v27 = vmul.f32 %v5965_v49, %v5963_v1 }
 0xf5e   :  { %v3568_v6 = vmul.f32 %v5967_v42, %v7725_v60  ;;  %v5969_v54 = vpop.eup %5968 }
 0xf60   :  { %v7770_v50 = vadd.f32 %v3569_v27, %v3568_v6 }
 0xf62   :  { %5970 = vtanh.f32 %v7770_v50 }
 0xf6c   :  { %v5971_v62 = vpop.eup %5970 }
 0xf6d   :  { %v3572_v63 = vmul.f32 %v5971_v62, %v5969_v54 }
 0xf6f   :  { %3646 = vmatmul.mubr.f32.vlgmr.msra.gmra.mrb[32].mxu0 %v3572_v63  ;;  %v4105_v15 = vrot.slane %v3572_v63, 4  ;;  %3717 = vmatmul.mubr.f32.vlgmr.msra.gmra.mrb[38].mxu1 %v3572_v63 }
 0xf70   :  { %5489 = vmatpush1.bf16.msra.mxu0 %v7237_v53  ;;  %5521 = vmatpush1.bf16.msra.mxu1 %v7313_v23 }
 0xf71   :  { %5491 = vmatprep.subr.bf16.mxu0 %v7252_v16  ;;  %5523 = vmatprep.subr.bf16.mxu1 %v7325_v56  ;;  %v7779_v60 = vsel %vm2462_vm4, %v7733_v12, %v4105_v15  ;;  %v3573_v12 = vrot.slane %v7571_v40, 5 }
 0xf72   :  { %3819 = vmatprep.mubr.f32.mxu0 %v6048_v8  ;;  %3890 = vmatprep.mubr.f32.mxu1 %v6048_v8 }
 0xf74   :  { %5493 = vmatpush1.bf16.msra.mxu0 %v7272_v41  ;;  %5525 = vmatpush1.bf16.msra.mxu1 %v7351_v7 }
 0xf75   :  { %5495 = vmatprep.subr.bf16.mxu0 %v7283_v0  ;;  %5527 = vmatprep.subr.bf16.mxu1 %v7363_v59 }
 0xf78   :  { %5497 = vmatpush1.bf16.msra.mxu0 %v7311_v46  ;;  %5529 = vmatpush1.bf16.msra.mxu1 %v7388_v21 }
 0xf79   :  { %5499 = vmatprep.subr.bf16.mxu0 %v7323_v14  ;;  %5531 = vmatprep.subr.bf16.mxu1 %v7400_v39 }
 0xf7c   :  { %5501 = vmatpush1.bf16.msra.mxu0 %v7349_v32  ;;  %5533 = vmatpush1.bf16.msra.mxu1 %v7424_v4 }
 0xf7d   :  { %5503 = vmatprep.subr.bf16.mxu0 %v7361_v29  ;;  %5535 = vmatprep.subr.bf16.mxu1 %v7436_v34 }
 0xf80   :  { %5505 = vmatpush1.bf16.msra.mxu0 %v7386_v55  ;;  %5537 = vmatpush1.bf16.msra.mxu1 %v7460_v3 }
 0xf81   :  { %5507 = vmatprep.subr.bf16.mxu0 %v7398_v35  ;;  %5539 = vmatprep.subr.bf16.mxu1 %v7469_v26 }
 0xf84   :  { %5509 = vmatpush1.bf16.msra.mxu0 %v7422_v2  ;;  %5541 = vmatpush1.bf16.msra.mxu1 %v7490_v31 }
 0xf85   :  { %5511 = vmatprep.subr.bf16.mxu0 %v7434_v24  ;;  %5543 = vmatprep.subr.bf16.mxu1 %v7494_v20 }
 0xf88   :  { %5513 = vmatpush1.bf16.msra.mxu0 %v7458_v45  ;;  %5545 = vmatpush1.bf16.msra.mxu1 %v7510_v57 }
 0xf89   :  { %5515 = vmatprep.subr.bf16.mxu0 %v7467_v11  ;;  %5547 = vmatprep.subr.bf16.mxu1 %v7513_v43 }
 0xf8c   :  { %5517 = vmatpush1.bf16.msra.mxu0 %v7488_v19  ;;  %5549 = vmatpush1.bf16.msra.mxu1 %v7524_v25 }
 0xf8d   :  { %5551 = vmatprep.subr.bf16.mxu0 %v7196_v10  ;;  %5583 = vmatprep.subr.bf16.mxu1 %v7295_v5 }
0x1042   :  { %v3647_v38 = vpop.f32.mrb[32].mxu0  ;;  %v3718_v52 = vpop.f32.mrb[38].mxu1 }
0x1043   :  { %v3648_v36 = vadd.f32 %v3647_v38, %v3573_v12  ;;  %v3719_v17 = vadd.f32 %v3718_v52, %v3575_v22  ;;  %v3649_v28 = vpop.f32.mrb[33].mxu0  ;;  %v3720_v48 = vpop.f32.mrb[39].mxu1 }
0x1044   :  { %v3650_v44 = vadd.f32 %v3649_v28, %v3574_v9  ;;  %v3721_v58 = vadd.f32 %v3720_v48, %v3576_v61  ;;  %v4129_v61 = vld [vmem:[%s7946_s10] sm:$0xff]  ;;  %v6051_v28 = vmov 0.0|0.0   ;;  %v4131_v48 = vld [vmem:[%s7946_s10 + $0x10] sm:$0xff] }
0x1045   :  { %v4324_v13 = vmul.f32 -1.442695, %v3648_v36  ;;  %v4130_v36 = vld [vmem:[%s7946_s10 + $0x8] sm:$0xff] }
0x1046   :  { %v4325_v10 = vmul.f32 -1.442695, %v3650_v44  ;;  %v4326_v5 = vmul.f32 -1.442695, %v3721_v58  ;;  %v4132_v44 = vld [vmem:[%s7946_s10 + $0x18] sm:$0xff] }
0x1047   :  { %5972 = vpow2.f32 %v4324_v13  ;;  %v5618_v58 = vpack.c.bf16 %v4132_v44, %v4131_v48  ;;  %v4133_v13 = vld [vmem:[%s7946_s10 + $0x20] sm:$0xff] }
0x1048   :  { %5974 = vpow2.f32 %v4325_v10  ;;  %v4134_v10 = vld [vmem:[%s7946_s10 + $0x28] sm:$0xff] }
0x1049   :  { %5976 = vpow2.f32 %v4326_v5  ;;  %v5621_v5 = vpack.c.bf16 %v4134_v10, %v4133_v13 }
0x104a   :  { %5978 = vtanh.f32 %v3719_v17  ;;  %v5615_v17 = vpack.c.bf16 %v4130_v36, %v4129_v61 }
0x1051   :  { %v5973_v18 = vpop.eup %5972 }
0x1052   :  { %v5975_v33 = vpop.eup %5974  ;;  %v3726_v1 = vadd.f32 1.0, %v5973_v18  ;;  %v4135_v18 = vld [vmem:[%s7946_s10 + $0x30] sm:$0xff] }
0x1053   :  { %v3732_v49 = vadd.f32 1.0, %v5975_v33  ;;  %v5977_v42 = vpop.eup %5976  ;;  %v4136_v33 = vld [vmem:[%s7946_s10 + $0x38] sm:$0xff] }
0x1054   :  { %5980 = vrcp.f32 %v3726_v1  ;;  %v5979_v27 = vpop.eup %5978  ;;  %v3739_v62 = vadd.f32 1.0, %v5977_v42  ;;  %v5624_v1 = vpack.c.bf16 %v4136_v33, %v4135_v18  ;;  %v4138_v42 = vld [vmem:[%s7946_s10 + $0x48] sm:$0xff] }
0x1055   :  { %5982 = vrcp.f32 %v3732_v49  ;;  %v4137_v49 = vld [vmem:[%s7946_s10 + $0x40] sm:$0xff] }
0x1056   :  { %5984 = vrcp.f32 %v3739_v62  ;;  %v4141_v62 = vld [vmem:[%s7946_s10 + $0x60] sm:$0xff] }
0x105e   :  { %v5981_v47 = vpop.eup %5980 }
0x105f   :  { %v5983_v6 = vpop.eup %5982  ;;  %v3743_v54 = vmul.f32 %v5981_v47, %v5979_v27  ;;  %v5627_v27 = vpack.c.bf16 %v4138_v42, %v4137_v49  ;;  %v4139_v47 = vld [vmem:[%s7946_s10 + $0x50] sm:$0xff] }
0x1060   :  { %v3742_v63 = vmul.f32 %v5983_v6, %v7770_v50  ;;  %v5985_v12 = vpop.eup %5984  ;;  %v4140_v6 = vld [vmem:[%s7946_s10 + $0x58] sm:$0xff] }
0x1062   :  { %v7816_v15 = vadd.f32 %v3743_v54, %v3742_v63  ;;  %v5630_v54 = vpack.c.bf16 %v4140_v6, %v4139_v47 }
0x1064   :  { %5986 = vtanh.f32 %v7816_v15 }
0x106e   :  { %v5987_v22 = vpop.eup %5986 }
0x106f   :  { %v3746_v38 = vmul.f32 %v5987_v22, %v5985_v12  ;;  %v4144_v12 = vld [vmem:[%s7946_s10 + $0x78] sm:$0xff] }
0x1071   :  { %3820 = vmatmul.mubr.f32.vlgmr.msra.gmra.mrb[34].mxu0 %v3746_v38  ;;  %v4108_v52 = vrot.slane %v3746_v38, 3  ;;  %3891 = vmatmul.mubr.f32.vlgmr.msra.gmra.mrb[40].mxu1 %v3746_v38  ;;  %v3921_v38 = vrot.slane %v7571_v40, 7 }
0x1072   :  { %5553 = vmatpush1.bf16.msra.mxu0 %v7237_v53  ;;  %5585 = vmatpush1.bf16.msra.mxu1 %v7313_v23  ;;  %v3747_v53 = vrot.slane %v7571_v40, 6  ;;  %v3750_v23 = vrot.slane %v7583_v37, 6 }
0x1073   :  { %5555 = vmatprep.subr.bf16.mxu0 %v7252_v16  ;;  %5587 = vmatprep.subr.bf16.mxu1 %v7325_v56  ;;  %v7824_v50 = vsel %vm4123_vm12, %v7779_v60, %v4108_v52  ;;  %v3749_v16 = vrot.slane %v7581_v30, 6  ;;  %v3923_v52 = vrot.slane %v7581_v30, 7 }
0x1074   :  { %3993 = vmatprep.mubr.f32.mxu0 %v6048_v8  ;;  %4064 = vmatprep.mubr.f32.mxu1 %v6048_v8 }
0x1076   :  { %5557 = vmatpush1.bf16.msra.mxu0 %v7272_v41  ;;  %5589 = vmatpush1.bf16.msra.mxu1 %v7351_v7 }
0x1077   :  { %5559 = vmatprep.subr.bf16.mxu0 %v7283_v0  ;;  %5591 = vmatprep.subr.bf16.mxu1 %v7363_v59 }
0x107a   :  { %5561 = vmatpush1.bf16.msra.mxu0 %v7311_v46  ;;  %5593 = vmatpush1.bf16.msra.mxu1 %v7388_v21  ;;  %v3748_v46 = vrot.slane %v7573_v51, 6 }
0x107b   :  { %5563 = vmatprep.subr.bf16.mxu0 %v7323_v14  ;;  %5595 = vmatprep.subr.bf16.mxu1 %v7400_v39 }
0x107e   :  { %5565 = vmatpush1.bf16.msra.mxu0 %v7349_v32  ;;  %5597 = vmatpush1.bf16.msra.mxu1 %v7424_v4 }
0x107f   :  { %5567 = vmatprep.subr.bf16.mxu0 %v7361_v29  ;;  %5599 = vmatprep.subr.bf16.mxu1 %v7436_v34 }
0x1082   :  { %5569 = vmatpush1.bf16.msra.mxu0 %v7386_v55  ;;  %5601 = vmatpush1.bf16.msra.mxu1 %v7460_v3 }
0x1083   :  { %5571 = vmatprep.subr.bf16.mxu0 %v7398_v35  ;;  %5603 = vmatprep.subr.bf16.mxu1 %v7469_v26 }
0x1086   :  { %5573 = vmatpush1.bf16.msra.mxu0 %v7422_v2  ;;  %5605 = vmatpush1.bf16.msra.mxu1 %v7490_v31 }
0x1087   :  { %5575 = vmatprep.subr.bf16.mxu0 %v7434_v24  ;;  %5607 = vmatprep.subr.bf16.mxu1 %v7494_v20 }
0x108a   :  { %5577 = vmatpush1.bf16.msra.mxu0 %v7458_v45  ;;  %5609 = vmatpush1.bf16.msra.mxu1 %v7510_v57 }
0x108b   :  { %5579 = vmatprep.subr.bf16.mxu0 %v7467_v11  ;;  %5611 = vmatprep.subr.bf16.mxu1 %v7513_v43 }
0x108e   :  { %5581 = vmatpush1.bf16.msra.mxu0 %v7488_v19  ;;  %5613 = vmatpush1.bf16.msra.mxu1 %v7524_v25 }
0x108f   :  { %5614 = vmatprep.subr.bf16.mxu0 %v6051_v28 }
0x1144   :  { %v3821_v41 = vpop.f32.mrb[34].mxu0  ;;  %v3892_v0 = vpop.f32.mrb[40].mxu1 }
0x1145   :  { %v3822_v14 = vadd.f32 %v3821_v41, %v3747_v53  ;;  %v3893_v56 = vadd.f32 %v3892_v0, %v3749_v16  ;;  %v3823_v32 = vpop.f32.mrb[35].mxu0  ;;  %v3894_v7 = vpop.f32.mrb[41].mxu1  ;;  %v3922_v16 = vrot.slane %v7573_v51, 7  ;;  %v3924_v41 = vrot.slane %v7583_v37, 7 }
0x1146   :  { %v3824_v29 = vadd.f32 %v3823_v32, %v3748_v46  ;;  %v3895_v59 = vadd.f32 %v3894_v7, %v3750_v23 }
0x1147   :  { %v4327_v55 = vmul.f32 -1.442695, %v3822_v14 }
0x1148   :  { %v4328_v21 = vmul.f32 -1.442695, %v3824_v29  ;;  %v4329_v35 = vmul.f32 -1.442695, %v3895_v59 }
0x1149   :  { %5988 = vpow2.f32 %v4327_v55 }
0x114a   :  { %5990 = vpow2.f32 %v4328_v21 }
0x114b   :  { %5992 = vpow2.f32 %v4329_v35 }
0x114c   :  { %5994 = vtanh.f32 %v3893_v56 }
0x1153   :  { %v5989_v39 = vpop.eup %5988 }
0x1154   :  { %v5991_v2 = vpop.eup %5990  ;;  %v3900_v4 = vadd.f32 1.0, %v5989_v39 }
0x1155   :  { %v3906_v24 = vadd.f32 1.0, %v5991_v2  ;;  %v5993_v34 = vpop.eup %5992 }
0x1156   :  { %5996 = vrcp.f32 %v3900_v4  ;;  %v5995_v45 = vpop.eup %5994  ;;  %v3913_v19 = vadd.f32 1.0, %v5993_v34 }
0x1157   :  { %5998 = vrcp.f32 %v3906_v24 }
0x1158   :  { %6000 = vrcp.f32 %v3913_v19 }
0x1160   :  { %v5997_v3 = vpop.eup %5996 }
0x1161   :  { %v5999_v11 = vpop.eup %5998  ;;  %v3917_v26 = vmul.f32 %v5997_v3, %v5995_v45 }
0x1162   :  { %v3916_v31 = vmul.f32 %v5999_v11, %v7816_v15  ;;  %v6001_v57 = vpop.eup %6000  ;;  %v4143_v15 = vld [vmem:[%s7946_s10 + $0x70] sm:$0xff] }
0x1163   :  { %v5636_v22 = vpack.c.bf16 %v4144_v12, %v4143_v15 }
0x1164   :  { %v7859_v20 = vadd.f32 %v3917_v26, %v3916_v31  ;;  %v7954_v31 = vlaneseq }
0x1166   :  { %6002 = vtanh.f32 %v7859_v20 }
0x1170   :  { %v6003_v43 = vpop.eup %6002 }
0x1171   :  { %v3920_v25 = vmul.f32 %v6003_v43, %v6001_v57  ;;  %v4223_v57 = vand.u32 127, %v7954_v31  ;;  %v4333_v43 = vld [vmem:[%s7947_s11] ss:$0 sm:$0xff]  ;;  %s6024_s11 = scalar_lea.vmem %s4244_s0, 128 }
0x1172   :  { %p6025_p0 = scmp.ne.s32.totalorder %s4244_s0, %s6024_s11  ;;  %p6030_p2 = scmp.lt.s32.totalorder %s6024_s11, %s6024_s11 }
0x1173   :  { %3994 = vmatmul.mubr.f32.vlgmr.msra.gmra.mrb[36].mxu0 %v3920_v25  ;;  %4065 = vmatmul.mubr.f32.vlgmr.msra.gmra.mrb[42].mxu1 %v3920_v25  ;;  %v4111_v60 = vrot.slane %v3920_v25, 2  ;;  %vm4224_vm0 = vcmp.lt.s32.totalorder %v4223_v57, 6 }
0x1174   :  { %5616 = vmatpush3.bf16.msra.mxu0 %v5615_v17  ;;  %4383 = vmatprep.mubr.msk.f32.mxu0 %vm6052_vm14, %v6048_v8  ;;  %v4142_v8 = vld [vmem:[%s7946_s10 + $0x68] sm:$0xff]  ;;  %p6031_p3 = por %p6030_p2, %p6029_p1 }
0x1175   :  { %v7863_v9 = vsel %vm4125_vm13, %v7824_v50, %v4111_v60  ;;  %5617 = vmatprep.subr.bf16.mxu0 %v6051_v28  ;;  %v5633_v63 = vpack.c.bf16 %v4142_v8, %v4141_v62 }
0x1176   :  { %p6032_p4 = pnand %p6031_p3, %p6025_p0 }
0x1178   :  { %5619 = vmatpush3.bf16.msra.mxu0 %v5618_v58 }
0x1179   :  { %5620 = vmatprep.subr.bf16.mxu0 %v6051_v28 }
0x117c   :  { %5622 = vmatpush3.bf16.msra.mxu0 %v5621_v5 }
0x117d   :  { %5623 = vmatprep.subr.bf16.mxu0 %v6051_v28 }
0x1180   :  { %5625 = vmatpush3.bf16.msra.mxu0 %v5624_v1 }
0x1181   :  { %5626 = vmatprep.subr.bf16.mxu0 %v6051_v28 }
0x1184   :  { %5628 = vmatpush3.bf16.msra.mxu0 %v5627_v27 }
0x1185   :  { %5629 = vmatprep.subr.bf16.mxu0 %v6051_v28 }
0x1188   :  { %5631 = vmatpush3.bf16.msra.mxu0 %v5630_v54 }
0x1189   :  { %5632 = vmatprep.subr.bf16.mxu0 %v6051_v28 }
0x118c   :  { %5634 = vmatpush3.bf16.msra.mxu0 %v5633_v63 }
0x118d   :  { %5635 = vmatprep.subr.bf16.mxu0 %v6051_v28 }
0x1190   :  { %5637 = vmatpush3.bf16.msra.mxu0 %v5636_v22 }
0x1246   :  { %v3995_v50 = vpop.f32.mrb[36].mxu0  ;;  %v4066_v53 = vpop.f32.mrb[42].mxu1 }
0x1247   :  { %v3996_v0 = vadd.f32 %v3995_v50, %v3921_v38  ;;  %v4067_v46 = vadd.f32 %v4066_v53, %v3923_v52  ;;  %v3997_v23 = vpop.f32.mrb[37].mxu0  ;;  %v4068_v14 = vpop.f32.mrb[43].mxu1 }
0x1248   :  { %v3998_v56 = vadd.f32 %v3997_v23, %v3922_v16  ;;  %v4069_v32 = vadd.f32 %v4068_v14, %v3924_v41 }
0x1249   :  { %v4330_v7 = vmul.f32 -1.442695, %v3996_v0 }
0x124a   :  { %v4331_v29 = vmul.f32 -1.442695, %v3998_v56  ;;  %v4332_v59 = vmul.f32 -1.442695, %v4069_v32 }
0x124b   :  { %6004 = vpow2.f32 %v4330_v7 }
0x124c   :  { %6006 = vpow2.f32 %v4331_v29 }
0x124d   :  { %6008 = vpow2.f32 %v4332_v59 }
0x124e   :  { %6010 = vtanh.f32 %v4067_v46 }
0x1255   :  { %v6005_v40 = vpop.eup %6004 }
0x1256   :  { %v6007_v55 = vpop.eup %6006  ;;  %v4074_v30 = vadd.f32 1.0, %v6005_v40 }
0x1257   :  { %v4080_v21 = vadd.f32 1.0, %v6007_v55  ;;  %v6009_v51 = vpop.eup %6008 }
0x1258   :  { %6012 = vrcp.f32 %v4074_v30  ;;  %v6011_v37 = vpop.eup %6010  ;;  %v4087_v4 = vadd.f32 1.0, %v6009_v51 }
0x1259   :  { %6014 = vrcp.f32 %v4080_v21 }
0x125a   :  { %6016 = vrcp.f32 %v4087_v4 }
0x1262   :  { %v6013_v35 = vpop.eup %6012 }
0x1263   :  { %v6015_v39 = vpop.eup %6014  ;;  %v4091_v2 = vmul.f32 %v6013_v35, %v6011_v37 }
0x1264   :  { %v4090_v24 = vmul.f32 %v6015_v39, %v7859_v20  ;;  %v6017_v45 = vpop.eup %6016 }
0x1266   :  { %v4092_v34 = vadd.f32 %v4091_v2, %v4090_v24 }
0x1268   :  { %6018 = vtanh.f32 %v4092_v34 }
0x1272   :  { %v6019_v3 = vpop.eup %6018 }
0x1273   :  { %v4094_v11 = vmul.f32 %v6019_v3, %v6017_v45 }
0x1275   :  { %v4114_v26 = vrot.slane %v4094_v11, 1 }
0x1277   :  { %v4128_v19 = vsel %vm4127_vm15, %v7863_v9, %v4114_v26 }
0x1278   :  { %4384 = vmatmul.mubr.f32.vlgmr.msra.gmra.mrb[38].mxu0 %v4128_v19 }
0x134b   :  { %v4218_v25 = vpop.f32.mrb[38].mxu0 }
0x134c   :  { %v4219_v20 = vadd.f32 %v4333_v43, %v4218_v25  ;;  %v4385_v60 = vpop.f32.mrb[39].mxu0 }
0x134e   :  { %v4225_v61 = vsel %vm4224_vm0, %v4219_v20, -1e+30 }
0x134f   :  { %4226 = vmax.xlane.f32.xlu0 %v4225_v61 }
0x13dc   :  { %v4227_v36 = vpop.xlane.xlu0 %4226 }
0x13dd   :  { %v4228_v17 = vsub.f32 %v4225_v61, %v4227_v36 }
0x13df   :  { %v4229_v28 = vmul.f32 1.442695, %v4228_v17 }
0x13e1   :  { %6020 = vpow2.f32 %v4229_v28 }
0x13eb   :  { %v6021_v48 = vpop.eup %6020 }
0x13ec   :  { %4231 = vadd.xlane.f32.xlu1 %v6021_v48 }
0x1479   :  { %v4232_v9 = vpop.xlane.xlu1 %4231 }
0x147a   :  { %6022 = vlog2.f32 %v4232_v9 }
0x1484   :  { %v6023_v44 = vpop.eup %6022 }
0x1485   :  { %v4234_v58 = vmul.f32 0.6931472, %v6023_v44 }
0x1487   :  { %v4235_v13 = vsub.f32 %v4228_v17, %v4234_v58 }
0x1489   :  { %4236 = vst [vmem:[#allocation3] sm:$0xff] %v4235_v13 }
0x148a   :  { %6035 = shalt.err (!%p6032_p4)
}
0x148b   :  { %s6036_s19 = scalar_lea.hbm %s7948_s12, 128 }
0x148c   :  { %p6037_p5 = scmp.ne.s32.totalorder %s7948_s12, %s6036_s19  ;;  %p6040_p6 = scmp.lt.u32.totalorder %s6036_s19, %s7948_s12 }
0x148e   :  { %p6042_p7 = pnand %p6040_p6, %p6037_p5 }
0x1490   :  { %6045 = shalt.err (!%p6042_p7)
}
0x1491   :  { %4246 = dma.vmem_to_hbm [thread:$0]  %s4244_s0, 128, %s7948_s12, [#allocation4]  }
0x1492   :  { %6046 = dma.done.wait [#allocation4], 128  }
0x1493   :  { %6047 = vsyncadd [#allocation4], 4294967168 }
0x1494   :  { %4250 = vsyncpa [#allocation4], 1 }

</bundles_post_ra>
